<compile_context>
chip_gen: v6e
topology: v6e:2x2x1
jax: 0.10.0
libtpu: 0.0.40
codegen_flags: <defaults>
</compile_context>

<pallas_src>
import jax
import jax.numpy as jnp
from jax import lax
from jax.experimental import pallas as pl
from jax.experimental.pallas import tpu as pltpu

C_IN, C_OUT, L = 5, 64, 64
H1, H2 = 50, 1
FLAT = C_OUT * L          # 4096 = 64 * 64, matches nn.Linear(64 * 64, 50)
KC = C_IN + 1             # conv contraction dim with the bias column folded in
N_CHAINS = 8              # independent fc1 accumulator chains


def fused_forward_kernel(x_ref, wc_ref, w1_ref, aux_ref, o_ref):
    # ---- conv1d(kernel_size=1) + bias + ReLU -------------------------------
    # Bias is folded into the matmul: x carries a ones row, wc a bias column.
    h = jnp.dot(wc_ref[...], x_ref[...],
                preferred_element_type=jnp.float32,
                precision=lax.Precision.HIGHEST)           # (C_OUT, L) f32
    h = jnp.maximum(h, 0.0)
    h_bf = h.astype(jnp.bfloat16)                          # one whole-tile cast

    # ---- fc1: z1[n] = sum_{c,l} h[c,l] * W1T[c*L + l, n] --------------------
    # The view(-1) flatten is pure index arithmetic on the pre-transposed fc1
    # weight.  64 independent (1,L)@(L,H1) partials; 8 interleaved chains keep
    # vreg pressure low while leaving the MXU pushes free of a serial chain.
    chains = [None] * N_CHAINS
    for c in range(C_OUT):                                 # statically unrolled
        part = jnp.dot(h_bf[c:c + 1, :],                   # (1, L)  bf16
                       w1_ref[pl.ds(c * L, L), :],         # (L, H1) bf16
                       preferred_element_type=jnp.float32)
        j = c % N_CHAINS
        chains[j] = part if chains[j] is None else chains[j] + part
    while len(chains) > 1:                                 # tree: 8 -> 4 -> 2 -> 1
        chains = [chains[i] + chains[i + 1] for i in range(0, len(chains), 2)]
    acc = chains[0]                                        # (1, H1) f32

    # ---- fc1 bias + ReLU, then fc2 on the VPU -------------------------------
    aux = aux_ref[...]                                     # (3, 128) f32
    b1 = aux[0:1, :H1]                                     # (1, H1) fc1 bias
    w2 = aux[1:2, :H1]                                     # (1, H1) fc2 weight
    b2 = aux[2:3, 0:1]                                     # (1, 1)  fc2 bias

    z1 = jnp.maximum(acc + b1, 0.0)                        # (1, H1)
    out = jnp.sum(z1 * w2, axis=-1, keepdims=True) + b2    # VPU mul + lane reduce
    o_ref[...] = out                                       # (1, 1)


def cnn_forecastnet_forward(x_ncl, kernel_params):
    """x_ncl: (1, C_IN, L) f32.  kernel_params: output of prepare_params()."""
    wc_aug, w1t, aux = kernel_params
    assert x_ncl.shape == (1, C_IN, L)
    # Append the ones row that carries the folded conv bias.
    x_aug = jnp.concatenate(
        [x_ncl[0], jnp.ones((1, L), x_ncl.dtype)], axis=0)  # (6, 64)

    full = lambda i: (0, 0)
    out = pl.pallas_call(
        fused_forward_kernel,
        out_shape=jax.ShapeDtypeStruct((1, H2), jnp.float32),
        grid=(1,),
        in_specs=[
            pl.BlockSpec((KC, L), full),                   # x (+ones row)  (6, 64)   f32
            pl.BlockSpec((C_OUT, KC), full),               # conv W|bias    (64, 6)   f32
            pl.BlockSpec((FLAT, H1), full),                # fc1 weight^T   (4096, 50) bf16
            pl.BlockSpec((3, 128), full),                  # packed aux     (3, 128)  f32
        ],
        out_specs=pl.BlockSpec((1, H2), full),
        compiler_params=pltpu.CompilerParams(
            dimension_semantics=("arbitrary",)),
        cost_estimate=pl.CostEstimate(
            flops=2 * (C_OUT * KC * L + FLAT * H1 + H1),
            transcendentals=0,
            bytes_accessed=(KC * L + C_OUT * KC + 3 * 128 + H2) * 4
                           + FLAT * H1 * 2),
    )(x_aug, wc_aug, w1t, aux)

    return out[0]    # (1,), same as the PyTorch module on a (1, 5, 64) input


def init_torch_params(key):
    """Deterministic synthetic parameters in the PyTorch layouts."""
    ks = jax.random.split(key, 6)
    conv_w = jax.random.normal(ks[0], (C_OUT, C_IN, 1), jnp.float32) * 0.1
    conv_b = jax.random.normal(ks[1], (C_OUT,), jnp.float32) * 0.1
    fc1_w = jax.random.normal(ks[2], (H1, FLAT), jnp.float32) * 0.02
    fc1_b = jax.random.normal(ks[3], (H1,), jnp.float32) * 0.1
    fc2_w = jax.random.normal(ks[4], (H2, H1), jnp.float32) * 0.1
    fc2_b = jax.random.normal(ks[5], (H2,), jnp.float32) * 0.1
    return conv_w, conv_b, fc1_w, fc1_b, fc2_w, fc2_b


def prepare_params(torch_params):
    """PyTorch layouts -> kernel layouts (one-time host-side work)."""
    conv_w, conv_b, fc1_w, fc1_b, fc2_w, fc2_b = torch_params
    # Conv weight with the bias folded in as an extra column (pairs with the
    # ones row appended to x): h = [Wc | bc] @ [x ; 1].
    wc_aug = jnp.concatenate([conv_w[:, :, 0], conv_b[:, None]], axis=1)  # (64, 6)
    # fc1 weight transposed so row c*L + l pairs with h[c, l]; bf16 halves the
    # dominant HBM stream (f32 accumulation stays in-kernel).
    w1t = fc1_w.T.astype(jnp.bfloat16)                                    # (4096, 50)
    # Remaining small operands packed into one lane-dense (3, 128) f32 array.
    aux = jnp.zeros((3, 128), jnp.float32)
    aux = aux.at[0, :H1].set(fc1_b)                 # fc1 bias
    aux = aux.at[1, :H1].set(fc2_w.reshape(-1))     # fc2 weight (as a lane row)
    aux = aux.at[2, 0].set(fc2_b[0])                # fc2 bias
    return wc_aug, w1t, aux


def reference_forward(x_ncl, torch_params):
    """Pure-JAX reference mirroring the PyTorch forward, with the same bf16
    rounding points (fc1 weight + fc1 activation input) as the kernel."""
    conv_w, conv_b, fc1_w, fc1_b, fc2_w, fc2_b = torch_params
    hp = lax.Precision.HIGHEST
    h = jnp.dot(conv_w[:, :, 0], x_ncl[0], precision=hp) + conv_b[:, None]
    h = jnp.maximum(h, 0.0)                                            # (64, 64)
    hf = h.astype(jnp.bfloat16).astype(jnp.float32).reshape(-1)        # view(-1)
    w1q = fc1_w.astype(jnp.bfloat16).astype(jnp.float32)
    z1 = jnp.maximum(jnp.dot(w1q, hf, precision=hp) + fc1_b, 0.0)      # (50,)
    return jnp.dot(fc2_w, z1, precision=hp) + fc2_b                    # (1,)


if __name__ == "__main__":
    key = jax.random.PRNGKey(0)
    kx, kp = jax.random.split(key)
    x = jax.random.normal(kx, (1, C_IN, L), jnp.float32)   # NCL, N*L = 64
    torch_params = init_torch_params(kp)
    kernel_params = prepare_params(torch_params)

    y = cnn_forecastnet_forward(x, kernel_params)
    y = jax.block_until_ready(y)

    y_ref = reference_forward(x, torch_params)
    assert y.shape == (1,), y.shape
    assert jnp.allclose(y, y_ref, atol=1e-3, rtol=1e-3), (y, y_ref)
    print("KERNEL_OK")
</pallas_src>

<mosaic_0001>
module attributes {stable_mosaic.version = 11 : i64} {
  func.func @fused_forward_kernel(%arg0: i32, %arg1: memref<6x64xf32, #tpu.memory_space<vmem>>, %arg2: memref<64x6xf32, #tpu.memory_space<vmem>>, %arg3: memref<4096x50xbf16, #tpu.memory_space<vmem>>, %arg4: memref<3x128xf32, #tpu.memory_space<vmem>>, %arg5: memref<1x1xf32, #tpu.memory_space<vmem>>) attributes {dimension_semantics = [#tpu.dimension_semantics<arbitrary>], iteration_bounds = array<i64: 1>, scalar_prefetch = 0 : i64, scratch_operands = 0 : i64, tpu.core_type = #tpu.core_type<tc>, window_params = [{pipeline_mode = #tpu.pipeline_mode<synchronous>, transform_indices = @transform_0, window_bounds = array<i64: 6, 64>}, {pipeline_mode = #tpu.pipeline_mode<synchronous>, transform_indices = @transform_1, window_bounds = array<i64: 64, 6>}, {pipeline_mode = #tpu.pipeline_mode<synchronous>, transform_indices = @transform_2, window_bounds = array<i64: 4096, 50>}, {pipeline_mode = #tpu.pipeline_mode<synchronous>, transform_indices = @transform_3, window_bounds = array<i64: 3, 128>}, {pipeline_mode = #tpu.pipeline_mode<synchronous>, transform_indices = @transform_4, window_bounds = array<i64: 1, 1>}]} {
    %c0 = arith.constant 0 : index
    %c0_0 = arith.constant 0 : index
    %0 = vector.load %arg2[%c0, %c0_0] : memref<64x6xf32, #tpu.memory_space<vmem>>, vector<64x6xf32>
    %c0_1 = arith.constant 0 : index
    %c0_2 = arith.constant 0 : index
    %1 = vector.load %arg1[%c0_1, %c0_2] : memref<6x64xf32, #tpu.memory_space<vmem>>, vector<6x64xf32>
    %cst = arith.constant dense<0.000000e+00> : vector<64x64xf32>
    %2 = tpu.matmul %0, %1, %cst {dimension_numbers = #tpu.dot_dimension_numbers<[1], [0], [0], [1], [0, 0, 1, 1], [], []>, precision = #tpu.contract_precision<fp32>} : vector<64x6xf32>, vector<6x64xf32>, vector<64x64xf32> -> vector<64x64xf32>
    %cst_3 = arith.constant 0.000000e+00 : f32
    %3 = vector.broadcast %cst_3 : f32 to vector<64x64xf32>
    %4 = arith.maximumf %2, %3 : vector<64x64xf32>
    %5 = arith.truncf %4 : vector<64x64xf32> to vector<64x64xbf16>
    %6 = vector.extract_strided_slice %5 {offsets = [0, 0], sizes = [1, 64], strides = [1, 1]} : vector<64x64xbf16> to vector<1x64xbf16>
    %c0_4 = arith.constant 0 : index
    %c0_5 = arith.constant 0 : index
    %7 = vector.load %arg3[%c0_4, %c0_5] : memref<4096x50xbf16, #tpu.memory_space<vmem>>, vector<64x50xbf16>
    %cst_6 = arith.constant dense<0.000000e+00> : vector<1x50xf32>
    %8 = tpu.matmul %6, %7, %cst_6 {dimension_numbers = #tpu.dot_dimension_numbers<[1], [0], [0], [1], [0, 0, 1, 1], [], []>} : vector<1x64xbf16>, vector<64x50xbf16>, vector<1x50xf32> -> vector<1x50xf32>
    %9 = vector.extract_strided_slice %5 {offsets = [1, 0], sizes = [1, 64], strides = [1, 1]} : vector<64x64xbf16> to vector<1x64xbf16>
    %c64 = arith.constant 64 : index
    %c0_7 = arith.constant 0 : index
    %10 = vector.load %arg3[%c64, %c0_7] : memref<4096x50xbf16, #tpu.memory_space<vmem>>, vector<64x50xbf16>
    %cst_8 = arith.constant dense<0.000000e+00> : vector<1x50xf32>
    %11 = tpu.matmul %9, %10, %cst_8 {dimension_numbers = #tpu.dot_dimension_numbers<[1], [0], [0], [1], [0, 0, 1, 1], [], []>} : vector<1x64xbf16>, vector<64x50xbf16>, vector<1x50xf32> -> vector<1x50xf32>
    %12 = vector.extract_strided_slice %5 {offsets = [2, 0], sizes = [1, 64], strides = [1, 1]} : vector<64x64xbf16> to vector<1x64xbf16>
    %c128 = arith.constant 128 : index
    %c0_9 = arith.constant 0 : index
    %13 = vector.load %arg3[%c128, %c0_9] : memref<4096x50xbf16, #tpu.memory_space<vmem>>, vector<64x50xbf16>
    %cst_10 = arith.constant dense<0.000000e+00> : vector<1x50xf32>
    %14 = tpu.matmul %12, %13, %cst_10 {dimension_numbers = #tpu.dot_dimension_numbers<[1], [0], [0], [1], [0, 0, 1, 1], [], []>} : vector<1x64xbf16>, vector<64x50xbf16>, vector<1x50xf32> -> vector<1x50xf32>
    %15 = vector.extract_strided_slice %5 {offsets = [3, 0], sizes = [1, 64], strides = [1, 1]} : vector<64x64xbf16> to vector<1x64xbf16>
    %c192 = arith.constant 192 : index
    %c0_11 = arith.constant 0 : index
    %16 = vector.load %arg3[%c192, %c0_11] : memref<4096x50xbf16, #tpu.memory_space<vmem>>, vector<64x50xbf16>
    %cst_12 = arith.constant dense<0.000000e+00> : vector<1x50xf32>
    %17 = tpu.matmul %15, %16, %cst_12 {dimension_numbers = #tpu.dot_dimension_numbers<[1], [0], [0], [1], [0, 0, 1, 1], [], []>} : vector<1x64xbf16>, vector<64x50xbf16>, vector<1x50xf32> -> vector<1x50xf32>
    %18 = vector.extract_strided_slice %5 {offsets = [4, 0], sizes = [1, 64], strides = [1, 1]} : vector<64x64xbf16> to vector<1x64xbf16>
    %c256 = arith.constant 256 : index
    %c0_13 = arith.constant 0 : index
    %19 = vector.load %arg3[%c256, %c0_13] : memref<4096x50xbf16, #tpu.memory_space<vmem>>, vector<64x50xbf16>
    %cst_14 = arith.constant dense<0.000000e+00> : vector<1x50xf32>
    %20 = tpu.matmul %18, %19, %cst_14 {dimension_numbers = #tpu.dot_dimension_numbers<[1], [0], [0], [1], [0, 0, 1, 1], [], []>} : vector<1x64xbf16>, vector<64x50xbf16>, vector<1x50xf32> -> vector<1x50xf32>
    %21 = vector.extract_strided_slice %5 {offsets = [5, 0], sizes = [1, 64], strides = [1, 1]} : vector<64x64xbf16> to vector<1x64xbf16>
    %c320 = arith.constant 320 : index
    %c0_15 = arith.constant 0 : index
    %22 = vector.load %arg3[%c320, %c0_15] : memref<4096x50xbf16, #tpu.memory_space<vmem>>, vector<64x50xbf16>
    %cst_16 = arith.constant dense<0.000000e+00> : vector<1x50xf32>
    %23 = tpu.matmul %21, %22, %cst_16 {dimension_numbers = #tpu.dot_dimension_numbers<[1], [0], [0], [1], [0, 0, 1, 1], [], []>} : vector<1x64xbf16>, vector<64x50xbf16>, vector<1x50xf32> -> vector<1x50xf32>
    %24 = vector.extract_strided_slice %5 {offsets = [6, 0], sizes = [1, 64], strides = [1, 1]} : vector<64x64xbf16> to vector<1x64xbf16>
    %c384 = arith.constant 384 : index
    %c0_17 = arith.constant 0 : index
    %25 = vector.load %arg3[%c384, %c0_17] : memref<4096x50xbf16, #tpu.memory_space<vmem>>, vector<64x50xbf16>
    %cst_18 = arith.constant dense<0.000000e+00> : vector<1x50xf32>
    %26 = tpu.matmul %24, %25, %cst_18 {dimension_numbers = #tpu.dot_dimension_numbers<[1], [0], [0], [1], [0, 0, 1, 1], [], []>} : vector<1x64xbf16>, vector<64x50xbf16>, vector<1x50xf32> -> vector<1x50xf32>
    %27 = vector.extract_strided_slice %5 {offsets = [7, 0], sizes = [1, 64], strides = [1, 1]} : vector<64x64xbf16> to vector<1x64xbf16>
    %c448 = arith.constant 448 : index
    %c0_19 = arith.constant 0 : index
    %28 = vector.load %arg3[%c448, %c0_19] : memref<4096x50xbf16, #tpu.memory_space<vmem>>, vector<64x50xbf16>
    %cst_20 = arith.constant dense<0.000000e+00> : vector<1x50xf32>
    %29 = tpu.matmul %27, %28, %cst_20 {dimension_numbers = #tpu.dot_dimension_numbers<[1], [0], [0], [1], [0, 0, 1, 1], [], []>} : vector<1x64xbf16>, vector<64x50xbf16>, vector<1x50xf32> -> vector<1x50xf32>
    %30 = vector.extract_strided_slice %5 {offsets = [8, 0], sizes = [1, 64], strides = [1, 1]} : vector<64x64xbf16> to vector<1x64xbf16>
    %c512 = arith.constant 512 : index
    %c0_21 = arith.constant 0 : index
    %31 = vector.load %arg3[%c512, %c0_21] : memref<4096x50xbf16, #tpu.memory_space<vmem>>, vector<64x50xbf16>
    %cst_22 = arith.constant dense<0.000000e+00> : vector<1x50xf32>
    %32 = tpu.matmul %30, %31, %cst_22 {dimension_numbers = #tpu.dot_dimension_numbers<[1], [0], [0], [1], [0, 0, 1, 1], [], []>} : vector<1x64xbf16>, vector<64x50xbf16>, vector<1x50xf32> -> vector<1x50xf32>
    %33 = arith.addf %8, %32 : vector<1x50xf32>
    %34 = vector.extract_strided_slice %5 {offsets = [9, 0], sizes = [1, 64], strides = [1, 1]} : vector<64x64xbf16> to vector<1x64xbf16>
    %c576 = arith.constant 576 : index
    %c0_23 = arith.constant 0 : index
    %35 = vector.load %arg3[%c576, %c0_23] : memref<4096x50xbf16, #tpu.memory_space<vmem>>, vector<64x50xbf16>
    %cst_24 = arith.constant dense<0.000000e+00> : vector<1x50xf32>
    %36 = tpu.matmul %34, %35, %cst_24 {dimension_numbers = #tpu.dot_dimension_numbers<[1], [0], [0], [1], [0, 0, 1, 1], [], []>} : vector<1x64xbf16>, vector<64x50xbf16>, vector<1x50xf32> -> vector<1x50xf32>
    %37 = arith.addf %11, %36 : vector<1x50xf32>
    %38 = vector.extract_strided_slice %5 {offsets = [10, 0], sizes = [1, 64], strides = [1, 1]} : vector<64x64xbf16> to vector<1x64xbf16>
    %c640 = arith.constant 640 : index
    %c0_25 = arith.constant 0 : index
    %39 = vector.load %arg3[%c640, %c0_25] : memref<4096x50xbf16, #tpu.memory_space<vmem>>, vector<64x50xbf16>
    %cst_26 = arith.constant dense<0.000000e+00> : vector<1x50xf32>
    %40 = tpu.matmul %38, %39, %cst_26 {dimension_numbers = #tpu.dot_dimension_numbers<[1], [0], [0], [1], [0, 0, 1, 1], [], []>} : vector<1x64xbf16>, vector<64x50xbf16>, vector<1x50xf32> -> vector<1x50xf32>
    %41 = arith.addf %14, %40 : vector<1x50xf32>
    %42 = vector.extract_strided_slice %5 {offsets = [11, 0], sizes = [1, 64], strides = [1, 1]} : vector<64x64xbf16> to vector<1x64xbf16>
    %c704 = arith.constant 704 : index
    %c0_27 = arith.constant 0 : index
    %43 = vector.load %arg3[%c704, %c0_27] : memref<4096x50xbf16, #tpu.memory_space<vmem>>, vector<64x50xbf16>
    %cst_28 = arith.constant dense<0.000000e+00> : vector<1x50xf32>
    %44 = tpu.matmul %42, %43, %cst_28 {dimension_numbers = #tpu.dot_dimension_numbers<[1], [0], [0], [1], [0, 0, 1, 1], [], []>} : vector<1x64xbf16>, vector<64x50xbf16>, vector<1x50xf32> -> vector<1x50xf32>
    %45 = arith.addf %17, %44 : vector<1x50xf32>
    %46 = vector.extract_strided_slice %5 {offsets = [12, 0], sizes = [1, 64], strides = [1, 1]} : vector<64x64xbf16> to vector<1x64xbf16>
    %c768 = arith.constant 768 : index
    %c0_29 = arith.constant 0 : index
    %47 = vector.load %arg3[%c768, %c0_29] : memref<4096x50xbf16, #tpu.memory_space<vmem>>, vector<64x50xbf16>
    %cst_30 = arith.constant dense<0.000000e+00> : vector<1x50xf32>
    %48 = tpu.matmul %46, %47, %cst_30 {dimension_numbers = #tpu.dot_dimension_numbers<[1], [0], [0], [1], [0, 0, 1, 1], [], []>} : vector<1x64xbf16>, vector<64x50xbf16>, vector<1x50xf32> -> vector<1x50xf32>
    %49 = arith.addf %20, %48 : vector<1x50xf32>
    %50 = vector.extract_strided_slice %5 {offsets = [13, 0], sizes = [1, 64], strides = [1, 1]} : vector<64x64xbf16> to vector<1x64xbf16>
    %c832 = arith.constant 832 : index
    %c0_31 = arith.constant 0 : index
    %51 = vector.load %arg3[%c832, %c0_31] : memref<4096x50xbf16, #tpu.memory_space<vmem>>, vector<64x50xbf16>
    %cst_32 = arith.constant dense<0.000000e+00> : vector<1x50xf32>
    %52 = tpu.matmul %50, %51, %cst_32 {dimension_numbers = #tpu.dot_dimension_numbers<[1], [0], [0], [1], [0, 0, 1, 1], [], []>} : vector<1x64xbf16>, vector<64x50xbf16>, vector<1x50xf32> -> vector<1x50xf32>
    %53 = arith.addf %23, %52 : vector<1x50xf32>
    %54 = vector.extract_strided_slice %5 {offsets = [14, 0], sizes = [1, 64], strides = [1, 1]} : vector<64x64xbf16> to vector<1x64xbf16>
    %c896 = arith.constant 896 : index
    %c0_33 = arith.constant 0 : index
    %55 = vector.load %arg3[%c896, %c0_33] : memref<4096x50xbf16, #tpu.memory_space<vmem>>, vector<64x50xbf16>
    %cst_34 = arith.constant dense<0.000000e+00> : vector<1x50xf32>
    %56 = tpu.matmul %54, %55, %cst_34 {dimension_numbers = #tpu.dot_dimension_numbers<[1], [0], [0], [1], [0, 0, 1, 1], [], []>} : vector<1x64xbf16>, vector<64x50xbf16>, vector<1x50xf32> -> vector<1x50xf32>
    %57 = arith.addf %26, %56 : vector<1x50xf32>
    %58 = vector.extract_strided_slice %5 {offsets = [15, 0], sizes = [1, 64], strides = [1, 1]} : vector<64x64xbf16> to vector<1x64xbf16>
    %c960 = arith.constant 960 : index
    %c0_35 = arith.constant 0 : index
    %59 = vector.load %arg3[%c960, %c0_35] : memref<4096x50xbf16, #tpu.memory_space<vmem>>, vector<64x50xbf16>
    %cst_36 = arith.constant dense<0.000000e+00> : vector<1x50xf32>
    %60 = tpu.matmul %58, %59, %cst_36 {dimension_numbers = #tpu.dot_dimension_numbers<[1], [0], [0], [1], [0, 0, 1, 1], [], []>} : vector<1x64xbf16>, vector<64x50xbf16>, vector<1x50xf32> -> vector<1x50xf32>
    %61 = arith.addf %29, %60 : vector<1x50xf32>
    %62 = vector.extract_strided_slice %5 {offsets = [16, 0], sizes = [1, 64], strides = [1, 1]} : vector<64x64xbf16> to vector<1x64xbf16>
    %c1024 = arith.constant 1024 : index
    %c0_37 = arith.constant 0 : index
    %63 = vector.load %arg3[%c1024, %c0_37] : memref<4096x50xbf16, #tpu.memory_space<vmem>>, vector<64x50xbf16>
    %cst_38 = arith.constant dense<0.000000e+00> : vector<1x50xf32>
    %64 = tpu.matmul %62, %63, %cst_38 {dimension_numbers = #tpu.dot_dimension_numbers<[1], [0], [0], [1], [0, 0, 1, 1], [], []>} : vector<1x64xbf16>, vector<64x50xbf16>, vector<1x50xf32> -> vector<1x50xf32>
    %65 = arith.addf %33, %64 : vector<1x50xf32>
    %66 = vector.extract_strided_slice %5 {offsets = [17, 0], sizes = [1, 64], strides = [1, 1]} : vector<64x64xbf16> to vector<1x64xbf16>
    %c1088 = arith.constant 1088 : index
    %c0_39 = arith.constant 0 : index
    %67 = vector.load %arg3[%c1088, %c0_39] : memref<4096x50xbf16, #tpu.memory_space<vmem>>, vector<64x50xbf16>
    %cst_40 = arith.constant dense<0.000000e+00> : vector<1x50xf32>
    %68 = tpu.matmul %66, %67, %cst_40 {dimension_numbers = #tpu.dot_dimension_numbers<[1], [0], [0], [1], [0, 0, 1, 1], [], []>} : vector<1x64xbf16>, vector<64x50xbf16>, vector<1x50xf32> -> vector<1x50xf32>
    %69 = arith.addf %37, %68 : vector<1x50xf32>
    %70 = vector.extract_strided_slice %5 {offsets = [18, 0], sizes = [1, 64], strides = [1, 1]} : vector<64x64xbf16> to vector<1x64xbf16>
    %c1152 = arith.constant 1152 : index
    %c0_41 = arith.constant 0 : index
    %71 = vector.load %arg3[%c1152, %c0_41] : memref<4096x50xbf16, #tpu.memory_space<vmem>>, vector<64x50xbf16>
    %cst_42 = arith.constant dense<0.000000e+00> : vector<1x50xf32>
    %72 = tpu.matmul %70, %71, %cst_42 {dimension_numbers = #tpu.dot_dimension_numbers<[1], [0], [0], [1], [0, 0, 1, 1], [], []>} : vector<1x64xbf16>, vector<64x50xbf16>, vector<1x50xf32> -> vector<1x50xf32>
    %73 = arith.addf %41, %72 : vector<1x50xf32>
    %74 = vector.extract_strided_slice %5 {offsets = [19, 0], sizes = [1, 64], strides = [1, 1]} : vector<64x64xbf16> to vector<1x64xbf16>
    %c1216 = arith.constant 1216 : index
    %c0_43 = arith.constant 0 : index
    %75 = vector.load %arg3[%c1216, %c0_43] : memref<4096x50xbf16, #tpu.memory_space<vmem>>, vector<64x50xbf16>
    %cst_44 = arith.constant dense<0.000000e+00> : vector<1x50xf32>
    %76 = tpu.matmul %74, %75, %cst_44 {dimension_numbers = #tpu.dot_dimension_numbers<[1], [0], [0], [1], [0, 0, 1, 1], [], []>} : vector<1x64xbf16>, vector<64x50xbf16>, vector<1x50xf32> -> vector<1x50xf32>
    %77 = arith.addf %45, %76 : vector<1x50xf32>
    %78 = vector.extract_strided_slice %5 {offsets = [20, 0], sizes = [1, 64], strides = [1, 1]} : vector<64x64xbf16> to vector<1x64xbf16>
    %c1280 = arith.constant 1280 : index
    %c0_45 = arith.constant 0 : index
    %79 = vector.load %arg3[%c1280, %c0_45] : memref<4096x50xbf16, #tpu.memory_space<vmem>>, vector<64x50xbf16>
    %cst_46 = arith.constant dense<0.000000e+00> : vector<1x50xf32>
    %80 = tpu.matmul %78, %79, %cst_46 {dimension_numbers = #tpu.dot_dimension_numbers<[1], [0], [0], [1], [0, 0, 1, 1], [], []>} : vector<1x64xbf16>, vector<64x50xbf16>, vector<1x50xf32> -> vector<1x50xf32>
    %81 = arith.addf %49, %80 : vector<1x50xf32>
    %82 = vector.extract_strided_slice %5 {offsets = [21, 0], sizes = [1, 64], strides = [1, 1]} : vector<64x64xbf16> to vector<1x64xbf16>
    %c1344 = arith.constant 1344 : index
    %c0_47 = arith.constant 0 : index
    %83 = vector.load %arg3[%c1344, %c0_47] : memref<4096x50xbf16, #tpu.memory_space<vmem>>, vector<64x50xbf16>
    %cst_48 = arith.constant dense<0.000000e+00> : vector<1x50xf32>
    %84 = tpu.matmul %82, %83, %cst_48 {dimension_numbers = #tpu.dot_dimension_numbers<[1], [0], [0], [1], [0, 0, 1, 1], [], []>} : vector<1x64xbf16>, vector<64x50xbf16>, vector<1x50xf32> -> vector<1x50xf32>
    %85 = arith.addf %53, %84 : vector<1x50xf32>
    %86 = vector.extract_strided_slice %5 {offsets = [22, 0], sizes = [1, 64], strides = [1, 1]} : vector<64x64xbf16> to vector<1x64xbf16>
    %c1408 = arith.constant 1408 : index
    %c0_49 = arith.constant 0 : index
    %87 = vector.load %arg3[%c1408, %c0_49] : memref<4096x50xbf16, #tpu.memory_space<vmem>>, vector<64x50xbf16>
    %cst_50 = arith.constant dense<0.000000e+00> : vector<1x50xf32>
    %88 = tpu.matmul %86, %87, %cst_50 {dimension_numbers = #tpu.dot_dimension_numbers<[1], [0], [0], [1], [0, 0, 1, 1], [], []>} : vector<1x64xbf16>, vector<64x50xbf16>, vector<1x50xf32> -> vector<1x50xf32>
    %89 = arith.addf %57, %88 : vector<1x50xf32>
    %90 = vector.extract_strided_slice %5 {offsets = [23, 0], sizes = [1, 64], strides = [1, 1]} : vector<64x64xbf16> to vector<1x64xbf16>
    %c1472 = arith.constant 1472 : index
    %c0_51 = arith.constant 0 : index
    %91 = vector.load %arg3[%c1472, %c0_51] : memref<4096x50xbf16, #tpu.memory_space<vmem>>, vector<64x50xbf16>
    %cst_52 = arith.constant dense<0.000000e+00> : vector<1x50xf32>
    %92 = tpu.matmul %90, %91, %cst_52 {dimension_numbers = #tpu.dot_dimension_numbers<[1], [0], [0], [1], [0, 0, 1, 1], [], []>} : vector<1x64xbf16>, vector<64x50xbf16>, vector<1x50xf32> -> vector<1x50xf32>
    %93 = arith.addf %61, %92 : vector<1x50xf32>
    %94 = vector.extract_strided_slice %5 {offsets = [24, 0], sizes = [1, 64], strides = [1, 1]} : vector<64x64xbf16> to vector<1x64xbf16>
    %c1536 = arith.constant 1536 : index
    %c0_53 = arith.constant 0 : index
    %95 = vector.load %arg3[%c1536, %c0_53] : memref<4096x50xbf16, #tpu.memory_space<vmem>>, vector<64x50xbf16>
    %cst_54 = arith.constant dense<0.000000e+00> : vector<1x50xf32>
    %96 = tpu.matmul %94, %95, %cst_54 {dimension_numbers = #tpu.dot_dimension_numbers<[1], [0], [0], [1], [0, 0, 1, 1], [], []>} : vector<1x64xbf16>, vector<64x50xbf16>, vector<1x50xf32> -> vector<1x50xf32>
    %97 = arith.addf %65, %96 : vector<1x50xf32>
    %98 = vector.extract_strided_slice %5 {offsets = [25, 0], sizes = [1, 64], strides = [1, 1]} : vector<64x64xbf16> to vector<1x64xbf16>
    %c1600 = arith.constant 1600 : index
    %c0_55 = arith.constant 0 : index
    %99 = vector.load %arg3[%c1600, %c0_55] : memref<4096x50xbf16, #tpu.memory_space<vmem>>, vector<64x50xbf16>
    %cst_56 = arith.constant dense<0.000000e+00> : vector<1x50xf32>
    %100 = tpu.matmul %98, %99, %cst_56 {dimension_numbers = #tpu.dot_dimension_numbers<[1], [0], [0], [1], [0, 0, 1, 1], [], []>} : vector<1x64xbf16>, vector<64x50xbf16>, vector<1x50xf32> -> vector<1x50xf32>
    %101 = arith.addf %69, %100 : vector<1x50xf32>
    %102 = vector.extract_strided_slice %5 {offsets = [26, 0], sizes = [1, 64], strides = [1, 1]} : vector<64x64xbf16> to vector<1x64xbf16>
    %c1664 = arith.constant 1664 : index
    %c0_57 = arith.constant 0 : index
    %103 = vector.load %arg3[%c1664, %c0_57] : memref<4096x50xbf16, #tpu.memory_space<vmem>>, vector<64x50xbf16>
    %cst_58 = arith.constant dense<0.000000e+00> : vector<1x50xf32>
    %104 = tpu.matmul %102, %103, %cst_58 {dimension_numbers = #tpu.dot_dimension_numbers<[1], [0], [0], [1], [0, 0, 1, 1], [], []>} : vector<1x64xbf16>, vector<64x50xbf16>, vector<1x50xf32> -> vector<1x50xf32>
    %105 = arith.addf %73, %104 : vector<1x50xf32>
    %106 = vector.extract_strided_slice %5 {offsets = [27, 0], sizes = [1, 64], strides = [1, 1]} : vector<64x64xbf16> to vector<1x64xbf16>
    %c1728 = arith.constant 1728 : index
    %c0_59 = arith.constant 0 : index
    %107 = vector.load %arg3[%c1728, %c0_59] : memref<4096x50xbf16, #tpu.memory_space<vmem>>, vector<64x50xbf16>
    %cst_60 = arith.constant dense<0.000000e+00> : vector<1x50xf32>
    %108 = tpu.matmul %106, %107, %cst_60 {dimension_numbers = #tpu.dot_dimension_numbers<[1], [0], [0], [1], [0, 0, 1, 1], [], []>} : vector<1x64xbf16>, vector<64x50xbf16>, vector<1x50xf32> -> vector<1x50xf32>
    %109 = arith.addf %77, %108 : vector<1x50xf32>
    %110 = vector.extract_strided_slice %5 {offsets = [28, 0], sizes = [1, 64], strides = [1, 1]} : vector<64x64xbf16> to vector<1x64xbf16>
    %c1792 = arith.constant 1792 : index
    %c0_61 = arith.constant 0 : index
    %111 = vector.load %arg3[%c1792, %c0_61] : memref<4096x50xbf16, #tpu.memory_space<vmem>>, vector<64x50xbf16>
    %cst_62 = arith.constant dense<0.000000e+00> : vector<1x50xf32>
    %112 = tpu.matmul %110, %111, %cst_62 {dimension_numbers = #tpu.dot_dimension_numbers<[1], [0], [0], [1], [0, 0, 1, 1], [], []>} : vector<1x64xbf16>, vector<64x50xbf16>, vector<1x50xf32> -> vector<1x50xf32>
    %113 = arith.addf %81, %112 : vector<1x50xf32>
    %114 = vector.extract_strided_slice %5 {offsets = [29, 0], sizes = [1, 64], strides = [1, 1]} : vector<64x64xbf16> to vector<1x64xbf16>
    %c1856 = arith.constant 1856 : index
    %c0_63 = arith.constant 0 : index
    %115 = vector.load %arg3[%c1856, %c0_63] : memref<4096x50xbf16, #tpu.memory_space<vmem>>, vector<64x50xbf16>
    %cst_64 = arith.constant dense<0.000000e+00> : vector<1x50xf32>
    %116 = tpu.matmul %114, %115, %cst_64 {dimension_numbers = #tpu.dot_dimension_numbers<[1], [0], [0], [1], [0, 0, 1, 1], [], []>} : vector<1x64xbf16>, vector<64x50xbf16>, vector<1x50xf32> -> vector<1x50xf32>
    %117 = arith.addf %85, %116 : vector<1x50xf32>
    %118 = vector.extract_strided_slice %5 {offsets = [30, 0], sizes = [1, 64], strides = [1, 1]} : vector<64x64xbf16> to vector<1x64xbf16>
    %c1920 = arith.constant 1920 : index
    %c0_65 = arith.constant 0 : index
    %119 = vector.load %arg3[%c1920, %c0_65] : memref<4096x50xbf16, #tpu.memory_space<vmem>>, vector<64x50xbf16>
    %cst_66 = arith.constant dense<0.000000e+00> : vector<1x50xf32>
    %120 = tpu.matmul %118, %119, %cst_66 {dimension_numbers = #tpu.dot_dimension_numbers<[1], [0], [0], [1], [0, 0, 1, 1], [], []>} : vector<1x64xbf16>, vector<64x50xbf16>, vector<1x50xf32> -> vector<1x50xf32>
    %121 = arith.addf %89, %120 : vector<1x50xf32>
    %122 = vector.extract_strided_slice %5 {offsets = [31, 0], sizes = [1, 64], strides = [1, 1]} : vector<64x64xbf16> to vector<1x64xbf16>
    %c1984 = arith.constant 1984 : index
    %c0_67 = arith.constant 0 : index
    %123 = vector.load %arg3[%c1984, %c0_67] : memref<4096x50xbf16, #tpu.memory_space<vmem>>, vector<64x50xbf16>
    %cst_68 = arith.constant dense<0.000000e+00> : vector<1x50xf32>
    %124 = tpu.matmul %122, %123, %cst_68 {dimension_numbers = #tpu.dot_dimension_numbers<[1], [0], [0], [1], [0, 0, 1, 1], [], []>} : vector<1x64xbf16>, vector<64x50xbf16>, vector<1x50xf32> -> vector<1x50xf32>
    %125 = arith.addf %93, %124 : vector<1x50xf32>
    %126 = vector.extract_strided_slice %5 {offsets = [32, 0], sizes = [1, 64], strides = [1, 1]} : vector<64x64xbf16> to vector<1x64xbf16>
    %c2048 = arith.constant 2048 : index
    %c0_69 = arith.constant 0 : index
    %127 = vector.load %arg3[%c2048, %c0_69] : memref<4096x50xbf16, #tpu.memory_space<vmem>>, vector<64x50xbf16>
    %cst_70 = arith.constant dense<0.000000e+00> : vector<1x50xf32>
    %128 = tpu.matmul %126, %127, %cst_70 {dimension_numbers = #tpu.dot_dimension_numbers<[1], [0], [0], [1], [0, 0, 1, 1], [], []>} : vector<1x64xbf16>, vector<64x50xbf16>, vector<1x50xf32> -> vector<1x50xf32>
    %129 = arith.addf %97, %128 : vector<1x50xf32>
    %130 = vector.extract_strided_slice %5 {offsets = [33, 0], sizes = [1, 64], strides = [1, 1]} : vector<64x64xbf16> to vector<1x64xbf16>
    %c2112 = arith.constant 2112 : index
    %c0_71 = arith.constant 0 : index
    %131 = vector.load %arg3[%c2112, %c0_71] : memref<4096x50xbf16, #tpu.memory_space<vmem>>, vector<64x50xbf16>
    %cst_72 = arith.constant dense<0.000000e+00> : vector<1x50xf32>
    %132 = tpu.matmul %130, %131, %cst_72 {dimension_numbers = #tpu.dot_dimension_numbers<[1], [0], [0], [1], [0, 0, 1, 1], [], []>} : vector<1x64xbf16>, vector<64x50xbf16>, vector<1x50xf32> -> vector<1x50xf32>
    %133 = arith.addf %101, %132 : vector<1x50xf32>
    %134 = vector.extract_strided_slice %5 {offsets = [34, 0], sizes = [1, 64], strides = [1, 1]} : vector<64x64xbf16> to vector<1x64xbf16>
    %c2176 = arith.constant 2176 : index
    %c0_73 = arith.constant 0 : index
    %135 = vector.load %arg3[%c2176, %c0_73] : memref<4096x50xbf16, #tpu.memory_space<vmem>>, vector<64x50xbf16>
    %cst_74 = arith.constant dense<0.000000e+00> : vector<1x50xf32>
    %136 = tpu.matmul %134, %135, %cst_74 {dimension_numbers = #tpu.dot_dimension_numbers<[1], [0], [0], [1], [0, 0, 1, 1], [], []>} : vector<1x64xbf16>, vector<64x50xbf16>, vector<1x50xf32> -> vector<1x50xf32>
    %137 = arith.addf %105, %136 : vector<1x50xf32>
    %138 = vector.extract_strided_slice %5 {offsets = [35, 0], sizes = [1, 64], strides = [1, 1]} : vector<64x64xbf16> to vector<1x64xbf16>
    %c2240 = arith.constant 2240 : index
    %c0_75 = arith.constant 0 : index
    %139 = vector.load %arg3[%c2240, %c0_75] : memref<4096x50xbf16, #tpu.memory_space<vmem>>, vector<64x50xbf16>
    %cst_76 = arith.constant dense<0.000000e+00> : vector<1x50xf32>
    %140 = tpu.matmul %138, %139, %cst_76 {dimension_numbers = #tpu.dot_dimension_numbers<[1], [0], [0], [1], [0, 0, 1, 1], [], []>} : vector<1x64xbf16>, vector<64x50xbf16>, vector<1x50xf32> -> vector<1x50xf32>
    %141 = arith.addf %109, %140 : vector<1x50xf32>
    %142 = vector.extract_strided_slice %5 {offsets = [36, 0], sizes = [1, 64], strides = [1, 1]} : vector<64x64xbf16> to vector<1x64xbf16>
    %c2304 = arith.constant 2304 : index
    %c0_77 = arith.constant 0 : index
    %143 = vector.load %arg3[%c2304, %c0_77] : memref<4096x50xbf16, #tpu.memory_space<vmem>>, vector<64x50xbf16>
    %cst_78 = arith.constant dense<0.000000e+00> : vector<1x50xf32>
    %144 = tpu.matmul %142, %143, %cst_78 {dimension_numbers = #tpu.dot_dimension_numbers<[1], [0], [0], [1], [0, 0, 1, 1], [], []>} : vector<1x64xbf16>, vector<64x50xbf16>, vector<1x50xf32> -> vector<1x50xf32>
    %145 = arith.addf %113, %144 : vector<1x50xf32>
    %146 = vector.extract_strided_slice %5 {offsets = [37, 0], sizes = [1, 64], strides = [1, 1]} : vector<64x64xbf16> to vector<1x64xbf16>
    %c2368 = arith.constant 2368 : index
    %c0_79 = arith.constant 0 : index
    %147 = vector.load %arg3[%c2368, %c0_79] : memref<4096x50xbf16, #tpu.memory_space<vmem>>, vector<64x50xbf16>
    %cst_80 = arith.constant dense<0.000000e+00> : vector<1x50xf32>
    %148 = tpu.matmul %146, %147, %cst_80 {dimension_numbers = #tpu.dot_dimension_numbers<[1], [0], [0], [1], [0, 0, 1, 1], [], []>} : vector<1x64xbf16>, vector<64x50xbf16>, vector<1x50xf32> -> vector<1x50xf32>
    %149 = arith.addf %117, %148 : vector<1x50xf32>
    %150 = vector.extract_strided_slice %5 {offsets = [38, 0], sizes = [1, 64], strides = [1, 1]} : vector<64x64xbf16> to vector<1x64xbf16>
    %c2432 = arith.constant 2432 : index
    %c0_81 = arith.constant 0 : index
    %151 = vector.load %arg3[%c2432, %c0_81] : memref<4096x50xbf16, #tpu.memory_space<vmem>>, vector<64x50xbf16>
    %cst_82 = arith.constant dense<0.000000e+00> : vector<1x50xf32>
    %152 = tpu.matmul %150, %151, %cst_82 {dimension_numbers = #tpu.dot_dimension_numbers<[1], [0], [0], [1], [0, 0, 1, 1], [], []>} : vector<1x64xbf16>, vector<64x50xbf16>, vector<1x50xf32> -> vector<1x50xf32>
    %153 = arith.addf %121, %152 : vector<1x50xf32>
    %154 = vector.extract_strided_slice %5 {offsets = [39, 0], sizes = [1, 64], strides = [1, 1]} : vector<64x64xbf16> to vector<1x64xbf16>
    %c2496 = arith.constant 2496 : index
    %c0_83 = arith.constant 0 : index
    %155 = vector.load %arg3[%c2496, %c0_83] : memref<4096x50xbf16, #tpu.memory_space<vmem>>, vector<64x50xbf16>
    %cst_84 = arith.constant dense<0.000000e+00> : vector<1x50xf32>
    %156 = tpu.matmul %154, %155, %cst_84 {dimension_numbers = #tpu.dot_dimension_numbers<[1], [0], [0], [1], [0, 0, 1, 1], [], []>} : vector<1x64xbf16>, vector<64x50xbf16>, vector<1x50xf32> -> vector<1x50xf32>
    %157 = arith.addf %125, %156 : vector<1x50xf32>
    %158 = vector.extract_strided_slice %5 {offsets = [40, 0], sizes = [1, 64], strides = [1, 1]} : vector<64x64xbf16> to vector<1x64xbf16>
    %c2560 = arith.constant 2560 : index
    %c0_85 = arith.constant 0 : index
    %159 = vector.load %arg3[%c2560, %c0_85] : memref<4096x50xbf16, #tpu.memory_space<vmem>>, vector<64x50xbf16>
    %cst_86 = arith.constant dense<0.000000e+00> : vector<1x50xf32>
    %160 = tpu.matmul %158, %159, %cst_86 {dimension_numbers = #tpu.dot_dimension_numbers<[1], [0], [0], [1], [0, 0, 1, 1], [], []>} : vector<1x64xbf16>, vector<64x50xbf16>, vector<1x50xf32> -> vector<1x50xf32>
    %161 = arith.addf %129, %160 : vector<1x50xf32>
    %162 = vector.extract_strided_slice %5 {offsets = [41, 0], sizes = [1, 64], strides = [1, 1]} : vector<64x64xbf16> to vector<1x64xbf16>
    %c2624 = arith.constant 2624 : index
    %c0_87 = arith.constant 0 : index
    %163 = vector.load %arg3[%c2624, %c0_87] : memref<4096x50xbf16, #tpu.memory_space<vmem>>, vector<64x50xbf16>
    %cst_88 = arith.constant dense<0.000000e+00> : vector<1x50xf32>
    %164 = tpu.matmul %162, %163, %cst_88 {dimension_numbers = #tpu.dot_dimension_numbers<[1], [0], [0], [1], [0, 0, 1, 1], [], []>} : vector<1x64xbf16>, vector<64x50xbf16>, vector<1x50xf32> -> vector<1x50xf32>
    %165 = arith.addf %133, %164 : vector<1x50xf32>
    %166 = vector.extract_strided_slice %5 {offsets = [42, 0], sizes = [1, 64], strides = [1, 1]} : vector<64x64xbf16> to vector<1x64xbf16>
    %c2688 = arith.constant 2688 : index
    %c0_89 = arith.constant 0 : index
    %167 = vector.load %arg3[%c2688, %c0_89] : memref<4096x50xbf16, #tpu.memory_space<vmem>>, vector<64x50xbf16>
    %cst_90 = arith.constant dense<0.000000e+00> : vector<1x50xf32>
    %168 = tpu.matmul %166, %167, %cst_90 {dimension_numbers = #tpu.dot_dimension_numbers<[1], [0], [0], [1], [0, 0, 1, 1], [], []>} : vector<1x64xbf16>, vector<64x50xbf16>, vector<1x50xf32> -> vector<1x50xf32>
    %169 = arith.addf %137, %168 : vector<1x50xf32>
    %170 = vector.extract_strided_slice %5 {offsets = [43, 0], sizes = [1, 64], strides = [1, 1]} : vector<64x64xbf16> to vector<1x64xbf16>
    %c2752 = arith.constant 2752 : index
    %c0_91 = arith.constant 0 : index
    %171 = vector.load %arg3[%c2752, %c0_91] : memref<4096x50xbf16, #tpu.memory_space<vmem>>, vector<64x50xbf16>
    %cst_92 = arith.constant dense<0.000000e+00> : vector<1x50xf32>
    %172 = tpu.matmul %170, %171, %cst_92 {dimension_numbers = #tpu.dot_dimension_numbers<[1], [0], [0], [1], [0, 0, 1, 1], [], []>} : vector<1x64xbf16>, vector<64x50xbf16>, vector<1x50xf32> -> vector<1x50xf32>
    %173 = arith.addf %141, %172 : vector<1x50xf32>
    %174 = vector.extract_strided_slice %5 {offsets = [44, 0], sizes = [1, 64], strides = [1, 1]} : vector<64x64xbf16> to vector<1x64xbf16>
    %c2816 = arith.constant 2816 : index
    %c0_93 = arith.constant 0 : index
    %175 = vector.load %arg3[%c2816, %c0_93] : memref<4096x50xbf16, #tpu.memory_space<vmem>>, vector<64x50xbf16>
    %cst_94 = arith.constant dense<0.000000e+00> : vector<1x50xf32>
    %176 = tpu.matmul %174, %175, %cst_94 {dimension_numbers = #tpu.dot_dimension_numbers<[1], [0], [0], [1], [0, 0, 1, 1], [], []>} : vector<1x64xbf16>, vector<64x50xbf16>, vector<1x50xf32> -> vector<1x50xf32>
    %177 = arith.addf %145, %176 : vector<1x50xf32>
    %178 = vector.extract_strided_slice %5 {offsets = [45, 0], sizes = [1, 64], strides = [1, 1]} : vector<64x64xbf16> to vector<1x64xbf16>
    %c2880 = arith.constant 2880 : index
    %c0_95 = arith.constant 0 : index
    %179 = vector.load %arg3[%c2880, %c0_95] : memref<4096x50xbf16, #tpu.memory_space<vmem>>, vector<64x50xbf16>
    %cst_96 = arith.constant dense<0.000000e+00> : vector<1x50xf32>
    %180 = tpu.matmul %178, %179, %cst_96 {dimension_numbers = #tpu.dot_dimension_numbers<[1], [0], [0], [1], [0, 0, 1, 1], [], []>} : vector<1x64xbf16>, vector<64x50xbf16>, vector<1x50xf32> -> vector<1x50xf32>
    %181 = arith.addf %149, %180 : vector<1x50xf32>
    %182 = vector.extract_strided_slice %5 {offsets = [46, 0], sizes = [1, 64], strides = [1, 1]} : vector<64x64xbf16> to vector<1x64xbf16>
    %c2944 = arith.constant 2944 : index
    %c0_97 = arith.constant 0 : index
    %183 = vector.load %arg3[%c2944, %c0_97] : memref<4096x50xbf16, #tpu.memory_space<vmem>>, vector<64x50xbf16>
    %cst_98 = arith.constant dense<0.000000e+00> : vector<1x50xf32>
    %184 = tpu.matmul %182, %183, %cst_98 {dimension_numbers = #tpu.dot_dimension_numbers<[1], [0], [0], [1], [0, 0, 1, 1], [], []>} : vector<1x64xbf16>, vector<64x50xbf16>, vector<1x50xf32> -> vector<1x50xf32>
    %185 = arith.addf %153, %184 : vector<1x50xf32>
    %186 = vector.extract_strided_slice %5 {offsets = [47, 0], sizes = [1, 64], strides = [1, 1]} : vector<64x64xbf16> to vector<1x64xbf16>
    %c3008 = arith.constant 3008 : index
    %c0_99 = arith.constant 0 : index
    %187 = vector.load %arg3[%c3008, %c0_99] : memref<4096x50xbf16, #tpu.memory_space<vmem>>, vector<64x50xbf16>
    %cst_100 = arith.constant dense<0.000000e+00> : vector<1x50xf32>
    %188 = tpu.matmul %186, %187, %cst_100 {dimension_numbers = #tpu.dot_dimension_numbers<[1], [0], [0], [1], [0, 0, 1, 1], [], []>} : vector<1x64xbf16>, vector<64x50xbf16>, vector<1x50xf32> -> vector<1x50xf32>
    %189 = arith.addf %157, %188 : vector<1x50xf32>
    %190 = vector.extract_strided_slice %5 {offsets = [48, 0], sizes = [1, 64], strides = [1, 1]} : vector<64x64xbf16> to vector<1x64xbf16>
    %c3072 = arith.constant 3072 : index
    %c0_101 = arith.constant 0 : index
    %191 = vector.load %arg3[%c3072, %c0_101] : memref<4096x50xbf16, #tpu.memory_space<vmem>>, vector<64x50xbf16>
    %cst_102 = arith.constant dense<0.000000e+00> : vector<1x50xf32>
    %192 = tpu.matmul %190, %191, %cst_102 {dimension_numbers = #tpu.dot_dimension_numbers<[1], [0], [0], [1], [0, 0, 1, 1], [], []>} : vector<1x64xbf16>, vector<64x50xbf16>, vector<1x50xf32> -> vector<1x50xf32>
    %193 = arith.addf %161, %192 : vector<1x50xf32>
    %194 = vector.extract_strided_slice %5 {offsets = [49, 0], sizes = [1, 64], strides = [1, 1]} : vector<64x64xbf16> to vector<1x64xbf16>
    %c3136 = arith.constant 3136 : index
    %c0_103 = arith.constant 0 : index
    %195 = vector.load %arg3[%c3136, %c0_103] : memref<4096x50xbf16, #tpu.memory_space<vmem>>, vector<64x50xbf16>
    %cst_104 = arith.constant dense<0.000000e+00> : vector<1x50xf32>
    %196 = tpu.matmul %194, %195, %cst_104 {dimension_numbers = #tpu.dot_dimension_numbers<[1], [0], [0], [1], [0, 0, 1, 1], [], []>} : vector<1x64xbf16>, vector<64x50xbf16>, vector<1x50xf32> -> vector<1x50xf32>
    %197 = arith.addf %165, %196 : vector<1x50xf32>
    %198 = vector.extract_strided_slice %5 {offsets = [50, 0], sizes = [1, 64], strides = [1, 1]} : vector<64x64xbf16> to vector<1x64xbf16>
    %c3200 = arith.constant 3200 : index
    %c0_105 = arith.constant 0 : index
    %199 = vector.load %arg3[%c3200, %c0_105] : memref<4096x50xbf16, #tpu.memory_space<vmem>>, vector<64x50xbf16>
    %cst_106 = arith.constant dense<0.000000e+00> : vector<1x50xf32>
    %200 = tpu.matmul %198, %199, %cst_106 {dimension_numbers = #tpu.dot_dimension_numbers<[1], [0], [0], [1], [0, 0, 1, 1], [], []>} : vector<1x64xbf16>, vector<64x50xbf16>, vector<1x50xf32> -> vector<1x50xf32>
    %201 = arith.addf %169, %200 : vector<1x50xf32>
    %202 = vector.extract_strided_slice %5 {offsets = [51, 0], sizes = [1, 64], strides = [1, 1]} : vector<64x64xbf16> to vector<1x64xbf16>
    %c3264 = arith.constant 3264 : index
    %c0_107 = arith.constant 0 : index
    %203 = vector.load %arg3[%c3264, %c0_107] : memref<4096x50xbf16, #tpu.memory_space<vmem>>, vector<64x50xbf16>
    %cst_108 = arith.constant dense<0.000000e+00> : vector<1x50xf32>
    %204 = tpu.matmul %202, %203, %cst_108 {dimension_numbers = #tpu.dot_dimension_numbers<[1], [0], [0], [1], [0, 0, 1, 1], [], []>} : vector<1x64xbf16>, vector<64x50xbf16>, vector<1x50xf32> -> vector<1x50xf32>
    %205 = arith.addf %173, %204 : vector<1x50xf32>
    %206 = vector.extract_strided_slice %5 {offsets = [52, 0], sizes = [1, 64], strides = [1, 1]} : vector<64x64xbf16> to vector<1x64xbf16>
    %c3328 = arith.constant 3328 : index
    %c0_109 = arith.constant 0 : index
    %207 = vector.load %arg3[%c3328, %c0_109] : memref<4096x50xbf16, #tpu.memory_space<vmem>>, vector<64x50xbf16>
    %cst_110 = arith.constant dense<0.000000e+00> : vector<1x50xf32>
    %208 = tpu.matmul %206, %207, %cst_110 {dimension_numbers = #tpu.dot_dimension_numbers<[1], [0], [0], [1], [0, 0, 1, 1], [], []>} : vector<1x64xbf16>, vector<64x50xbf16>, vector<1x50xf32> -> vector<1x50xf32>
    %209 = arith.addf %177, %208 : vector<1x50xf32>
    %210 = vector.extract_strided_slice %5 {offsets = [53, 0], sizes = [1, 64], strides = [1, 1]} : vector<64x64xbf16> to vector<1x64xbf16>
    %c3392 = arith.constant 3392 : index
    %c0_111 = arith.constant 0 : index
    %211 = vector.load %arg3[%c3392, %c0_111] : memref<4096x50xbf16, #tpu.memory_space<vmem>>, vector<64x50xbf16>
    %cst_112 = arith.constant dense<0.000000e+00> : vector<1x50xf32>
    %212 = tpu.matmul %210, %211, %cst_112 {dimension_numbers = #tpu.dot_dimension_numbers<[1], [0], [0], [1], [0, 0, 1, 1], [], []>} : vector<1x64xbf16>, vector<64x50xbf16>, vector<1x50xf32> -> vector<1x50xf32>
    %213 = arith.addf %181, %212 : vector<1x50xf32>
    %214 = vector.extract_strided_slice %5 {offsets = [54, 0], sizes = [1, 64], strides = [1, 1]} : vector<64x64xbf16> to vector<1x64xbf16>
    %c3456 = arith.constant 3456 : index
    %c0_113 = arith.constant 0 : index
    %215 = vector.load %arg3[%c3456, %c0_113] : memref<4096x50xbf16, #tpu.memory_space<vmem>>, vector<64x50xbf16>
    %cst_114 = arith.constant dense<0.000000e+00> : vector<1x50xf32>
    %216 = tpu.matmul %214, %215, %cst_114 {dimension_numbers = #tpu.dot_dimension_numbers<[1], [0], [0], [1], [0, 0, 1, 1], [], []>} : vector<1x64xbf16>, vector<64x50xbf16>, vector<1x50xf32> -> vector<1x50xf32>
    %217 = arith.addf %185, %216 : vector<1x50xf32>
    %218 = vector.extract_strided_slice %5 {offsets = [55, 0], sizes = [1, 64], strides = [1, 1]} : vector<64x64xbf16> to vector<1x64xbf16>
    %c3520 = arith.constant 3520 : index
    %c0_115 = arith.constant 0 : index
    %219 = vector.load %arg3[%c3520, %c0_115] : memref<4096x50xbf16, #tpu.memory_space<vmem>>, vector<64x50xbf16>
    %cst_116 = arith.constant dense<0.000000e+00> : vector<1x50xf32>
    %220 = tpu.matmul %218, %219, %cst_116 {dimension_numbers = #tpu.dot_dimension_numbers<[1], [0], [0], [1], [0, 0, 1, 1], [], []>} : vector<1x64xbf16>, vector<64x50xbf16>, vector<1x50xf32> -> vector<1x50xf32>
    %221 = arith.addf %189, %220 : vector<1x50xf32>
    %222 = vector.extract_strided_slice %5 {offsets = [56, 0], sizes = [1, 64], strides = [1, 1]} : vector<64x64xbf16> to vector<1x64xbf16>
    %c3584 = arith.constant 3584 : index
    %c0_117 = arith.constant 0 : index
    %223 = vector.load %arg3[%c3584, %c0_117] : memref<4096x50xbf16, #tpu.memory_space<vmem>>, vector<64x50xbf16>
    %cst_118 = arith.constant dense<0.000000e+00> : vector<1x50xf32>
    %224 = tpu.matmul %222, %223, %cst_118 {dimension_numbers = #tpu.dot_dimension_numbers<[1], [0], [0], [1], [0, 0, 1, 1], [], []>} : vector<1x64xbf16>, vector<64x50xbf16>, vector<1x50xf32> -> vector<1x50xf32>
    %225 = arith.addf %193, %224 : vector<1x50xf32>
    %226 = vector.extract_strided_slice %5 {offsets = [57, 0], sizes = [1, 64], strides = [1, 1]} : vector<64x64xbf16> to vector<1x64xbf16>
    %c3648 = arith.constant 3648 : index
    %c0_119 = arith.constant 0 : index
    %227 = vector.load %arg3[%c3648, %c0_119] : memref<4096x50xbf16, #tpu.memory_space<vmem>>, vector<64x50xbf16>
    %cst_120 = arith.constant dense<0.000000e+00> : vector<1x50xf32>
    %228 = tpu.matmul %226, %227, %cst_120 {dimension_numbers = #tpu.dot_dimension_numbers<[1], [0], [0], [1], [0, 0, 1, 1], [], []>} : vector<1x64xbf16>, vector<64x50xbf16>, vector<1x50xf32> -> vector<1x50xf32>
    %229 = arith.addf %197, %228 : vector<1x50xf32>
    %230 = vector.extract_strided_slice %5 {offsets = [58, 0], sizes = [1, 64], strides = [1, 1]} : vector<64x64xbf16> to vector<1x64xbf16>
    %c3712 = arith.constant 3712 : index
    %c0_121 = arith.constant 0 : index
    %231 = vector.load %arg3[%c3712, %c0_121] : memref<4096x50xbf16, #tpu.memory_space<vmem>>, vector<64x50xbf16>
    %cst_122 = arith.constant dense<0.000000e+00> : vector<1x50xf32>
    %232 = tpu.matmul %230, %231, %cst_122 {dimension_numbers = #tpu.dot_dimension_numbers<[1], [0], [0], [1], [0, 0, 1, 1], [], []>} : vector<1x64xbf16>, vector<64x50xbf16>, vector<1x50xf32> -> vector<1x50xf32>
    %233 = arith.addf %201, %232 : vector<1x50xf32>
    %234 = vector.extract_strided_slice %5 {offsets = [59, 0], sizes = [1, 64], strides = [1, 1]} : vector<64x64xbf16> to vector<1x64xbf16>
    %c3776 = arith.constant 3776 : index
    %c0_123 = arith.constant 0 : index
    %235 = vector.load %arg3[%c3776, %c0_123] : memref<4096x50xbf16, #tpu.memory_space<vmem>>, vector<64x50xbf16>
    %cst_124 = arith.constant dense<0.000000e+00> : vector<1x50xf32>
    %236 = tpu.matmul %234, %235, %cst_124 {dimension_numbers = #tpu.dot_dimension_numbers<[1], [0], [0], [1], [0, 0, 1, 1], [], []>} : vector<1x64xbf16>, vector<64x50xbf16>, vector<1x50xf32> -> vector<1x50xf32>
    %237 = arith.addf %205, %236 : vector<1x50xf32>
    %238 = vector.extract_strided_slice %5 {offsets = [60, 0], sizes = [1, 64], strides = [1, 1]} : vector<64x64xbf16> to vector<1x64xbf16>
    %c3840 = arith.constant 3840 : index
    %c0_125 = arith.constant 0 : index
    %239 = vector.load %arg3[%c3840, %c0_125] : memref<4096x50xbf16, #tpu.memory_space<vmem>>, vector<64x50xbf16>
    %cst_126 = arith.constant dense<0.000000e+00> : vector<1x50xf32>
    %240 = tpu.matmul %238, %239, %cst_126 {dimension_numbers = #tpu.dot_dimension_numbers<[1], [0], [0], [1], [0, 0, 1, 1], [], []>} : vector<1x64xbf16>, vector<64x50xbf16>, vector<1x50xf32> -> vector<1x50xf32>
    %241 = arith.addf %209, %240 : vector<1x50xf32>
    %242 = vector.extract_strided_slice %5 {offsets = [61, 0], sizes = [1, 64], strides = [1, 1]} : vector<64x64xbf16> to vector<1x64xbf16>
    %c3904 = arith.constant 3904 : index
    %c0_127 = arith.constant 0 : index
    %243 = vector.load %arg3[%c3904, %c0_127] : memref<4096x50xbf16, #tpu.memory_space<vmem>>, vector<64x50xbf16>
    %cst_128 = arith.constant dense<0.000000e+00> : vector<1x50xf32>
    %244 = tpu.matmul %242, %243, %cst_128 {dimension_numbers = #tpu.dot_dimension_numbers<[1], [0], [0], [1], [0, 0, 1, 1], [], []>} : vector<1x64xbf16>, vector<64x50xbf16>, vector<1x50xf32> -> vector<1x50xf32>
    %245 = arith.addf %213, %244 : vector<1x50xf32>
    %246 = vector.extract_strided_slice %5 {offsets = [62, 0], sizes = [1, 64], strides = [1, 1]} : vector<64x64xbf16> to vector<1x64xbf16>
    %c3968 = arith.constant 3968 : index
    %c0_129 = arith.constant 0 : index
    %247 = vector.load %arg3[%c3968, %c0_129] : memref<4096x50xbf16, #tpu.memory_space<vmem>>, vector<64x50xbf16>
    %cst_130 = arith.constant dense<0.000000e+00> : vector<1x50xf32>
    %248 = tpu.matmul %246, %247, %cst_130 {dimension_numbers = #tpu.dot_dimension_numbers<[1], [0], [0], [1], [0, 0, 1, 1], [], []>} : vector<1x64xbf16>, vector<64x50xbf16>, vector<1x50xf32> -> vector<1x50xf32>
    %249 = arith.addf %217, %248 : vector<1x50xf32>
    %250 = vector.extract_strided_slice %5 {offsets = [63, 0], sizes = [1, 64], strides = [1, 1]} : vector<64x64xbf16> to vector<1x64xbf16>
    %c4032 = arith.constant 4032 : index
    %c0_131 = arith.constant 0 : index
    %251 = vector.load %arg3[%c4032, %c0_131] : memref<4096x50xbf16, #tpu.memory_space<vmem>>, vector<64x50xbf16>
    %cst_132 = arith.constant dense<0.000000e+00> : vector<1x50xf32>
    %252 = tpu.matmul %250, %251, %cst_132 {dimension_numbers = #tpu.dot_dimension_numbers<[1], [0], [0], [1], [0, 0, 1, 1], [], []>} : vector<1x64xbf16>, vector<64x50xbf16>, vector<1x50xf32> -> vector<1x50xf32>
    %253 = arith.addf %221, %252 : vector<1x50xf32>
    %254 = arith.addf %225, %229 : vector<1x50xf32>
    %255 = arith.addf %233, %237 : vector<1x50xf32>
    %256 = arith.addf %241, %245 : vector<1x50xf32>
    %257 = arith.addf %249, %253 : vector<1x50xf32>
    %258 = arith.addf %254, %255 : vector<1x50xf32>
    %259 = arith.addf %256, %257 : vector<1x50xf32>
    %260 = arith.addf %258, %259 : vector<1x50xf32>
    %c0_133 = arith.constant 0 : index
    %c0_134 = arith.constant 0 : index
    %261 = vector.load %arg4[%c0_133, %c0_134] : memref<3x128xf32, #tpu.memory_space<vmem>>, vector<3x128xf32>
    %262 = vector.extract_strided_slice %261 {offsets = [0, 0], sizes = [1, 50], strides = [1, 1]} : vector<3x128xf32> to vector<1x50xf32>
    %263 = vector.extract_strided_slice %261 {offsets = [1, 0], sizes = [1, 50], strides = [1, 1]} : vector<3x128xf32> to vector<1x50xf32>
    %264 = vector.extract_strided_slice %261 {offsets = [2, 0], sizes = [1, 1], strides = [1, 1]} : vector<3x128xf32> to vector<1x1xf32>
    %265 = arith.addf %260, %262 : vector<1x50xf32>
    %cst_135 = arith.constant 0.000000e+00 : f32
    %266 = vector.broadcast %cst_135 : f32 to vector<1x50xf32>
    %267 = arith.maximumf %265, %266 : vector<1x50xf32>
    %268 = arith.mulf %267, %263 : vector<1x50xf32>
    %cst_136 = arith.constant dense<0.000000e+00> : vector<1xf32>
    %269 = vector.multi_reduction <add>, %268, %cst_136 [1] : vector<1x50xf32> to vector<1xf32>
    %270 = vector.shape_cast %269 : vector<1xf32> to vector<1x1xf32>
    %271 = arith.addf %270, %264 : vector<1x1xf32>
    %c0_137 = arith.constant 0 : index
    %c0_138 = arith.constant 0 : index
    %272 = vector.load %arg5[%c0_137, %c0_138] : memref<1x1xf32, #tpu.memory_space<vmem>>, vector<1x1xf32>
    tpu.vector_store %arg5[%c0_137, %c0_138], %271 {strides = array<i32>} : memref<1x1xf32, #tpu.memory_space<vmem>>, vector<1x1xf32>,
    return
  }
  func.func @transform_0(%arg0: i32) -> (i32, i32) {
    %c0_i32 = arith.constant 0 : i32
    %c0_i32_0 = arith.constant 0 : i32
    %c0_i32_1 = arith.constant 0 : i32
    return %c0_i32, %c0_i32_0 : i32, i32
  }
  func.func @transform_1(%arg0: i32) -> (i32, i32) {
    %c0_i32 = arith.constant 0 : i32
    %c0_i32_0 = arith.constant 0 : i32
    %c0_i32_1 = arith.constant 0 : i32
    return %c0_i32, %c0_i32_0 : i32, i32
  }
  func.func @transform_2(%arg0: i32) -> (i32, i32) {
    %c0_i32 = arith.constant 0 : i32
    %c0_i32_0 = arith.constant 0 : i32
    %c0_i32_1 = arith.constant 0 : i32
    return %c0_i32, %c0_i32_0 : i32, i32
  }
  func.func @transform_3(%arg0: i32) -> (i32, i32) {
    %c0_i32 = arith.constant 0 : i32
    %c0_i32_0 = arith.constant 0 : i32
    %c0_i32_1 = arith.constant 0 : i32
    return %c0_i32, %c0_i32_0 : i32, i32
  }
  func.func @transform_4(%arg0: i32) -> (i32, i32) {
    %c0_i32 = arith.constant 0 : i32
    %c0_i32_0 = arith.constant 0 : i32
    %c0_i32_1 = arith.constant 0 : i32
    return %c0_i32, %c0_i32_0 : i32, i32
  }
}

</mosaic_0001>

<bundles_post_ra>
// kernel: tpu_custom_call.1
= control target key start
LH: loop header
LB: loop body
LE: loop exit
PB: predicated region body
PF: predicated region fallthrough
CT: control target
= control target key end

     0   :  { %vm53_vm0 = vcmask 1045504   ;;  %vm28_vm1 = vcmask 48128   ;;  %vm7598_vm2 = vmmov 0   ;;  %s9185_s0 = inlined_call_operand.vmem [shape: f32[6,64], index: 0, kind: input, shape index: {}]   ;;  %s9186_s1 = inlined_call_operand.vmem [shape: f32[64,6], index: 1, kind: input, shape index: {}]   ;;  %s9187_s2 = inlined_call_operand.vmem [shape: bf16[4096,50], index: 2, kind: input, shape index: {}]   ;;  %s9188_s3 = inlined_call_operand.vmem [shape: f32[3,128], index: 3, kind: input, shape index: {}]   ;;  %s9189_s4 = inlined_call_operand.hbm [shape: f32[1,1], index: 4, kind: output, shape index: {}]  }
   0x1   :  { %v27_v0 = vld [vmem:[%s9185_s0] sm:$0x3f]  ;;  %v20_v2 = vld [vmem:[%s9186_s1 + $0x8] sm:$0xff]  ;;  %v21_v6 = vld [vmem:[%s9186_s1 + $0x10] sm:$0xff] }
   0x2   :  { %v19_v1 = vld [vmem:[%s9186_s1] sm:$0xff]  ;;  %v55_v3 = vsel %vm53_vm0, %v27_v0, 0  ;;  %v33_v5 = vsel %vm28_vm1, %v20_v2, 0  ;;  %v22_v7 = vld [vmem:[%s9186_s1 + $0x18] sm:$0xff]  ;;  %v36_v12 = vsel %vm28_vm1, %v21_v6, 0  ;;  %v24_v13 = vld [vmem:[%s9186_s1 + $0x28] sm:$0xff] }
   0x3   :  { %v30_v4 = vsel %vm28_vm1, %v19_v1, 0  ;;  %v23_v8 = vld [vmem:[%s9186_s1 + $0x20] sm:$0xff]  ;;  %v7645_v9 = vand.u32 4294901760, %v55_v3  ;;  %v7649_v11 = vand.u32 4294901760, %v33_v5  ;;  %v25_v14 = vld [vmem:[%s9186_s1 + $0x30] sm:$0xff]  ;;  %v7658_v15 = vand.u32 4294901760, %v36_v12 }
   0x4   :  { %v7647_v10 = vand.u32 4294901760, %v30_v4  ;;  %v39_v16 = vsel %vm28_vm1, %v22_v7, 0  ;;  %v42_v17 = vsel %vm28_vm1, %v23_v8, 0  ;;  %v45_v18 = vsel %vm28_vm1, %v24_v13, 0  ;;  %v26_v39 = vld [vmem:[%s9186_s1 + $0x38] sm:$0xff]  ;;  %v7321_v2 = vld [vmem:[%s9187_s2 + $0x10] sm:$0xff]  }
   0x5   :  { %6464 = vmatprep.subr.mxu0 %v7645_v9  ;;  %v235_v20 = vsub.f32 %v55_v3, %v7645_v9  ;;  %v7669_v21 = vsub.f32 %v33_v5, %v7649_v11  ;;  %v7672_v22 = vand.u32 4294901760, %v39_v16  ;;  %v7676_v23 = vsub.f32 %v36_v12, %v7658_v15  ;;  %v7319_v63 = vld [vmem:[%s9187_s2 + $0x18] sm:$0xff]   ;;  %v7322_v3 = vld [vmem:[%s9187_s2 + $0x110] sm:$0xff]   ;;  %v7324_v5 = vld [vmem:[%s9187_s2 + $0x108] sm:$0xff]  }
   0x6   :  { %v7665_v19 = vsub.f32 %v30_v4, %v7647_v10  ;;  %6480 = vmatprep.mubr.f32.mxu1 %v7647_v10  ;;  %6465 = vmatpush3.msra.mxu0 %v7645_v9  ;;  %v7678_v24 = vand.u32 4294901760, %v42_v17  ;;  %v7680_v25 = vand.u32 4294901760, %v45_v18  ;;  %v48_v26 = vsel %vm28_vm1, %v25_v14, 0  ;;  %v7320_v1 = vld [vmem:[%s9187_s2 + $0x118] sm:$0xff]   ;;  %v7323_v4 = vld [vmem:[%s9187_s2 + $0x8] sm:$0xff]   ;;  %v7325_v6 = vld [vmem:[%s9187_s2] sm:$0xff]  }
   0x7   :  { %v236_v28 = vand.u32 4294901760, %v235_v20  ;;  %6492 = vmatprep.subr.mxu0 %v235_v20  ;;  %v135_v29 = vand.u32 4294901760, %v7669_v21  ;;  %v7686_v30 = vsub.f32 %v39_v16, %v7672_v22  ;;  %v145_v31 = vand.u32 4294901760, %v7676_v23  ;;  %v7326_v7 = vld [vmem:[%s9187_s2 + $0x100] sm:$0xff]  }
   0x8   :  { %v125_v27 = vand.u32 4294901760, %v7665_v19  ;;  %v7690_v32 = vsub.f32 %v42_v17, %v7678_v24  ;;  %v7693_v33 = vsub.f32 %v45_v18, %v7680_v25  ;;  %v7695_v34 = vand.u32 4294901760, %v48_v26 }
   0x9   :  { %v237_v36 = vsub.f32 %v235_v20, %v236_v28  ;;  %v136_v37 = vsub.f32 %v7669_v21, %v135_v29  ;;  %v155_v38 = vand.u32 4294901760, %v7686_v30  ;;  %v146_v40 = vsub.f32 %v7676_v23, %v145_v31 }
   0xa   :  { %v126_v35 = vsub.f32 %v7665_v19, %v125_v27  ;;  %v165_v41 = vand.u32 4294901760, %v7690_v32  ;;  %v175_v42 = vand.u32 4294901760, %v7693_v33  ;;  %v184_v43 = vsub.f32 %v48_v26, %v7695_v34 }
   0xb   :  { %v238_v45 = vand.u32 4294901760, %v237_v36  ;;  %v137_v46 = vand.u32 4294901760, %v136_v37  ;;  %v156_v47 = vsub.f32 %v7686_v30, %v155_v38  ;;  %v147_v48 = vand.u32 4294901760, %v146_v40 }
   0xc   :  { %v127_v44 = vand.u32 4294901760, %v126_v35  ;;  %v166_v49 = vsub.f32 %v7690_v32, %v165_v41  ;;  %v176_v50 = vsub.f32 %v7693_v33, %v175_v42  ;;  %v185_v51 = vand.u32 4294901760, %v184_v43 }
   0xd   :  { %6478 = vmatprep.subr.mxu1 %v238_v45  ;;  %v51_v52 = vsel %vm28_vm1, %v26_v39, 0  ;;  %v157_v53 = vand.u32 4294901760, %v156_v47  ;;  %v7597_v0 = vmov 0.0  }
   0xe   :  { %6466 = vmatprep.mubr.f32.mxu0 %v127_v44  ;;  %6479 = vmatpush3.msra.mxu1 %v238_v45  ;;  %v167_v54 = vand.u32 4294901760, %v166_v49  ;;  %v186_v55 = vsub.f32 %v184_v43, %v185_v51  ;;  %v193_v56 = vand.u32 4294901760, %v51_v52  ;;  %v177_v57 = vand.u32 4294901760, %v176_v50 }
   0xf   :  { %6467 = vmatmul.mubr.f32.vlgmr.msra.gmra.mxu0 %v137_v46  ;;  %6481 = vmatmul.mubr.f32.vlgmr.msra.gmra.mxu1 %v7649_v11 }
  0x10   :  { %6493 = vmatpush3.msra.mxu0 %v235_v20  ;;  %6506 = vmatprep.subr.mxu1 %v7645_v9  ;;  %v194_v58 = vsub.f32 %v51_v52, %v193_v56  ;;  %v187_v59 = vand.u32 4294901760, %v186_v55 }
  0x11   :  { %6469 = vmatprep.mubr.f32.mxu0 %v147_v48  ;;  %6507 = vmatpush3.msra.mxu1 %v7645_v9 }
  0x12   :  { %6483 = vmatprep.mubr.f32.mxu1 %v7658_v15  ;;  %v195_v60 = vand.u32 4294901760, %v194_v58  ;;  %6520 = vmatprep.subr.mxu0 %v236_v28 }
  0x13   :  { %6470 = vmatmul.mubr.f32.gmra.mxu0 %v157_v53  ;;  %6484 = vmatmul.mubr.f32.gmra.mxu1 %v7672_v22 }
  0x14   :  { %6472 = vmatprep.mubr.f32.mxu0 %v167_v54  ;;  %6486 = vmatprep.mubr.f32.mxu1 %v7678_v24  ;;  %v196_v61 = vsub.f32 %v194_v58, %v195_v60 }
  0x15   :  { %6534 = vmatprep.subr.mxu1 %v7645_v9 }
  0x16   :  { %v197_v62 = vand.u32 4294901760, %v196_v61 }
  0x17   :  { %6473 = vmatmul.mubr.f32.gmra.mxu0 %v177_v57  ;;  %6487 = vmatmul.mubr.f32.gmra.mxu1 %v7680_v25 }
  0x18   :  { %6475 = vmatprep.mubr.f32.mxu0 %v187_v59  ;;  %6489 = vmatprep.mubr.f32.mxu1 %v7695_v34 }
  0x1b   :  { %6476 = vmatmul.mubr.f32.gmra.mxu0 %v197_v62  ;;  %6490 = vmatmul.mubr.f32.gmra.mxu1 %v193_v56 }
  0x1c   :  { %6494 = vmatprep.mubr.f32.mxu0 %v7665_v19  ;;  %6508 = vmatprep.mubr.f32.mxu1 %v125_v27 }
  0x1f   :  { %6495 = vmatmul.mubr.f32.vlgmr.msra.gmra.mxu0 %v7669_v21  ;;  %6509 = vmatmul.mubr.f32.vlgmr.msra.gmra.mxu1 %v135_v29 }
  0x20   :  { %6521 = vmatpush3.msra.mxu0 %v236_v28  ;;  %6535 = vmatpush3.msra.mxu1 %v7645_v9 }
  0x21   :  { %6497 = vmatprep.mubr.f32.mxu0 %v7676_v23  ;;  %6511 = vmatprep.mubr.f32.mxu1 %v145_v31 }
  0x22   :  { %6560 = vmatprep.subr.bf16.mxu1 %v7597_v0  ;;  %6548 = vmatprep.subr.bf16.mxu0 %v7597_v0 }
  0x23   :  { %6498 = vmatmul.mubr.f32.gmra.mxu0 %v7686_v30  ;;  %6512 = vmatmul.mubr.f32.gmra.mxu1 %v155_v38 }
  0x24   :  { %6500 = vmatprep.mubr.f32.mxu0 %v7690_v32  ;;  %6514 = vmatprep.mubr.f32.mxu1 %v165_v41 }
  0x27   :  { %6501 = vmatmul.mubr.f32.gmra.mxu0 %v7693_v33  ;;  %6515 = vmatmul.mubr.f32.gmra.mxu1 %v175_v42 }
  0x28   :  { %6503 = vmatprep.mubr.f32.mxu0 %v184_v43  ;;  %6517 = vmatprep.mubr.f32.mxu1 %v185_v51 }
  0x2b   :  { %6504 = vmatmul.mubr.f32.gmra.mxu0 %v194_v58  ;;  %6518 = vmatmul.mubr.f32.gmra.mxu1 %v195_v60 }
  0x2c   :  { %6522 = vmatprep.mubr.f32.mxu0 %v7647_v10  ;;  %6536 = vmatprep.mubr.f32.mxu1 %v7647_v10 }
  0x2f   :  { %6523 = vmatmul.mubr.f32.vlgmr.msra.gmra.mxu0 %v7649_v11  ;;  %6537 = vmatmul.mubr.f32.vlgmr.msra.gmra.mxu1 %v7649_v11 }
  0x30   :  { %6525 = vmatprep.mubr.f32.mxu0 %v7658_v15  ;;  %6539 = vmatprep.mubr.f32.mxu1 %v7658_v15 }
  0x31   :  { %6561 = vmatpush3.bf16.msra.mxu1 %v7319_v63  ;;  %6549 = vmatpush3.bf16.msra.mxu0 %v7320_v1 }
  0x32   :  { %6562 = vmatprep.subr.bf16.mxu1 %v7597_v0  ;;  %6550 = vmatprep.subr.bf16.mxu0 %v7597_v0 }
  0x33   :  { %6526 = vmatmul.mubr.f32.gmra.mxu0 %v7672_v22  ;;  %6540 = vmatmul.mubr.f32.gmra.mxu1 %v7672_v22 }
  0x34   :  { %6528 = vmatprep.mubr.f32.mxu0 %v7678_v24  ;;  %6542 = vmatprep.mubr.f32.mxu1 %v7678_v24 }
  0x35   :  { %6563 = vmatpush3.bf16.msra.mxu1 %v7321_v2  ;;  %6551 = vmatpush3.bf16.msra.mxu0 %v7322_v3 }
  0x36   :  { %6564 = vmatprep.subr.bf16.mxu1 %v7597_v0  ;;  %6552 = vmatprep.subr.bf16.mxu0 %v7597_v0 }
  0x37   :  { %6529 = vmatmul.mubr.f32.gmra.mxu0 %v7680_v25  ;;  %6543 = vmatmul.mubr.f32.gmra.mxu1 %v7680_v25 }
  0x38   :  { %6531 = vmatprep.mubr.f32.mxu0 %v7695_v34  ;;  %6545 = vmatprep.mubr.f32.mxu1 %v7695_v34 }
  0x39   :  { %6565 = vmatpush3.bf16.msra.mxu1 %v7323_v4  ;;  %6553 = vmatpush3.bf16.msra.mxu0 %v7324_v5 }
  0x3a   :  { %6566 = vmatprep.subr.bf16.mxu1 %v7597_v0  ;;  %6554 = vmatprep.subr.bf16.mxu0 %v7597_v0 }
  0x3b   :  { %6532 = vmatmul.mubr.f32.gmra.mxu0 %v193_v56  ;;  %6546 = vmatmul.mubr.f32.gmra.mxu1 %v193_v56 }
  0x3c   :  { %6568 = vmatprep.mubr.msk.bf16.mxu1 %vm7598_vm2, %v7597_v0  ;;  %6556 = vmatprep.mubr.msk.bf16.mxu0 %vm7598_vm2, %v7597_v0 }
  0x3d   :  { %6567 = vmatpush3.bf16.msra.mxu1 %v7325_v6  ;;  %6555 = vmatpush3.bf16.msra.mxu0 %v7326_v7 }
  0x3e   :  { %6584 = vmatprep.subr.bf16.mxu1 %v7597_v0  ;;  %6572 = vmatprep.subr.bf16.mxu0 %v7597_v0 }
  0x3f   :  { %9 = vsyncpa [#allocation3], 0  ;;  %vm914_vm3 = vcmask 523264   ;;  %vm5747_vm4 = vcmask 401408   ;;  %s7599_s14 = smov [#allocation2]   ;;  %vm5754_vm5 = vcmask 0  }
  0x40   :  { %s5762_s15 = sshll.u32 %s7599_s14, 4  ;;  %s5763_s15 = int_to_ptr.vmem [resolvable:$true] %s5762_s15 }
  0x41   :  { %s7575_s16 = scalar_lea.vmem %s5763_s15, 16  ;;  %s7579_s17 = scalar_lea.vmem %s5763_s15, 32 }
  0x42   :  { %p7576_p0 = scmp.ne.s32.totalorder %s5763_s15, %s7575_s16  ;;  %p7580_p1 = scmp.lt.s32.totalorder %s5763_s15, %s5763_s15 }
  0x43   :  { %p7581_p2 = scmp.lt.s32.totalorder %s7579_s17, %s7575_s16 }
  0x45   :  { %p7582_p3 = por %p7581_p2, %p7580_p1 }
  0x47   :  { %p7583_p4 = pnand %p7582_p3, %p7576_p0 }
  0xcf   :  { %v6468_v8 = vpop.f32.mrf.mxu0  ;;  %v6482_v9 = vpop.f32.mrf.mxu1 }
  0xd0   :  { %v282_v39 = vadd.f32 %v6482_v9, %v6468_v8 }
  0xd1   :  { %v129_v10 = vpop.f32.mrf.mxu0  ;;  %v275_v11 = vpop.f32.mrf.mxu1 }
  0xd2   :  { %v276_v43 = vadd.f32 %v275_v11, %v129_v10  ;;  %v7327_v10 = vld [vmem:[%s9187_s2 + $0x38] sm:$0xff]  }
  0xd3   :  { %v6471_v12 = vpop.f32.mrf.mxu0  ;;  %v6485_v13 = vpop.f32.mrf.mxu1 }
  0xd4   :  { %v294_v14 = vadd.f32 %v6485_v13, %v6471_v12 }
  0xd5   :  { %v7779_v15 = vpop.f32.mrf.mxu0  ;;  %v7781_v16 = vpop.f32.mrf.mxu1 }
  0xd7   :  { %v6474_v17 = vpop.f32.mrf.mxu0  ;;  %v6488_v18 = vpop.f32.mrf.mxu1 }
  0xd8   :  { %v306_v19 = vadd.f32 %v6488_v18, %v6474_v17  ;;  %v7328_v17 = vld [vmem:[%s9187_s2 + $0x138] sm:$0xff]  }
  0xd9   :  { %v169_v20 = vpop.f32.mrf.mxu0  ;;  %v299_v21 = vpop.f32.mrf.mxu1 }
  0xda   :  { %v300_v22 = vadd.f32 %v299_v21, %v169_v20 }
  0xdb   :  { %v6477_v23 = vpop.f32.mrf.mxu0  ;;  %v6491_v24 = vpop.f32.mrf.mxu1 }
  0xdc   :  { %v318_v25 = vadd.f32 %v6491_v24, %v6477_v23  ;;  %v7329_v23 = vld [vmem:[%s9187_s2 + $0x30] sm:$0xff]  }
  0xdd   :  { %v7783_v26 = vpop.f32.mrf.mxu0  ;;  %v7785_v27 = vpop.f32.mrf.mxu1 }
  0xdf   :  { %v6496_v28 = vpop.f32.mrf.mxu0  ;;  %v6510_v29 = vpop.f32.mrf.mxu1 }
  0xe0   :  { %v399_v44 = vadd.f32 %v6496_v28, %v282_v39  ;;  %v7333_v39 = vld [vmem:[%s9187_s2 + $0x20] sm:$0xff]  }
  0xe1   :  { %v391_v30 = vpop.f32.mrf.mxu0  ;;  %v514_v31 = vpop.f32.mrf.mxu1 }
  0xe2   :  { %v392_v49 = vadd.f32 %v391_v30, %v276_v43  ;;  %v523_v54 = vadd.f32 %v6510_v29, %v399_v44  ;;  %v7330_v29 = vld [vmem:[%s9187_s2 + $0x130] sm:$0xff]   ;;  %v7336_v43 = vld [vmem:[%s9187_s2 + $0x158] sm:$0xff]  }
  0xe3   :  { %v6499_v32 = vpop.f32.mrf.mxu0  ;;  %v6513_v34 = vpop.f32.mrf.mxu1 }
  0xe4   :  { %v413_v33 = vadd.f32 %v6499_v32, %v294_v14  ;;  %v515_v58 = vadd.f32 %v514_v31, %v392_v49  ;;  %v7341_v49 = vld [vmem:[%s9187_s2 + $0x40] sm:$0xff]  }
  0xe5   :  { %v7787_v35 = vpop.f32.mrf.mxu0  ;;  %v7791_v37 = vpop.f32.mrf.mxu1 }
  0xe6   :  { %v7789_v36 = vadd.f32 %v6513_v34, %v413_v33  ;;  %v7331_v33 = vld [vmem:[%s9187_s2 + $0x28] sm:$0xff]  }
  0xe7   :  { %v6502_v38 = vpop.f32.mrf.mxu0  ;;  %v6516_v41 = vpop.f32.mrf.mxu1 }
  0xe8   :  { %v427_v40 = vadd.f32 %v6502_v38, %v306_v19  ;;  %v7332_v38 = vld [vmem:[%s9187_s2 + $0x128] sm:$0xff]  }
  0xe9   :  { %v419_v42 = vpop.f32.mrf.mxu0  ;;  %v546_v47 = vpop.f32.mrf.mxu1 }
  0xea   :  { %v555_v45 = vadd.f32 %v6516_v41, %v427_v40  ;;  %v420_v46 = vadd.f32 %v419_v42, %v300_v22  ;;  %v7334_v40 = vld [vmem:[%s9187_s2 + $0x120] sm:$0xff]   ;;  %v7335_v42 = vld [vmem:[%s9187_s2 + $0x58] sm:$0xff]  }
  0xeb   :  { %v6505_v48 = vpop.f32.mrf.mxu0  ;;  %v6519_v52 = vpop.f32.mrf.mxu1 }
  0xec   :  { %v547_v50 = vadd.f32 %v546_v47, %v420_v46  ;;  %v441_v51 = vadd.f32 %v6505_v48, %v318_v25  ;;  %v7338_v46 = vld [vmem:[%s9187_s2 + $0x150] sm:$0xff]   ;;  %v7339_v47 = vld [vmem:[%s9187_s2 + $0x48] sm:$0xff]  }
  0xed   :  { %v7793_v53 = vpop.f32.mrf.mxu0  ;;  %v7795_v56 = vpop.f32.mrf.mxu1  ;;  %v7340_v48 = vld [vmem:[%s9187_s2 + $0x148] sm:$0xff]  }
  0xee   :  { %v571_v55 = vadd.f32 %v6519_v52, %v441_v51  ;;  %v7343_v51 = vld [vmem:[%s9187_s2 + $0x78] sm:$0xff]  }
  0xef   :  { %v6524_v57 = vpop.f32.mrf.mxu0  ;;  %v6538_v60 = vpop.f32.mrf.mxu1 }
  0xf0   :  { %v651_v59 = vadd.f32 %v6524_v57, %v523_v54  ;;  %v7344_v54 = vld [vmem:[%s9187_s2 + $0x178] sm:$0xff]   ;;  %v7345_v57 = vld [vmem:[%s9187_s2 + $0x70] sm:$0xff]  }
  0xf1   :  { %v644_v61 = vpop.f32.mrf.mxu0  ;;  %v758_v1 = vpop.f32.mrf.mxu1 }
  0xf2   :  { %v765_v62 = vadd.f32 %v6538_v60, %v651_v59  ;;  %v645_v63 = vadd.f32 %v644_v61, %v515_v58  ;;  %v7346_v58 = vld [vmem:[%s9187_s2 + $0x170] sm:$0xff]   ;;  %v7347_v59 = vld [vmem:[%s9187_s2 + $0x68] sm:$0xff]   ;;  %v7349_v61 = vld [vmem:[%s9187_s2 + $0x60] sm:$0xff]  }
  0xf3   :  { %v7797_v2 = vpop.f32.mrf.mxu0  ;;  %v7799_v4 = vpop.f32.mrf.mxu1  ;;  %v7348_v60 = vld [vmem:[%s9187_s2 + $0x168] sm:$0xff]  }
  0xf4   :  { %v759_v3 = vadd.f32 %v758_v1, %v645_v63  ;;  %v805_v6 = vmax.f32 %v765_v62, 0.0  ;;  %v7350_v62 = vld [vmem:[%s9187_s2 + $0x160] sm:$0xff]   ;;  %v7351_v63 = vld [vmem:[%s9187_s2 + $0x98] sm:$0xff]  }
  0xf5   :  { %v7801_v5 = vpop.f32.mrf.mxu0  ;;  %v7803_v8 = vpop.f32.mrf.mxu1 }
  0xf6   :  { %v804_v7 = vmax.f32 %v759_v3, 0.0  ;;  %v7352_v3 = vld [vmem:[%s9187_s2 + $0x198] sm:$0xff]  }
  0xf7   :  { %v6530_v9 = vpop.f32.mrf.mxu0  ;;  %v6544_v13 = vpop.f32.mrf.mxu1 }
  0xf8   :  { %v7808_v11 = vpack.c.bf16 %v805_v6, %v804_v7  ;;  %v675_v12 = vadd.f32 %v6530_v9, %v555_v45  ;;  %v7337_v45 = vld [vmem:[%s9187_s2 + $0x50] sm:$0xff]  }
  0xf9   :  { %v668_v14 = vpop.f32.mrf.mxu0  ;;  %v782_v20 = vpop.f32.mrf.mxu1  ;;  %v7353_v7 = vld [vmem:[%s9187_s2 + $0x90] sm:$0xff]  }
  0xfa   :  { %v669_v18 = vadd.f32 %v668_v14, %v547_v50  ;;  %v789_v19 = vadd.f32 %v6544_v13, %v675_v12  ;;  %6569 = vmatmul.mubr.msk.bf16.vlgmr.msra.gmra.mxu1 %vm914_vm3, %v7808_v11  ;;  %v889_v21 = vrot.slane %v7808_v11, 4  ;;  %v7850_v41 = vshrl.u32 %v7808_v11, 16  ;;  %v7342_v50 = vld [vmem:[%s9187_s2 + $0x140] sm:$0xff]   ;;  %v7354_v9 = vld [vmem:[%s9187_s2 + $0x190] sm:$0xff]   ;;  %v7356_v12 = vld [vmem:[%s9187_s2 + $0x188] sm:$0xff]  }
  0xfb   :  { %6585 = vmatpush3.bf16.msra.mxu1 %v7327_v10  ;;  %v6533_v22 = vpop.f32.mrf.mxu0  ;;  %6592 = vmatprep.mubr.msk.bf16.mxu1 %vm7598_vm2, %v7597_v0  ;;  %v6547_v28 = vpop.f32.mrf.mxu1  ;;  %v1246_v52 = vrot.slane %v7808_v11, 1  ;;  %v7355_v10 = vld [vmem:[%s9187_s2 + $0x88] sm:$0xff]   ;;  %v7357_v13 = vld [vmem:[%s9187_s2 + $0x80] sm:$0xff]  }
  0xfc   :  { %v687_v24 = vadd.f32 %v6533_v22, %v571_v55  ;;  %v783_v25 = vadd.f32 %v782_v20, %v669_v18  ;;  %6557 = vmatmul.mubr.msk.bf16.vlgmr.msra.gmra.mxu0 %vm914_vm3, %v889_v21  ;;  %6586 = vmatprep.subr.bf16.mxu1 %v7597_v0  ;;  %v809_v30 = vmax.f32 %v789_v19, 0.0  ;;  %v1035_v44 = vrot.slane %v7850_v41, 4  ;;  %v7358_v14 = vld [vmem:[%s9187_s2 + $0x180] sm:$0xff]   ;;  %v7360_v19 = vld [vmem:[%s9187_s2 + $0x1b8] sm:$0xff]   ;;  %v7361_v21 = vld [vmem:[%s9187_s2 + $0xb0] sm:$0xff]  }
  0xfd   :  { %6573 = vmatpush3.bf16.msra.mxu0 %v7328_v17  ;;  %6580 = vmatprep.mubr.msk.bf16.mxu0 %vm7598_vm2, %v7597_v0  ;;  %v1178_v55 = vrot.slane %v7808_v11, 5  ;;  %v1390_v1 = vrot.slane %v7850_v41, 1  ;;  %v1322_v6 = vrot.slane %v7850_v41, 5  ;;  %v7359_v17 = vld [vmem:[%s9187_s2 + $0xb8] sm:$0xff]   ;;  %v1534_v18 = vrot.slane %v7808_v11, 2  ;;  %v7362_v22 = vld [vmem:[%s9187_s2 + $0x1b0] sm:$0xff]  }
  0xfe   :  { %v808_v31 = vmax.f32 %v783_v25, 0.0  ;;  %v7828_v32 = vadd.f32 %v6547_v28, %v687_v24  ;;  %6574 = vmatprep.subr.bf16.mxu0 %v7597_v0  ;;  %v1466_v20 = vrot.slane %v7808_v11, 6  ;;  %v7364_v24 = vld [vmem:[%s9187_s2 + $0x1a8] sm:$0xff]   ;;  %v7365_v25 = vld [vmem:[%s9187_s2 + $0xa0] sm:$0xff]  }
  0xff   :  { %6587 = vmatpush3.bf16.msra.mxu1 %v7329_v23  ;;  %v7363_v23 = vld [vmem:[%s9187_s2 + $0xa8] sm:$0xff]   ;;  %v7366_v28 = vld [vmem:[%s9187_s2 + $0x1a0] sm:$0xff]  }
 0x100   :  { %v7834_v34 = vpack.c.bf16 %v809_v30, %v808_v31  ;;  %6588 = vmatprep.subr.bf16.mxu1 %v7597_v0  ;;  %v1678_v30 = vrot.slane %v7850_v41, 2  ;;  %v7368_v31 = vld [vmem:[%s9187_s2 + $0x1d8] sm:$0xff]  }
 0x101   :  { %6575 = vmatpush3.bf16.msra.mxu0 %v7330_v29  ;;  %v7367_v29 = vld [vmem:[%s9187_s2 + $0xd8] sm:$0xff]  }
 0x102   :  { %6576 = vmatprep.subr.bf16.mxu0 %v7597_v0 }
 0x103   :  { %6589 = vmatpush3.bf16.msra.mxu1 %v7331_v33  ;;  %v1610_v33 = vrot.slane %v7850_v41, 6 }
 0x104   :  { %6590 = vmatprep.subr.bf16.mxu1 %v7597_v0 }
 0x105   :  { %6577 = vmatpush3.bf16.msra.mxu0 %v7332_v38  ;;  %v7369_v38 = vld [vmem:[%s9187_s2 + $0xd0] sm:$0xff]  }
 0x106   :  { %6578 = vmatprep.subr.bf16.mxu0 %v7597_v0 }
 0x107   :  { %6591 = vmatpush3.bf16.msra.mxu1 %v7333_v39  ;;  %v7370_v39 = vld [vmem:[%s9187_s2 + $0x1d0] sm:$0xff]  }
 0x108   :  { %6608 = vmatprep.subr.bf16.mxu1 %v7597_v0 }
 0x109   :  { %6579 = vmatpush3.bf16.msra.mxu0 %v7334_v40  ;;  %v7371_v40 = vld [vmem:[%s9187_s2 + $0xc8] sm:$0xff]  }
 0x10a   :  { %6593 = vmatmul.mubr.msk.bf16.vlgmr.msra.gmra.mxu1 %vm914_vm3, %v7850_v41  ;;  %6596 = vmatprep.subr.bf16.mxu0 %v7597_v0 }
 0x10b   :  { %6609 = vmatpush3.bf16.msra.mxu1 %v7335_v42  ;;  %6616 = vmatprep.mubr.msk.bf16.mxu1 %vm7598_vm2, %v7597_v0  ;;  %v7372_v42 = vld [vmem:[%s9187_s2 + $0x1c8] sm:$0xff]  }
 0x10c   :  { %6581 = vmatmul.mubr.msk.bf16.vlgmr.msra.gmra.mxu0 %vm914_vm3, %v1035_v44  ;;  %6610 = vmatprep.subr.bf16.mxu1 %v7597_v0  ;;  %v7374_v44 = vld [vmem:[%s9187_s2 + $0x1c0] sm:$0xff]  }
 0x10d   :  { %6597 = vmatpush3.bf16.msra.mxu0 %v7336_v43  ;;  %6604 = vmatprep.mubr.msk.bf16.mxu0 %vm7598_vm2, %v7597_v0  ;;  %v7373_v43 = vld [vmem:[%s9187_s2 + $0xc0] sm:$0xff]  }
 0x10e   :  { %6598 = vmatprep.subr.bf16.mxu0 %v7597_v0 }
 0x10f   :  { %6611 = vmatpush3.bf16.msra.mxu1 %v7337_v45  ;;  %v7375_v45 = vld [vmem:[%s9187_s2 + $0xf8] sm:$0xff]  }
 0x110   :  { %6612 = vmatprep.subr.bf16.mxu1 %v7597_v0 }
 0x111   :  { %6599 = vmatpush3.bf16.msra.mxu0 %v7338_v46  ;;  %v1822_v46 = vrot.slane %v7808_v11, 3 }
 0x112   :  { %6600 = vmatprep.subr.bf16.mxu0 %v7597_v0 }
 0x113   :  { %6613 = vmatpush3.bf16.msra.mxu1 %v7339_v47  ;;  %v7376_v47 = vld [vmem:[%s9187_s2 + $0x1f8] sm:$0xff]  }
 0x114   :  { %6614 = vmatprep.subr.bf16.mxu1 %v7597_v0 }
 0x115   :  { %6601 = vmatpush3.bf16.msra.mxu0 %v7340_v48  ;;  %v1754_v48 = vrot.slane %v7808_v11, 7  ;;  %v7379_v11 = vld [vmem:[%s9187_s2 + $0xe8] sm:$0xff]  }
 0x116   :  { %6602 = vmatprep.subr.bf16.mxu0 %v7597_v0 }
 0x117   :  { %6615 = vmatpush3.bf16.msra.mxu1 %v7341_v49  ;;  %v7377_v49 = vld [vmem:[%s9187_s2 + $0xf0] sm:$0xff]  }
 0x118   :  { %6632 = vmatprep.subr.bf16.mxu1 %v7597_v0 }
 0x119   :  { %6603 = vmatpush3.bf16.msra.mxu0 %v7342_v50  ;;  %v7378_v50 = vld [vmem:[%s9187_s2 + $0x1f0] sm:$0xff]  }
 0x11a   :  { %6617 = vmatmul.mubr.msk.bf16.vlgmr.msra.gmra.mxu1 %vm914_vm3, %v1246_v52  ;;  %6620 = vmatprep.subr.bf16.mxu0 %v7597_v0  ;;  %v7380_v52 = vld [vmem:[%s9187_s2 + $0x1e8] sm:$0xff]  }
 0x11b   :  { %6633 = vmatpush3.bf16.msra.mxu1 %v7343_v51  ;;  %6640 = vmatprep.mubr.msk.bf16.mxu1 %vm7598_vm2, %v7597_v0  ;;  %v288_v51 = vadd.f32 %v7781_v16, %v7779_v15  ;;  %v7382_v15 = vld [vmem:[%s9187_s2 + $0x1e0] sm:$0xff]  }
 0x11c   :  { %6605 = vmatmul.mubr.msk.bf16.vlgmr.msra.gmra.mxu0 %vm914_vm3, %v1178_v55  ;;  %6634 = vmatprep.subr.bf16.mxu1 %v7597_v0  ;;  %v7381_v55 = vld [vmem:[%s9187_s2 + $0xe0] sm:$0xff]  }
 0x11d   :  { %6621 = vmatpush3.bf16.msra.mxu0 %v7344_v54  ;;  %6628 = vmatprep.mubr.msk.bf16.mxu0 %vm7598_vm2, %v7597_v0  ;;  %v406_v54 = vadd.f32 %v7787_v35, %v288_v51  ;;  %v7383_v35 = vld [vmem:[%s9187_s2 + $0x238] sm:$0xff]   ;;  %v7418_v51 = vld [vmem:[%s9187_s2 + $0x310] sm:$0xff]  }
 0x11e   :  { %6622 = vmatprep.subr.bf16.mxu0 %v7597_v0 }
 0x11f   :  { %6635 = vmatpush3.bf16.msra.mxu1 %v7345_v57  ;;  %v531_v16 = vadd.f32 %v7791_v37, %v406_v54  ;;  %v663_v37 = vadd.f32 %v7797_v2, %v7789_v36  ;;  %v7386_v36 = vld [vmem:[%s9187_s2 + $0x210] sm:$0xff]   ;;  %v7420_v54 = vld [vmem:[%s9187_s2 + $0x308] sm:$0xff]  }
 0x120   :  { %6636 = vmatprep.subr.bf16.mxu1 %v7597_v0 }
 0x121   :  { %6623 = vmatpush3.bf16.msra.mxu0 %v7346_v58  ;;  %v657_v57 = vadd.f32 %v7801_v5, %v531_v16  ;;  %v1966_v58 = vrot.slane %v7850_v41, 3  ;;  %v7385_v5 = vld [vmem:[%s9187_s2 + $0x230] sm:$0xff]   ;;  %v777_v2 = vadd.f32 %v7799_v4, %v663_v37  ;;  %v7389_v4 = vld [vmem:[%s9187_s2 + $0x220] sm:$0xff]   ;;  %v7423_v16 = vld [vmem:[%s9187_s2 + $0x378] sm:$0xff]  }
 0x122   :  { %6624 = vmatprep.subr.bf16.mxu0 %v7597_v0 }
 0x123   :  { %6637 = vmatpush3.bf16.msra.mxu1 %v7347_v59  ;;  %v7384_v59 = vld [vmem:[%s9187_s2 + $0x218] sm:$0xff]  }
 0x124   :  { %6638 = vmatprep.subr.bf16.mxu1 %v7597_v0 }
 0x125   :  { %6625 = vmatpush3.bf16.msra.mxu0 %v7348_v60  ;;  %v1898_v60 = vrot.slane %v7850_v41, 7 }
 0x126   :  { %6626 = vmatprep.subr.bf16.mxu0 %v7597_v0 }
 0x127   :  { %6639 = vmatpush3.bf16.msra.mxu1 %v7349_v61  ;;  %v771_v61 = vadd.f32 %v7803_v8, %v657_v57  ;;  %v7387_v8 = vld [vmem:[%s9187_s2 + $0x228] sm:$0xff]  }
 0x128   :  { %6656 = vmatprep.subr.bf16.mxu1 %v7597_v0 }
 0x129   :  { %6627 = vmatpush3.bf16.msra.mxu0 %v7350_v62  ;;  %v806_v41 = vmax.f32 %v771_v61, 0.0  ;;  %v7388_v62 = vld [vmem:[%s9187_s2 + $0x208] sm:$0xff]  }
 0x12a   :  { %6641 = vmatmul.mubr.msk.bf16.vlgmr.msra.gmra.mxu1 %vm914_vm3, %v1390_v1  ;;  %6644 = vmatprep.subr.bf16.mxu0 %v7597_v0 }
 0x12b   :  { %6657 = vmatpush3.bf16.msra.mxu1 %v7351_v63  ;;  %6664 = vmatprep.mubr.msk.bf16.mxu1 %vm7598_vm2, %v7597_v0  ;;  %v807_v63 = vmax.f32 %v777_v2, 0.0 }
 0x12c   :  { %6629 = vmatmul.mubr.msk.bf16.vlgmr.msra.gmra.mxu0 %vm914_vm3, %v1322_v6  ;;  %6658 = vmatprep.subr.bf16.mxu1 %v7597_v0  ;;  %v7391_v6 = vld [vmem:[%s9187_s2 + $0x278] sm:$0xff]  }
 0x12d   :  { %6645 = vmatpush3.bf16.msra.mxu0 %v7352_v3  ;;  %6652 = vmatprep.mubr.msk.bf16.mxu0 %vm7598_vm2, %v7597_v0  ;;  %v8136_v1 = vpack.c.bf16 %v807_v63, %v806_v41  ;;  %v7390_v3 = vld [vmem:[%s9187_s2 + $0x200] sm:$0xff]   ;;  %v7427_v63 = vld [vmem:[%s9187_s2 + $0x368] sm:$0xff]  }
 0x12e   :  { %6646 = vmatprep.subr.bf16.mxu0 %v7597_v0 }
 0x12f   :  { %6659 = vmatpush3.bf16.msra.mxu1 %v7353_v7  ;;  %v8147_v7 = vshrl.u32 %v8136_v1, 16 }
 0x130   :  { %6660 = vmatprep.subr.bf16.mxu1 %v7597_v0 }
 0x131   :  { %6647 = vmatpush3.bf16.msra.mxu0 %v7354_v9  ;;  %v7392_v9 = vld [vmem:[%s9187_s2 + $0x258] sm:$0xff]   ;;  %v2736_v57 = vrot.slane %v8147_v7, 4 }
 0x132   :  { %6648 = vmatprep.subr.bf16.mxu0 %v7597_v0 }
 0x133   :  { %6661 = vmatpush3.bf16.msra.mxu1 %v7355_v10  ;;  %v7393_v10 = vld [vmem:[%s9187_s2 + $0x270] sm:$0xff]  }
 0x134   :  { %6662 = vmatprep.subr.bf16.mxu1 %v7597_v0 }
 0x135   :  { %6649 = vmatpush3.bf16.msra.mxu0 %v7356_v12  ;;  %v7394_v12 = vld [vmem:[%s9187_s2 + $0x250] sm:$0xff]  }
 0x136   :  { %6650 = vmatprep.subr.bf16.mxu0 %v7597_v0 }
 0x137   :  { %6663 = vmatpush3.bf16.msra.mxu1 %v7357_v13  ;;  %v7395_v13 = vld [vmem:[%s9187_s2 + $0x268] sm:$0xff]  }
 0x138   :  { %6680 = vmatprep.subr.bf16.mxu1 %v7597_v0 }
 0x139   :  { %6651 = vmatpush3.bf16.msra.mxu0 %v7358_v14  ;;  %v7396_v14 = vld [vmem:[%s9187_s2 + $0x248] sm:$0xff]  }
 0x13a   :  { %6665 = vmatmul.mubr.msk.bf16.vlgmr.msra.gmra.mxu1 %vm914_vm3, %v1534_v18  ;;  %6668 = vmatprep.subr.bf16.mxu0 %v7597_v0  ;;  %v7398_v18 = vld [vmem:[%s9187_s2 + $0x240] sm:$0xff]  }
 0x13b   :  { %6681 = vmatpush3.bf16.msra.mxu1 %v7359_v17  ;;  %6688 = vmatprep.mubr.msk.bf16.mxu1 %vm7598_vm2, %v7597_v0  ;;  %v7397_v17 = vld [vmem:[%s9187_s2 + $0x260] sm:$0xff]  }
 0x13c   :  { %6653 = vmatmul.mubr.msk.bf16.vlgmr.msra.gmra.mxu0 %vm914_vm3, %v1466_v20  ;;  %6682 = vmatprep.subr.bf16.mxu1 %v7597_v0  ;;  %v2274_v20 = vrot.slane %v8147_v7, 1 }
 0x13d   :  { %6669 = vmatpush3.bf16.msra.mxu0 %v7360_v19  ;;  %6676 = vmatprep.mubr.msk.bf16.mxu0 %vm7598_vm2, %v7597_v0  ;;  %v7399_v19 = vld [vmem:[%s9187_s2 + $0x2b8] sm:$0xff]  }
 0x13e   :  { %6670 = vmatprep.subr.bf16.mxu0 %v7597_v0 }
 0x13f   :  { %6683 = vmatpush3.bf16.msra.mxu1 %v7361_v21  ;;  %v7400_v21 = vld [vmem:[%s9187_s2 + $0x298] sm:$0xff]  }
 0x140   :  { %6684 = vmatprep.subr.bf16.mxu1 %v7597_v0 }
 0x141   :  { %6671 = vmatpush3.bf16.msra.mxu0 %v7362_v22  ;;  %v2197_v22 = vrot.slane %v8136_v1, 1 }
 0x142   :  { %6672 = vmatprep.subr.bf16.mxu0 %v7597_v0 }
 0x143   :  { %6685 = vmatpush3.bf16.msra.mxu1 %v7363_v23  ;;  %v7401_v23 = vld [vmem:[%s9187_s2 + $0x2b0] sm:$0xff]  }
 0x144   :  { %6686 = vmatprep.subr.bf16.mxu1 %v7597_v0 }
 0x145   :  { %6673 = vmatpush3.bf16.msra.mxu0 %v7364_v24  ;;  %v7402_v24 = vld [vmem:[%s9187_s2 + $0x290] sm:$0xff]  }
 0x146   :  { %6674 = vmatprep.subr.bf16.mxu0 %v7597_v0 }
 0x147   :  { %6687 = vmatpush3.bf16.msra.mxu1 %v7365_v25  ;;  %v7403_v25 = vld [vmem:[%s9187_s2 + $0x2a8] sm:$0xff]  }
 0x148   :  { %6704 = vmatprep.subr.bf16.mxu1 %v7597_v0 }
 0x149   :  { %6675 = vmatpush3.bf16.msra.mxu0 %v7366_v28  ;;  %v7404_v28 = vld [vmem:[%s9187_s2 + $0x288] sm:$0xff]  }
 0x14a   :  { %6689 = vmatmul.mubr.msk.bf16.vlgmr.msra.gmra.mxu1 %vm914_vm3, %v1678_v30  ;;  %6692 = vmatprep.subr.bf16.mxu0 %v7597_v0  ;;  %v7406_v30 = vld [vmem:[%s9187_s2 + $0x280] sm:$0xff]  }
 0x14b   :  { %6705 = vmatpush3.bf16.msra.mxu1 %v7367_v29  ;;  %6712 = vmatprep.mubr.msk.bf16.mxu1 %vm7598_vm2, %v7597_v0  ;;  %v7405_v29 = vld [vmem:[%s9187_s2 + $0x2a0] sm:$0xff]  }
 0x14c   :  { %6677 = vmatmul.mubr.msk.bf16.vlgmr.msra.gmra.mxu0 %vm914_vm3, %v1610_v33  ;;  %6706 = vmatprep.subr.bf16.mxu1 %v7597_v0  ;;  %v2428_v33 = vrot.slane %v8147_v7, 2 }
 0x14d   :  { %6693 = vmatpush3.bf16.msra.mxu0 %v7368_v31  ;;  %6700 = vmatprep.mubr.msk.bf16.mxu0 %vm7598_vm2, %v7597_v0  ;;  %v7407_v31 = vld [vmem:[%s9187_s2 + $0x2f8] sm:$0xff]  }
 0x14e   :  { %6694 = vmatprep.subr.bf16.mxu0 %v7597_v0 }
 0x14f   :  { %6707 = vmatpush3.bf16.msra.mxu1 %v7369_v38  ;;  %v7408_v38 = vld [vmem:[%s9187_s2 + $0x2d8] sm:$0xff]  }
 0x150   :  { %6708 = vmatprep.subr.bf16.mxu1 %v7597_v0 }
 0x151   :  { %6695 = vmatpush3.bf16.msra.mxu0 %v7370_v39  ;;  %v2351_v39 = vrot.slane %v8136_v1, 2 }
 0x152   :  { %6696 = vmatprep.subr.bf16.mxu0 %v7597_v0 }
 0x153   :  { %6709 = vmatpush3.bf16.msra.mxu1 %v7371_v40  ;;  %v7409_v40 = vld [vmem:[%s9187_s2 + $0x2f0] sm:$0xff]  }
 0x154   :  { %6710 = vmatprep.subr.bf16.mxu1 %v7597_v0 }
 0x155   :  { %6697 = vmatpush3.bf16.msra.mxu0 %v7372_v42  ;;  %v7410_v42 = vld [vmem:[%s9187_s2 + $0x2d0] sm:$0xff]  }
 0x156   :  { %6698 = vmatprep.subr.bf16.mxu0 %v7597_v0 }
 0x157   :  { %6711 = vmatpush3.bf16.msra.mxu1 %v7373_v43  ;;  %v7411_v43 = vld [vmem:[%s9187_s2 + $0x2e8] sm:$0xff]  }
 0x158   :  { %6728 = vmatprep.subr.bf16.mxu1 %v7597_v0 }
 0x159   :  { %6699 = vmatpush3.bf16.msra.mxu0 %v7374_v44  ;;  %v7412_v44 = vld [vmem:[%s9187_s2 + $0x2c8] sm:$0xff]  }
 0x15a   :  { %6713 = vmatmul.mubr.msk.bf16.vlgmr.msra.gmra.mxu1 %vm914_vm3, %v1822_v46  ;;  %6716 = vmatprep.subr.bf16.mxu0 %v7597_v0  ;;  %v7414_v46 = vld [vmem:[%s9187_s2 + $0x2c0] sm:$0xff]  }
 0x15b   :  { %6729 = vmatpush3.bf16.msra.mxu1 %v7375_v45  ;;  %6736 = vmatprep.mubr.msk.bf16.mxu1 %vm7598_vm2, %v7597_v0  ;;  %v7413_v45 = vld [vmem:[%s9187_s2 + $0x2e0] sm:$0xff]  }
 0x15c   :  { %6701 = vmatmul.mubr.msk.bf16.vlgmr.msra.gmra.mxu0 %vm914_vm3, %v1754_v48  ;;  %6730 = vmatprep.subr.bf16.mxu1 %v7597_v0  ;;  %v2582_v48 = vrot.slane %v8147_v7, 3 }
 0x15d   :  { %6717 = vmatpush3.bf16.msra.mxu0 %v7376_v47  ;;  %6724 = vmatprep.mubr.msk.bf16.mxu0 %vm7598_vm2, %v7597_v0  ;;  %v7415_v47 = vld [vmem:[%s9187_s2 + $0x338] sm:$0xff]  }
 0x15e   :  { %6718 = vmatprep.subr.bf16.mxu0 %v7597_v0 }
 0x15f   :  { %6731 = vmatpush3.bf16.msra.mxu1 %v7377_v49  ;;  %v7416_v49 = vld [vmem:[%s9187_s2 + $0x318] sm:$0xff]  }
 0x160   :  { %6732 = vmatprep.subr.bf16.mxu1 %v7597_v0 }
 0x161   :  { %6719 = vmatpush3.bf16.msra.mxu0 %v7378_v50  ;;  %v2505_v50 = vrot.slane %v8136_v1, 3 }
 0x162   :  { %6720 = vmatprep.subr.bf16.mxu0 %v7597_v0 }
 0x163   :  { %6733 = vmatpush3.bf16.msra.mxu1 %v7379_v11  ;;  %v7417_v11 = vld [vmem:[%s9187_s2 + $0x330] sm:$0xff]  }
 0x164   :  { %6734 = vmatprep.subr.bf16.mxu1 %v7597_v0 }
 0x165   :  { %6721 = vmatpush3.bf16.msra.mxu0 %v7380_v52  ;;  %v7419_v52 = vld [vmem:[%s9187_s2 + $0x328] sm:$0xff]  }
 0x166   :  { %6722 = vmatprep.subr.bf16.mxu0 %v7597_v0 }
 0x167   :  { %6735 = vmatpush3.bf16.msra.mxu1 %v7381_v55  ;;  %v7421_v55 = vld [vmem:[%s9187_s2 + $0x320] sm:$0xff]  }
 0x168   :  { %6752 = vmatprep.subr.bf16.mxu1 %v7597_v0 }
 0x169   :  { %6723 = vmatpush3.bf16.msra.mxu0 %v7382_v15  ;;  %v7422_v15 = vld [vmem:[%s9187_s2 + $0x300] sm:$0xff]  }
 0x16a   :  { %6737 = vmatmul.mubr.msk.bf16.vlgmr.msra.gmra.mxu1 %vm914_vm3, %v1966_v58  ;;  %6740 = vmatprep.subr.bf16.mxu0 %v7597_v0  ;;  %v7424_v58 = vld [vmem:[%s9187_s2 + $0x358] sm:$0xff]  }
 0x16b   :  { %6753 = vmatpush3.bf16.msra.mxu1 %v7383_v35  ;;  %6760 = vmatprep.mubr.msk.bf16.mxu1 %vm7598_vm2, %v7597_v0  ;;  %v8309_v35 = vpop.f32.mrf.mxu1 }
 0x16c   :  { %6725 = vmatmul.mubr.msk.bf16.vlgmr.msra.gmra.mxu0 %vm914_vm3, %v1898_v60  ;;  %6754 = vmatprep.subr.bf16.mxu1 %v7597_v0  ;;  %v2659_v60 = vrot.slane %v8136_v1, 4 }
 0x16d   :  { %6741 = vmatpush3.bf16.msra.mxu0 %v7384_v59  ;;  %6748 = vmatprep.mubr.msk.bf16.mxu0 %vm7598_vm2, %v7597_v0  ;;  %v8316_v59 = vpop.f32.mrf.mxu0 }
 0x16e   :  { %6742 = vmatprep.subr.bf16.mxu0 %v7597_v0 }
 0x16f   :  { %6755 = vmatpush3.bf16.msra.mxu1 %v7385_v5  ;;  %v7425_v5 = vld [vmem:[%s9187_s2 + $0x370] sm:$0xff]  }
 0x170   :  { %6756 = vmatprep.subr.bf16.mxu1 %v7597_v0 }
 0x171   :  { %6743 = vmatpush3.bf16.msra.mxu0 %v7386_v36 }
 0x172   :  { %6744 = vmatprep.subr.bf16.mxu0 %v7597_v0 }
 0x173   :  { %6757 = vmatpush3.bf16.msra.mxu1 %v7387_v8  ;;  %v7426_v8 = vld [vmem:[%s9187_s2 + $0x350] sm:$0xff]  }
 0x174   :  { %6758 = vmatprep.subr.bf16.mxu1 %v7597_v0 }
 0x175   :  { %6745 = vmatpush3.bf16.msra.mxu0 %v7388_v62 }
 0x176   :  { %6746 = vmatprep.subr.bf16.mxu0 %v7597_v0 }
 0x177   :  { %6759 = vmatpush3.bf16.msra.mxu1 %v7389_v4 }
 0x178   :  { %6776 = vmatprep.subr.bf16.mxu1 %v7597_v0 }
 0x179   :  { %6747 = vmatpush3.bf16.msra.mxu0 %v7390_v3 }
 0x17a   :  { %6761 = vmatmul.mubr.msk.bf16.vlgmr.msra.gmra.mxu1 %vm914_vm3, %v8147_v7  ;;  %6764 = vmatprep.subr.bf16.mxu0 %v7597_v0 }
 0x17b   :  { %6777 = vmatpush3.bf16.msra.mxu1 %v7391_v6  ;;  %6784 = vmatprep.mubr.msk.bf16.mxu1 %vm7598_vm2, %v7597_v0  ;;  %v7428_v6 = vld [vmem:[%s9187_s2 + $0x348] sm:$0xff]  }
 0x17c   :  { %6749 = vmatmul.mubr.msk.bf16.vlgmr.msra.gmra.mxu0 %vm914_vm3, %v8136_v1  ;;  %6778 = vmatprep.subr.bf16.mxu1 %v7597_v0 }
 0x17d   :  { %6765 = vmatpush3.bf16.msra.mxu0 %v7392_v9  ;;  %6772 = vmatprep.mubr.msk.bf16.mxu0 %vm7598_vm2, %v7597_v0 }
 0x17e   :  { %6766 = vmatprep.subr.bf16.mxu0 %v7597_v0 }
 0x17f   :  { %6779 = vmatpush3.bf16.msra.mxu1 %v7393_v10  ;;  %v7429_v10 = vld [vmem:[%s9187_s2 + $0x360] sm:$0xff]  }
 0x180   :  { %6780 = vmatprep.subr.bf16.mxu1 %v7597_v0 }
 0x181   :  { %6767 = vmatpush3.bf16.msra.mxu0 %v7394_v12  ;;  %v7430_v12 = vld [vmem:[%s9187_s2 + $0x340] sm:$0xff]  }
 0x182   :  { %6768 = vmatprep.subr.bf16.mxu0 %v7597_v0 }
 0x183   :  { %6781 = vmatpush3.bf16.msra.mxu1 %v7395_v13  ;;  %v7431_v13 = vld [vmem:[%s9187_s2 + $0x3b8] sm:$0xff]  }
 0x184   :  { %6782 = vmatprep.subr.bf16.mxu1 %v7597_v0 }
 0x185   :  { %6769 = vmatpush3.bf16.msra.mxu0 %v7396_v14  ;;  %v2890_v14 = vrot.slane %v8147_v7, 5 }
 0x186   :  { %6770 = vmatprep.subr.bf16.mxu0 %v7597_v0 }
 0x187   :  { %6783 = vmatpush3.bf16.msra.mxu1 %v7397_v17  ;;  %v7432_v17 = vld [vmem:[%s9187_s2 + $0x398] sm:$0xff]  }
 0x188   :  { %6800 = vmatprep.subr.bf16.mxu1 %v7597_v0 }
 0x189   :  { %6771 = vmatpush3.bf16.msra.mxu0 %v7398_v18 }
 0x18a   :  { %6785 = vmatmul.mubr.msk.bf16.vlgmr.msra.gmra.mxu1 %vm914_vm3, %v2274_v20  ;;  %6788 = vmatprep.subr.bf16.mxu0 %v7597_v0  ;;  %v7433_v20 = vld [vmem:[%s9187_s2 + $0x3b0] sm:$0xff]  }
 0x18b   :  { %6801 = vmatpush3.bf16.msra.mxu1 %v7399_v19  ;;  %6808 = vmatprep.mubr.msk.bf16.mxu1 %vm7598_vm2, %v7597_v0  ;;  %v2813_v19 = vrot.slane %v8136_v1, 5 }
 0x18c   :  { %6773 = vmatmul.mubr.msk.bf16.vlgmr.msra.gmra.mxu0 %vm914_vm3, %v2197_v22  ;;  %6802 = vmatprep.subr.bf16.mxu1 %v7597_v0 }
 0x18d   :  { %6789 = vmatpush3.bf16.msra.mxu0 %v7400_v21  ;;  %6796 = vmatprep.mubr.msk.bf16.mxu0 %vm7598_vm2, %v7597_v0 }
 0x18e   :  { %6790 = vmatprep.subr.bf16.mxu0 %v7597_v0 }
 0x18f   :  { %6803 = vmatpush3.bf16.msra.mxu1 %v7401_v23 }
 0x190   :  { %6804 = vmatprep.subr.bf16.mxu1 %v7597_v0 }
 0x191   :  { %6791 = vmatpush3.bf16.msra.mxu0 %v7402_v24  ;;  %v7434_v24 = vld [vmem:[%s9187_s2 + $0x390] sm:$0xff]  }
 0x192   :  { %6792 = vmatprep.subr.bf16.mxu0 %v7597_v0 }
 0x193   :  { %6805 = vmatpush3.bf16.msra.mxu1 %v7403_v25 }
 0x194   :  { %6806 = vmatprep.subr.bf16.mxu1 %v7597_v0 }
 0x195   :  { %6793 = vmatpush3.bf16.msra.mxu0 %v7404_v28 }
 0x196   :  { %6794 = vmatprep.subr.bf16.mxu0 %v7597_v0 }
 0x197   :  { %6807 = vmatpush3.bf16.msra.mxu1 %v7405_v29  ;;  %v7435_v29 = vld [vmem:[%s9187_s2 + $0x3a8] sm:$0xff]  }
 0x198   :  { %6824 = vmatprep.subr.bf16.mxu1 %v7597_v0 }
 0x199   :  { %6795 = vmatpush3.bf16.msra.mxu0 %v7406_v30 }
 0x19a   :  { %6809 = vmatmul.mubr.msk.bf16.vlgmr.msra.gmra.mxu1 %vm914_vm3, %v2428_v33  ;;  %6812 = vmatprep.subr.bf16.mxu0 %v7597_v0  ;;  %v7436_v33 = vld [vmem:[%s9187_s2 + $0x388] sm:$0xff]  }
 0x19b   :  { %6825 = vmatpush3.bf16.msra.mxu1 %v7407_v31  ;;  %6832 = vmatprep.mubr.msk.bf16.mxu1 %vm7598_vm2, %v7597_v0 }
 0x19c   :  { %6797 = vmatmul.mubr.msk.bf16.vlgmr.msra.gmra.mxu0 %vm914_vm3, %v2351_v39  ;;  %6826 = vmatprep.subr.bf16.mxu1 %v7597_v0  ;;  %v7437_v39 = vld [vmem:[%s9187_s2 + $0x3a0] sm:$0xff]  }
 0x19d   :  { %6813 = vmatpush3.bf16.msra.mxu0 %v7408_v38  ;;  %6820 = vmatprep.mubr.msk.bf16.mxu0 %vm7598_vm2, %v7597_v0 }
 0x19e   :  { %6814 = vmatprep.subr.bf16.mxu0 %v7597_v0 }
 0x19f   :  { %6827 = vmatpush3.bf16.msra.mxu1 %v7409_v40  ;;  %v7438_v40 = vld [vmem:[%s9187_s2 + $0x380] sm:$0xff]  }
 0x1a0   :  { %6828 = vmatprep.subr.bf16.mxu1 %v7597_v0 }
 0x1a1   :  { %6815 = vmatpush3.bf16.msra.mxu0 %v7410_v42  ;;  %v7439_v42 = vld [vmem:[%s9187_s2 + $0x3f8] sm:$0xff]  }
 0x1a2   :  { %6816 = vmatprep.subr.bf16.mxu0 %v7597_v0 }
 0x1a3   :  { %6829 = vmatpush3.bf16.msra.mxu1 %v7411_v43  ;;  %v3044_v43 = vrot.slane %v8147_v7, 6 }
 0x1a4   :  { %6830 = vmatprep.subr.bf16.mxu1 %v7597_v0 }
 0x1a5   :  { %6817 = vmatpush3.bf16.msra.mxu0 %v7412_v44  ;;  %v7440_v44 = vld [vmem:[%s9187_s2 + $0x3d8] sm:$0xff]  }
 0x1a6   :  { %6818 = vmatprep.subr.bf16.mxu0 %v7597_v0 }
 0x1a7   :  { %6831 = vmatpush3.bf16.msra.mxu1 %v7413_v45 }
 0x1a8   :  { %6848 = vmatprep.subr.bf16.mxu1 %v7597_v0 }
 0x1a9   :  { %6819 = vmatpush3.bf16.msra.mxu0 %v7414_v46  ;;  %v2967_v46 = vrot.slane %v8136_v1, 6 }
 0x1aa   :  { %6833 = vmatmul.mubr.msk.bf16.vlgmr.msra.gmra.mxu1 %vm914_vm3, %v2582_v48  ;;  %6836 = vmatprep.subr.bf16.mxu0 %v7597_v0 }
 0x1ab   :  { %6849 = vmatpush3.bf16.msra.mxu1 %v7415_v47  ;;  %6856 = vmatprep.mubr.msk.bf16.mxu1 %vm7598_vm2, %v7597_v0  ;;  %v7441_v47 = vld [vmem:[%s9187_s2 + $0x3f0] sm:$0xff]  }
 0x1ac   :  { %6821 = vmatmul.mubr.msk.bf16.vlgmr.msra.gmra.mxu0 %vm914_vm3, %v2505_v50  ;;  %6850 = vmatprep.subr.bf16.mxu1 %v7597_v0 }
 0x1ad   :  { %6837 = vmatpush3.bf16.msra.mxu0 %v7416_v49  ;;  %6844 = vmatprep.mubr.msk.bf16.mxu0 %vm7598_vm2, %v7597_v0 }
 0x1ae   :  { %6838 = vmatprep.subr.bf16.mxu0 %v7597_v0 }
 0x1af   :  { %6851 = vmatpush3.bf16.msra.mxu1 %v7417_v11  ;;  %v7442_v11 = vld [vmem:[%s9187_s2 + $0x3d0] sm:$0xff]  }
 0x1b0   :  { %6852 = vmatprep.subr.bf16.mxu1 %v7597_v0 }
 0x1b1   :  { %6839 = vmatpush3.bf16.msra.mxu0 %v7418_v51 }
 0x1b2   :  { %6840 = vmatprep.subr.bf16.mxu0 %v7597_v0 }
 0x1b3   :  { %6853 = vmatpush3.bf16.msra.mxu1 %v7419_v52 }
 0x1b4   :  { %6854 = vmatprep.subr.bf16.mxu1 %v7597_v0 }
 0x1b5   :  { %6841 = vmatpush3.bf16.msra.mxu0 %v7420_v54  ;;  %v7443_v54 = vld [vmem:[%s9187_s2 + $0x3e8] sm:$0xff]  }
 0x1b6   :  { %6842 = vmatprep.subr.bf16.mxu0 %v7597_v0 }
 0x1b7   :  { %6855 = vmatpush3.bf16.msra.mxu1 %v7421_v55 }
 0x1b8   :  { %6872 = vmatprep.subr.bf16.mxu1 %v7597_v0 }
 0x1b9   :  { %6843 = vmatpush3.bf16.msra.mxu0 %v7422_v15 }
 0x1ba   :  { %6857 = vmatmul.mubr.msk.bf16.vlgmr.msra.gmra.mxu1 %vm914_vm3, %v2736_v57  ;;  %v1019_v37 = vpop.f32.mrf.mxu1  ;;  %6860 = vmatprep.subr.bf16.mxu0 %v7597_v0 }
 0x1bb   :  { %6873 = vmatpush3.bf16.msra.mxu1 %v7423_v16  ;;  %6880 = vmatprep.mubr.msk.bf16.mxu1 %vm7598_vm2, %v7597_v0  ;;  %v7444_v16 = vld [vmem:[%s9187_s2 + $0x3c8] sm:$0xff]  }
 0x1bc   :  { %6845 = vmatmul.mubr.msk.bf16.vlgmr.msra.gmra.mxu0 %vm914_vm3, %v2659_v60  ;;  %v952_v61 = vpop.f32.mrf.mxu0  ;;  %v6570_v36 = vpop.f32.mrf.mxu1  ;;  %6874 = vmatprep.subr.bf16.mxu1 %v7597_v0  ;;  %v7447_v60 = vld [vmem:[%s9187_s2 + $0x438] sm:$0xff]  }
 0x1bd   :  { %v8328_v2 = vadd.f32 %v1019_v37, %v952_v61  ;;  %6861 = vmatpush3.bf16.msra.mxu0 %v7424_v58  ;;  %6868 = vmatprep.mubr.msk.bf16.mxu0 %vm7598_vm2, %v7597_v0  ;;  %v7445_v58 = vld [vmem:[%s9187_s2 + $0x3e0] sm:$0xff]   ;;  %v7448_v61 = vld [vmem:[%s9187_s2 + $0x418] sm:$0xff]  }
 0x1be   :  { %v6558_v41 = vpop.f32.mrf.mxu0  ;;  %v1022_v62 = vpop.f32.mrf.mxu1  ;;  %6862 = vmatprep.subr.bf16.mxu0 %v7597_v0  ;;  %v7446_v37 = vld [vmem:[%s9187_s2 + $0x3c0] sm:$0xff]  }
 0x1bf   :  { %6875 = vmatpush3.bf16.msra.mxu1 %v7425_v5  ;;  %v3198_v5 = vrot.slane %v8147_v7, 7  ;;  %v7449_v41 = vld [vmem:[%s9187_s2 + $0x430] sm:$0xff]  }
 0x1c0   :  { %v955_v4 = vpop.f32.mrf.mxu0  ;;  %v6571_v3 = vpop.f32.mrf.mxu1  ;;  %6876 = vmatprep.subr.bf16.mxu1 %v7597_v0 }
 0x1c1   :  { %6863 = vmatpush3.bf16.msra.mxu0 %v7426_v8  ;;  %v3121_v8 = vrot.slane %v8136_v1, 7  ;;  %v7450_v1 = vld [vmem:[%s9187_s2 + $0x410] sm:$0xff]  }
 0x1c2   :  { %v6559_v9 = vpop.f32.mrf.mxu0  ;;  %6864 = vmatprep.subr.bf16.mxu0 %v7597_v0 }
 0x1c3   :  { %6877 = vmatpush3.bf16.msra.mxu1 %v7427_v63 }
 0x1c4   :  { %6878 = vmatprep.subr.bf16.mxu1 %v7597_v0 }
 0x1c5   :  { %6865 = vmatpush3.bf16.msra.mxu0 %v7428_v6  ;;  %v7451_v6 = vld [vmem:[%s9187_s2 + $0x428] sm:$0xff]  }
 0x1c6   :  { %6866 = vmatprep.subr.bf16.mxu0 %v7597_v0 }
 0x1c7   :  { %6879 = vmatpush3.bf16.msra.mxu1 %v7429_v10 }
 0x1c8   :  { %6896 = vmatprep.subr.bf16.mxu1 %v7597_v0 }
 0x1c9   :  { %6867 = vmatpush3.bf16.msra.mxu0 %v7430_v12  ;;  %v7452_v12 = vld [vmem:[%s9187_s2 + $0x408] sm:$0xff]  }
 0x1ca   :  { %v1164_v18 = vpop.f32.mrf.mxu1  ;;  %6881 = vmatmul.mubr.msk.bf16.vlgmr.msra.gmra.mxu1 %vm914_vm3, %v2890_v14  ;;  %6884 = vmatprep.subr.bf16.mxu0 %v7597_v0  ;;  %v7453_v14 = vld [vmem:[%s9187_s2 + $0x420] sm:$0xff]  }
 0x1cb   :  { %6897 = vmatpush3.bf16.msra.mxu1 %v7431_v13  ;;  %6904 = vmatprep.mubr.msk.bf16.mxu1 %vm7598_vm2, %v7597_v0 }
 0x1cc   :  { %v1097_v21 = vpop.f32.mrf.mxu0  ;;  %v6594_v22 = vpop.f32.mrf.mxu1  ;;  %6869 = vmatmul.mubr.msk.bf16.vlgmr.msra.gmra.mxu0 %vm914_vm3, %v2813_v19  ;;  %6898 = vmatprep.subr.bf16.mxu1 %v7597_v0  ;;  %v8482_v19 = vshrl.u32 %v7834_v34, 16 }
 0x1cd   :  { %v8370_v23 = vadd.f32 %v1164_v18, %v1097_v21  ;;  %6885 = vmatpush3.bf16.msra.mxu0 %v7432_v17  ;;  %6892 = vmatprep.mubr.msk.bf16.mxu0 %vm7598_vm2, %v7597_v0  ;;  %v7454_v17 = vld [vmem:[%s9187_s2 + $0x400] sm:$0xff]   ;;  %v7455_v18 = vld [vmem:[%s9187_s2 + $0x478] sm:$0xff]   ;;  %v7457_v22 = vld [vmem:[%s9187_s2 + $0x470] sm:$0xff]  }
 0x1ce   :  { %v6582_v25 = vpop.f32.mrf.mxu0  ;;  %v1167_v28 = vpop.f32.mrf.mxu1  ;;  %6886 = vmatprep.subr.bf16.mxu0 %v7597_v0 }
 0x1cf   :  { %6899 = vmatpush3.bf16.msra.mxu1 %v7433_v20  ;;  %v7456_v20 = vld [vmem:[%s9187_s2 + $0x458] sm:$0xff]  }
 0x1d0   :  { %v1100_v30 = vpop.f32.mrf.mxu0  ;;  %v6595_v31 = vpop.f32.mrf.mxu1  ;;  %6900 = vmatprep.subr.bf16.mxu1 %v7597_v0 }
 0x1d1   :  { %6887 = vmatpush3.bf16.msra.mxu0 %v7434_v24 }
 0x1d2   :  { %v6583_v38 = vpop.f32.mrf.mxu0  ;;  %6888 = vmatprep.subr.bf16.mxu0 %v7597_v0 }
 0x1d3   :  { %6901 = vmatpush3.bf16.msra.mxu1 %v7435_v29  ;;  %v7458_v29 = vld [vmem:[%s9187_s2 + $0x450] sm:$0xff]  }
 0x1d4   :  { %6902 = vmatprep.subr.bf16.mxu1 %v7597_v0 }
 0x1d5   :  { %6889 = vmatpush3.bf16.msra.mxu0 %v7436_v33  ;;  %v7459_v33 = vld [vmem:[%s9187_s2 + $0x468] sm:$0xff]  }
 0x1d6   :  { %6890 = vmatprep.subr.bf16.mxu0 %v7597_v0 }
 0x1d7   :  { %6903 = vmatpush3.bf16.msra.mxu1 %v7437_v39 }
 0x1d8   :  { %6920 = vmatprep.subr.bf16.mxu1 %v7597_v0 }
 0x1d9   :  { %6891 = vmatpush3.bf16.msra.mxu0 %v7438_v40  ;;  %v7460_v40 = vld [vmem:[%s9187_s2 + $0x448] sm:$0xff]  }
 0x1da   :  { %v1308_v45 = vpop.f32.mrf.mxu1  ;;  %6905 = vmatmul.mubr.msk.bf16.vlgmr.msra.gmra.mxu1 %vm914_vm3, %v3044_v43  ;;  %6908 = vmatprep.subr.bf16.mxu0 %v7597_v0  ;;  %v7461_v43 = vld [vmem:[%s9187_s2 + $0x460] sm:$0xff]  }
 0x1db   :  { %6921 = vmatpush3.bf16.msra.mxu1 %v7439_v42  ;;  %6928 = vmatprep.mubr.msk.bf16.mxu1 %vm7598_vm2, %v7597_v0 }
 0x1dc   :  { %v1240_v48 = vpop.f32.mrf.mxu0  ;;  %v6618_v49 = vpop.f32.mrf.mxu1  ;;  %6893 = vmatmul.mubr.msk.bf16.vlgmr.msra.gmra.mxu0 %vm914_vm3, %v2967_v46  ;;  %6922 = vmatprep.subr.bf16.mxu1 %v7597_v0  ;;  %v3507_v46 = vrot.slane %v8482_v19, 1 }
 0x1dd   :  { %v8412_v50 = vadd.f32 %v1308_v45, %v1240_v48  ;;  %6909 = vmatpush3.bf16.msra.mxu0 %v7440_v44  ;;  %6916 = vmatprep.mubr.msk.bf16.mxu0 %vm7598_vm2, %v7597_v0  ;;  %v7462_v44 = vld [vmem:[%s9187_s2 + $0x440] sm:$0xff]   ;;  %v7463_v45 = vld [vmem:[%s9187_s2 + $0x4b8] sm:$0xff]   ;;  %v3430_v49 = vrot.slane %v7834_v34, 1 }
 0x1de   :  { %v6606_v51 = vpop.f32.mrf.mxu0  ;;  %v1311_v52 = vpop.f32.mrf.mxu1  ;;  %6910 = vmatprep.subr.bf16.mxu0 %v7597_v0 }
 0x1df   :  { %6923 = vmatpush3.bf16.msra.mxu1 %v7441_v47  ;;  %v7464_v47 = vld [vmem:[%s9187_s2 + $0x498] sm:$0xff]  }
 0x1e0   :  { %v1243_v55 = vpop.f32.mrf.mxu0  ;;  %v6619_v15 = vpop.f32.mrf.mxu1  ;;  %6924 = vmatprep.subr.bf16.mxu1 %v7597_v0 }
 0x1e1   :  { %6911 = vmatpush3.bf16.msra.mxu0 %v7442_v11  ;;  %v7465_v11 = vld [vmem:[%s9187_s2 + $0x4b0] sm:$0xff]  }
 0x1e2   :  { %v6607_v57 = vpop.f32.mrf.mxu0  ;;  %6912 = vmatprep.subr.bf16.mxu0 %v7597_v0  ;;  %v7466_v55 = vld [vmem:[%s9187_s2 + $0x490] sm:$0xff]  }
 0x1e3   :  { %6925 = vmatpush3.bf16.msra.mxu1 %v7443_v54  ;;  %v7467_v57 = vld [vmem:[%s9187_s2 + $0x4a8] sm:$0xff]  }
 0x1e4   :  { %6926 = vmatprep.subr.bf16.mxu1 %v7597_v0 }
 0x1e5   :  { %6913 = vmatpush3.bf16.msra.mxu0 %v7444_v16 }
 0x1e6   :  { %6914 = vmatprep.subr.bf16.mxu0 %v7597_v0 }
 0x1e7   :  { %6927 = vmatpush3.bf16.msra.mxu1 %v7445_v58 }
 0x1e8   :  { %6944 = vmatprep.subr.bf16.mxu1 %v7597_v0 }
 0x1e9   :  { %6915 = vmatpush3.bf16.msra.mxu0 %v7446_v37 }
 0x1ea   :  { %v1452_v36 = vpop.f32.mrf.mxu1  ;;  %6929 = vmatmul.mubr.msk.bf16.vlgmr.msra.gmra.mxu1 %vm914_vm3, %v3198_v5  ;;  %6932 = vmatprep.subr.bf16.mxu0 %v7597_v0 }
 0x1eb   :  { %6945 = vmatpush3.bf16.msra.mxu1 %v7447_v60  ;;  %6952 = vmatprep.mubr.msk.bf16.mxu1 %vm7598_vm2, %v7597_v0  ;;  %v7468_v60 = vld [vmem:[%s9187_s2 + $0x488] sm:$0xff]  }
 0x1ec   :  { %v1384_v7 = vpop.f32.mrf.mxu0  ;;  %v6642_v62 = vpop.f32.mrf.mxu1  ;;  %6917 = vmatmul.mubr.msk.bf16.vlgmr.msra.gmra.mxu0 %vm914_vm3, %v3121_v8  ;;  %6946 = vmatprep.subr.bf16.mxu1 %v7597_v0  ;;  %v7471_v8 = vld [vmem:[%s9187_s2 + $0x4f8] sm:$0xff]  }
 0x1ed   :  { %v8454_v63 = vadd.f32 %v1452_v36, %v1384_v7  ;;  %6933 = vmatpush3.bf16.msra.mxu0 %v7448_v61  ;;  %6940 = vmatprep.mubr.msk.bf16.mxu0 %vm7598_vm2, %v7597_v0  ;;  %v7469_v61 = vld [vmem:[%s9187_s2 + $0x4a0] sm:$0xff]   ;;  %v7472_v7 = vld [vmem:[%s9187_s2 + $0x4d8] sm:$0xff]  }
 0x1ee   :  { %v6630_v4 = vpop.f32.mrf.mxu0  ;;  %v1455_v3 = vpop.f32.mrf.mxu1  ;;  %6934 = vmatprep.subr.bf16.mxu0 %v7597_v0  ;;  %v7470_v36 = vld [vmem:[%s9187_s2 + $0x480] sm:$0xff]  }
 0x1ef   :  { %6947 = vmatpush3.bf16.msra.mxu1 %v7449_v41  ;;  %v3661_v41 = vrot.slane %v8482_v19, 2  ;;  %v7473_v4 = vld [vmem:[%s9187_s2 + $0x4f0] sm:$0xff]  }
 0x1f0   :  { %v1387_v9 = vpop.f32.mrf.mxu0  ;;  %v6643_v10 = vpop.f32.mrf.mxu1  ;;  %6948 = vmatprep.subr.bf16.mxu1 %v7597_v0 }
 0x1f1   :  { %6935 = vmatpush3.bf16.msra.mxu0 %v7450_v1  ;;  %v3584_v1 = vrot.slane %v7834_v34, 2  ;;  %v7474_v10 = vld [vmem:[%s9187_s2 + $0x4d0] sm:$0xff]  }
 0x1f2   :  { %v6631_v13 = vpop.f32.mrf.mxu0  ;;  %6936 = vmatprep.subr.bf16.mxu0 %v7597_v0 }
 0x1f3   :  { %6949 = vmatpush3.bf16.msra.mxu1 %v7451_v6 }
 0x1f4   :  { %6950 = vmatprep.subr.bf16.mxu1 %v7597_v0 }
 0x1f5   :  { %6937 = vmatpush3.bf16.msra.mxu0 %v7452_v12 }
 0x1f6   :  { %6938 = vmatprep.subr.bf16.mxu0 %v7597_v0 }
 0x1f7   :  { %6951 = vmatpush3.bf16.msra.mxu1 %v7453_v14  ;;  %v7475_v14 = vld [vmem:[%s9187_s2 + $0x4e8] sm:$0xff]  }
 0x1f8   :  { %6968 = vmatprep.subr.bf16.mxu1 %v7597_v0 }
 0x1f9   :  { %6939 = vmatpush3.bf16.msra.mxu0 %v7454_v17 }
 0x1fa   :  { %v1596_v21 = vpop.f32.mrf.mxu1  ;;  %6953 = vmatmul.mubr.msk.bf16.vlgmr.msra.gmra.mxu1 %vm914_vm3, %v8482_v19  ;;  %6956 = vmatprep.subr.bf16.mxu0 %v7597_v0 }
 0x1fb   :  { %6969 = vmatpush3.bf16.msra.mxu1 %v7455_v18  ;;  %6976 = vmatprep.mubr.msk.bf16.mxu1 %vm7598_vm2, %v7597_v0 }
 0x1fc   :  { %v1528_v24 = vpop.f32.mrf.mxu0  ;;  %v6666_v25 = vpop.f32.mrf.mxu1  ;;  %6941 = vmatmul.mubr.msk.bf16.vlgmr.msra.gmra.mxu0 %vm914_vm3, %v7834_v34  ;;  %6970 = vmatprep.subr.bf16.mxu1 %v7597_v0 }
 0x1fd   :  { %v8499_v28 = vadd.f32 %v1596_v21, %v1528_v24  ;;  %6957 = vmatpush3.bf16.msra.mxu0 %v7456_v20  ;;  %6964 = vmatprep.mubr.msk.bf16.mxu0 %vm7598_vm2, %v7597_v0  ;;  %v7476_v20 = vld [vmem:[%s9187_s2 + $0x4c8] sm:$0xff]   ;;  %v7478_v24 = vld [vmem:[%s9187_s2 + $0x4c0] sm:$0xff]   ;;  %v7479_v25 = vld [vmem:[%s9187_s2 + $0x538] sm:$0xff]  }
 0x1fe   :  { %v6654_v30 = vpop.f32.mrf.mxu0  ;;  %v1599_v31 = vpop.f32.mrf.mxu1  ;;  %6958 = vmatprep.subr.bf16.mxu0 %v7597_v0 }
 0x1ff   :  { %6971 = vmatpush3.bf16.msra.mxu1 %v7457_v22  ;;  %v7477_v22 = vld [vmem:[%s9187_s2 + $0x4e0] sm:$0xff]   ;;  %v7480_v30 = vld [vmem:[%s9187_s2 + $0x518] sm:$0xff]  }
 0x200   :  { %v1531_v38 = vpop.f32.mrf.mxu0  ;;  %v6667_v39 = vpop.f32.mrf.mxu1  ;;  %6972 = vmatprep.subr.bf16.mxu1 %v7597_v0 }
 0x201   :  { %6959 = vmatpush3.bf16.msra.mxu0 %v7458_v29  ;;  %v3815_v29 = vrot.slane %v8482_v19, 3  ;;  %v7481_v38 = vld [vmem:[%s9187_s2 + $0x530] sm:$0xff]  }
 0x202   :  { %v6655_v42 = vpop.f32.mrf.mxu0  ;;  %6960 = vmatprep.subr.bf16.mxu0 %v7597_v0 }
 0x203   :  { %6973 = vmatpush3.bf16.msra.mxu1 %v7459_v33  ;;  %v3738_v33 = vrot.slane %v7834_v34, 3 }
 0x204   :  { %6974 = vmatprep.subr.bf16.mxu1 %v7597_v0 }
 0x205   :  { %6961 = vmatpush3.bf16.msra.mxu0 %v7460_v40 }
 0x206   :  { %6962 = vmatprep.subr.bf16.mxu0 %v7597_v0 }
 0x207   :  { %6975 = vmatpush3.bf16.msra.mxu1 %v7461_v43  ;;  %v7482_v43 = vld [vmem:[%s9187_s2 + $0x510] sm:$0xff]  }
 0x208   :  { %6992 = vmatprep.subr.bf16.mxu1 %v7597_v0 }
 0x209   :  { %6963 = vmatpush3.bf16.msra.mxu0 %v7462_v44 }
 0x20a   :  { %v1740_v48 = vpop.f32.mrf.mxu1  ;;  %6977 = vmatmul.mubr.msk.bf16.vlgmr.msra.gmra.mxu1 %vm914_vm3, %v3507_v46  ;;  %6980 = vmatprep.subr.bf16.mxu0 %v7597_v0  ;;  %v7483_v46 = vld [vmem:[%s9187_s2 + $0x528] sm:$0xff]  }
 0x20b   :  { %6993 = vmatpush3.bf16.msra.mxu1 %v7463_v45  ;;  %7000 = vmatprep.mubr.msk.bf16.mxu1 %vm7598_vm2, %v7597_v0 }
 0x20c   :  { %v1672_v51 = vpop.f32.mrf.mxu0  ;;  %v6690_v52 = vpop.f32.mrf.mxu1  ;;  %6965 = vmatmul.mubr.msk.bf16.vlgmr.msra.gmra.mxu0 %vm914_vm3, %v3430_v49  ;;  %6994 = vmatprep.subr.bf16.mxu1 %v7597_v0  ;;  %v7484_v49 = vld [vmem:[%s9187_s2 + $0x508] sm:$0xff]  }
 0x20d   :  { %v8541_v54 = vadd.f32 %v1740_v48, %v1672_v51  ;;  %6981 = vmatpush3.bf16.msra.mxu0 %v7464_v47  ;;  %6988 = vmatprep.mubr.msk.bf16.mxu0 %vm7598_vm2, %v7597_v0  ;;  %v7485_v51 = vld [vmem:[%s9187_s2 + $0x520] sm:$0xff]  }
 0x20e   :  { %v6678_v15 = vpop.f32.mrf.mxu0  ;;  %v1743_v16 = vpop.f32.mrf.mxu1  ;;  %6982 = vmatprep.subr.bf16.mxu0 %v7597_v0  ;;  %v7486_v52 = vld [vmem:[%s9187_s2 + $0x500] sm:$0xff]  }
 0x20f   :  { %6995 = vmatpush3.bf16.msra.mxu1 %v7465_v11  ;;  %v3969_v15 = vrot.slane %v8482_v19, 4  ;;  %v7488_v16 = vld [vmem:[%s9187_s2 + $0x558] sm:$0xff]  }
 0x210   :  { %v1675_v58 = vpop.f32.mrf.mxu0  ;;  %v6691_v37 = vpop.f32.mrf.mxu1  ;;  %6996 = vmatprep.subr.bf16.mxu1 %v7597_v0 }
 0x211   :  { %6983 = vmatpush3.bf16.msra.mxu0 %v7466_v55  ;;  %v7487_v55 = vld [vmem:[%s9187_s2 + $0x578] sm:$0xff]   ;;  %v3892_v58 = vrot.slane %v7834_v34, 4 }
 0x212   :  { %v6679_v5 = vpop.f32.mrf.mxu0  ;;  %6984 = vmatprep.subr.bf16.mxu0 %v7597_v0 }
 0x213   :  { %6997 = vmatpush3.bf16.msra.mxu1 %v7467_v57 }
 0x214   :  { %6998 = vmatprep.subr.bf16.mxu1 %v7597_v0 }
 0x215   :  { %6985 = vmatpush3.bf16.msra.mxu0 %v7468_v60  ;;  %v7489_v60 = vld [vmem:[%s9187_s2 + $0x570] sm:$0xff]  }
 0x216   :  { %6986 = vmatprep.subr.bf16.mxu0 %v7597_v0 }
 0x217   :  { %6999 = vmatpush3.bf16.msra.mxu1 %v7469_v61 }
 0x218   :  { %7016 = vmatprep.subr.bf16.mxu1 %v7597_v0 }
 0x219   :  { %6987 = vmatpush3.bf16.msra.mxu0 %v7470_v36 }
 0x21a   :  { %v1884_v62 = vpop.f32.mrf.mxu1  ;;  %7001 = vmatmul.mubr.msk.bf16.vlgmr.msra.gmra.mxu1 %vm914_vm3, %v3661_v41  ;;  %7004 = vmatprep.subr.bf16.mxu0 %v7597_v0 }
 0x21b   :  { %7017 = vmatpush3.bf16.msra.mxu1 %v7471_v8  ;;  %7024 = vmatprep.mubr.msk.bf16.mxu1 %vm7598_vm2, %v7597_v0 }
 0x21c   :  { %v1816_v3 = vpop.f32.mrf.mxu0  ;;  %v6714_v6 = vpop.f32.mrf.mxu1  ;;  %6989 = vmatmul.mubr.msk.bf16.vlgmr.msra.gmra.mxu0 %vm914_vm3, %v3584_v1  ;;  %7018 = vmatprep.subr.bf16.mxu1 %v7597_v0  ;;  %v7492_v1 = vld [vmem:[%s9187_s2 + $0x548] sm:$0xff]  }
 0x21d   :  { %v8583_v9 = vadd.f32 %v1884_v62, %v1816_v3  ;;  %7005 = vmatpush3.bf16.msra.mxu0 %v7472_v7  ;;  %7012 = vmatprep.mubr.msk.bf16.mxu0 %vm7598_vm2, %v7597_v0  ;;  %v7491_v7 = vld [vmem:[%s9187_s2 + $0x568] sm:$0xff]   ;;  %v7493_v3 = vld [vmem:[%s9187_s2 + $0x560] sm:$0xff]  }
 0x21e   :  { %v6702_v12 = vpop.f32.mrf.mxu0  ;;  %v1887_v13 = vpop.f32.mrf.mxu1  ;;  %7006 = vmatprep.subr.bf16.mxu0 %v7597_v0  ;;  %v7494_v6 = vld [vmem:[%s9187_s2 + $0x540] sm:$0xff]  }
 0x21f   :  { %7019 = vmatpush3.bf16.msra.mxu1 %v7473_v4  ;;  %v4123_v12 = vrot.slane %v8482_v19, 5  ;;  %v7496_v13 = vld [vmem:[%s9187_s2 + $0x598] sm:$0xff]  }
 0x220   :  { %v1819_v17 = vpop.f32.mrf.mxu0  ;;  %v6715_v18 = vpop.f32.mrf.mxu1  ;;  %7020 = vmatprep.subr.bf16.mxu1 %v7597_v0 }
 0x221   :  { %7007 = vmatpush3.bf16.msra.mxu0 %v7474_v10  ;;  %v7495_v10 = vld [vmem:[%s9187_s2 + $0x5b8] sm:$0xff]   ;;  %v4046_v17 = vrot.slane %v7834_v34, 5 }
 0x222   :  { %v6703_v21 = vpop.f32.mrf.mxu0  ;;  %7008 = vmatprep.subr.bf16.mxu0 %v7597_v0 }
 0x223   :  { %7021 = vmatpush3.bf16.msra.mxu1 %v7475_v14 }
 0x224   :  { %7022 = vmatprep.subr.bf16.mxu1 %v7597_v0 }
 0x225   :  { %7009 = vmatpush3.bf16.msra.mxu0 %v7476_v20  ;;  %v7497_v20 = vld [vmem:[%s9187_s2 + $0x5b0] sm:$0xff]  }
 0x226   :  { %7010 = vmatprep.subr.bf16.mxu0 %v7597_v0 }
 0x227   :  { %7023 = vmatpush3.bf16.msra.mxu1 %v7477_v22 }
 0x228   :  { %7040 = vmatprep.subr.bf16.mxu1 %v7597_v0 }
 0x229   :  { %7011 = vmatpush3.bf16.msra.mxu0 %v7478_v24 }
 0x22a   :  { %v2028_v31 = vpop.f32.mrf.mxu1  ;;  %7025 = vmatmul.mubr.msk.bf16.vlgmr.msra.gmra.mxu1 %vm914_vm3, %v3815_v29  ;;  %7028 = vmatprep.subr.bf16.mxu0 %v7597_v0 }
 0x22b   :  { %7041 = vmatpush3.bf16.msra.mxu1 %v7479_v25  ;;  %7048 = vmatprep.mubr.msk.bf16.mxu1 %vm7598_vm2, %v7597_v0 }
 0x22c   :  { %v1960_v39 = vpop.f32.mrf.mxu0  ;;  %v6738_v40 = vpop.f32.mrf.mxu1  ;;  %7013 = vmatmul.mubr.msk.bf16.vlgmr.msra.gmra.mxu0 %vm914_vm3, %v3738_v33  ;;  %7042 = vmatprep.subr.bf16.mxu1 %v7597_v0  ;;  %v7500_v33 = vld [vmem:[%s9187_s2 + $0x588] sm:$0xff]  }
 0x22d   :  { %v8625_v42 = vadd.f32 %v2028_v31, %v1960_v39  ;;  %7029 = vmatpush3.bf16.msra.mxu0 %v7480_v30  ;;  %7036 = vmatprep.mubr.msk.bf16.mxu0 %vm7598_vm2, %v7597_v0  ;;  %v7499_v30 = vld [vmem:[%s9187_s2 + $0x5a8] sm:$0xff]   ;;  %v7501_v39 = vld [vmem:[%s9187_s2 + $0x5a0] sm:$0xff]  }
 0x22e   :  { %v6726_v44 = vpop.f32.mrf.mxu0  ;;  %v2031_v45 = vpop.f32.mrf.mxu1  ;;  %7030 = vmatprep.subr.bf16.mxu0 %v7597_v0  ;;  %v7502_v40 = vld [vmem:[%s9187_s2 + $0x580] sm:$0xff]  }
 0x22f   :  { %7043 = vmatpush3.bf16.msra.mxu1 %v7481_v38  ;;  %v4277_v44 = vrot.slane %v8482_v19, 6  ;;  %v7504_v45 = vld [vmem:[%s9187_s2 + $0x5d8] sm:$0xff]  }
 0x230   :  { %v1963_v47 = vpop.f32.mrf.mxu0  ;;  %v6739_v48 = vpop.f32.mrf.mxu1  ;;  %7044 = vmatprep.subr.bf16.mxu1 %v7597_v0 }
 0x231   :  { %7031 = vmatpush3.bf16.msra.mxu0 %v7482_v43  ;;  %v7503_v43 = vld [vmem:[%s9187_s2 + $0x5f8] sm:$0xff]   ;;  %v4200_v47 = vrot.slane %v7834_v34, 6 }
 0x232   :  { %v6727_v11 = vpop.f32.mrf.mxu0  ;;  %7032 = vmatprep.subr.bf16.mxu0 %v7597_v0 }
 0x233   :  { %7045 = vmatpush3.bf16.msra.mxu1 %v7483_v46 }
 0x234   :  { %7046 = vmatprep.subr.bf16.mxu1 %v7597_v0 }
 0x235   :  { %7033 = vmatpush3.bf16.msra.mxu0 %v7484_v49  ;;  %v7505_v49 = vld [vmem:[%s9187_s2 + $0x5f0] sm:$0xff]  }
 0x236   :  { %7034 = vmatprep.subr.bf16.mxu0 %v7597_v0 }
 0x237   :  { %7047 = vmatpush3.bf16.msra.mxu1 %v7485_v51 }
 0x238   :  { %7064 = vmatprep.subr.bf16.mxu1 %v7597_v0 }
 0x239   :  { %7035 = vmatpush3.bf16.msra.mxu0 %v7486_v52 }
 0x23a   :  { %v2181_v57 = vpop.f32.mrf.mxu1  ;;  %7049 = vmatmul.mubr.msk.bf16.vlgmr.msra.gmra.mxu1 %vm914_vm3, %v3969_v15  ;;  %7052 = vmatprep.subr.bf16.mxu0 %v7597_v0 }
 0x23b   :  { %v8661_v37 = vadd.f32 %v2181_v57, %v8370_v23  ;;  %7065 = vmatpush3.bf16.msra.mxu1 %v7487_v55  ;;  %7072 = vmatprep.mubr.msk.bf16.mxu1 %vm7598_vm2, %v7597_v0  ;;  %v7490_v23 = vld [vmem:[%s9187_s2 + $0x550] sm:$0xff]  }
 0x23c   :  { %v2103_v5 = vpop.f32.mrf.mxu0  ;;  %v6762_v61 = vpop.f32.mrf.mxu1  ;;  %7037 = vmatmul.mubr.msk.bf16.vlgmr.msra.gmra.mxu0 %vm914_vm3, %v3892_v58  ;;  %7066 = vmatprep.subr.bf16.mxu1 %v7597_v0 }
 0x23d   :  { %v8671_v36 = vadd.f32 %v2103_v5, %v8328_v2  ;;  %7053 = vmatpush3.bf16.msra.mxu0 %v7488_v16  ;;  %7060 = vmatprep.mubr.msk.bf16.mxu0 %vm7598_vm2, %v7597_v0  ;;  %v7507_v16 = vld [vmem:[%s9187_s2 + $0x5e8] sm:$0xff]  }
 0x23e   :  { %v6750_v8 = vpop.f32.mrf.mxu0  ;;  %v2184_v41 = vpop.f32.mrf.mxu1  ;;  %7054 = vmatprep.subr.bf16.mxu0 %v7597_v0 }
 0x23f   :  { %7067 = vmatpush3.bf16.msra.mxu1 %v7489_v60  ;;  %v7508_v60 = vld [vmem:[%s9187_s2 + $0x5c8] sm:$0xff]   ;;  %v4431_v41 = vrot.slane %v8482_v19, 7 }
 0x240   :  { %v2106_v62 = vpop.f32.mrf.mxu0  ;;  %v6763_v2 = vpop.f32.mrf.mxu1  ;;  %7068 = vmatprep.subr.bf16.mxu1 %v7597_v0 }
 0x241   :  { %7055 = vmatpush3.bf16.msra.mxu0 %v7490_v23  ;;  %v7509_v23 = vld [vmem:[%s9187_s2 + $0x5e0] sm:$0xff]  }
 0x242   :  { %v6751_v4 = vpop.f32.mrf.mxu0  ;;  %7056 = vmatprep.subr.bf16.mxu0 %v7597_v0 }
 0x243   :  { %7069 = vmatpush3.bf16.msra.mxu1 %v7491_v7  ;;  %v7512_v7 = vld [vmem:[%s9187_s2 + $0x618] sm:$0xff]  }
 0x244   :  { %7070 = vmatprep.subr.bf16.mxu1 %v7597_v0 }
 0x245   :  { %7057 = vmatpush3.bf16.msra.mxu0 %v7492_v1 }
 0x246   :  { %7058 = vmatprep.subr.bf16.mxu0 %v7597_v0 }
 0x247   :  { %7071 = vmatpush3.bf16.msra.mxu1 %v7493_v3 }
 0x248   :  { %7088 = vmatprep.subr.bf16.mxu1 %v7597_v0 }
 0x249   :  { %7059 = vmatpush3.bf16.msra.mxu0 %v7494_v6 }
 0x24a   :  { %v2336_v14 = vpop.f32.mrf.mxu1  ;;  %7073 = vmatmul.mubr.msk.bf16.vlgmr.msra.gmra.mxu1 %vm914_vm3, %v4123_v12  ;;  %7076 = vmatprep.subr.bf16.mxu0 %v7597_v0 }
 0x24b   :  { %v8707_v18 = vadd.f32 %v2336_v14, %v8454_v63  ;;  %7089 = vmatpush3.bf16.msra.mxu1 %v7495_v10  ;;  %7096 = vmatprep.mubr.msk.bf16.mxu1 %vm7598_vm2, %v7597_v0  ;;  %v7498_v63 = vld [vmem:[%s9187_s2 + $0x590] sm:$0xff]   ;;  %v811_v14 = vmax.f32 %v7828_v32, 0.0  ;;  %v7519_v32 = vld [vmem:[%s9187_s2 + $0x678] sm:$0xff]  }
 0x24c   :  { %v2259_v21 = vpop.f32.mrf.mxu0  ;;  %v6786_v22 = vpop.f32.mrf.mxu1  ;;  %7061 = vmatmul.mubr.msk.bf16.vlgmr.msra.gmra.mxu0 %vm914_vm3, %v4046_v17  ;;  %7090 = vmatprep.subr.bf16.mxu1 %v7597_v0 }
 0x24d   :  { %v8717_v24 = vadd.f32 %v2259_v21, %v8412_v50  ;;  %7077 = vmatpush3.bf16.msra.mxu0 %v7496_v13  ;;  %7084 = vmatprep.mubr.msk.bf16.mxu0 %vm7598_vm2, %v7597_v0  ;;  %v7516_v13 = vld [vmem:[%s9187_s2 + $0x608] sm:$0xff]   ;;  %v7518_v22 = vld [vmem:[%s9187_s2 + $0x600] sm:$0xff]  }
 0x24e   :  { %v6774_v25 = vpop.f32.mrf.mxu0  ;;  %v2339_v29 = vpop.f32.mrf.mxu1  ;;  %7078 = vmatprep.subr.bf16.mxu0 %v7597_v0 }
 0x24f   :  { %7091 = vmatpush3.bf16.msra.mxu1 %v7497_v20  ;;  %v7517_v20 = vld [vmem:[%s9187_s2 + $0x620] sm:$0xff]   ;;  %v7520_v25 = vld [vmem:[%s9187_s2 + $0x658] sm:$0xff]  }
 0x250   :  { %v2262_v31 = vpop.f32.mrf.mxu0  ;;  %v6787_v50 = vpop.f32.mrf.mxu1  ;;  %7092 = vmatprep.subr.bf16.mxu1 %v7597_v0 }
 0x251   :  { %7079 = vmatpush3.bf16.msra.mxu0 %v7498_v63  ;;  %v7521_v31 = vld [vmem:[%s9187_s2 + $0x670] sm:$0xff]  }
 0x252   :  { %v6775_v38 = vpop.f32.mrf.mxu0  ;;  %7080 = vmatprep.subr.bf16.mxu0 %v7597_v0 }
 0x253   :  { %7093 = vmatpush3.bf16.msra.mxu1 %v7499_v30 }
 0x254   :  { %7094 = vmatprep.subr.bf16.mxu1 %v7597_v0 }
 0x255   :  { %7081 = vmatpush3.bf16.msra.mxu0 %v7500_v33 }
 0x256   :  { %7082 = vmatprep.subr.bf16.mxu0 %v7597_v0 }
 0x257   :  { %7095 = vmatpush3.bf16.msra.mxu1 %v7501_v39 }
 0x258   :  { %7112 = vmatprep.subr.bf16.mxu1 %v7597_v0 }
 0x259   :  { %7083 = vmatpush3.bf16.msra.mxu0 %v7502_v40 }
 0x25a   :  { %v2490_v46 = vpop.f32.mrf.mxu1  ;;  %7097 = vmatmul.mubr.msk.bf16.vlgmr.msra.gmra.mxu1 %vm914_vm3, %v4277_v44  ;;  %7100 = vmatprep.subr.bf16.mxu0 %v7597_v0 }
 0x25b   :  { %v8753_v48 = vadd.f32 %v2490_v46, %v8541_v54  ;;  %7113 = vmatpush3.bf16.msra.mxu1 %v7503_v43  ;;  %7120 = vmatprep.mubr.msk.bf16.mxu1 %vm7598_vm2, %v7597_v0  ;;  %v7506_v54 = vld [vmem:[%s9187_s2 + $0x5d0] sm:$0xff]   ;;  %v7523_v43 = vld [vmem:[%s9187_s2 + $0x668] sm:$0xff]  }
 0x25c   :  { %v2413_v11 = vpop.f32.mrf.mxu0  ;;  %v6810_v51 = vpop.f32.mrf.mxu1  ;;  %7085 = vmatmul.mubr.msk.bf16.vlgmr.msra.gmra.mxu0 %vm914_vm3, %v4200_v47  ;;  %7114 = vmatprep.subr.bf16.mxu1 %v7597_v0  ;;  %v7525_v47 = vld [vmem:[%s9187_s2 + $0x660] sm:$0xff]  }
 0x25d   :  { %v8763_v52 = vadd.f32 %v2413_v11, %v8499_v28  ;;  %7101 = vmatpush3.bf16.msra.mxu0 %v7504_v45  ;;  %7108 = vmatprep.mubr.msk.bf16.mxu0 %vm7598_vm2, %v7597_v0  ;;  %v312_v28 = vadd.f32 %v7785_v27, %v7783_v26  ;;  %v7510_v26 = vld [vmem:[%s9187_s2 + $0x5c0] sm:$0xff]   ;;  %v7524_v45 = vld [vmem:[%s9187_s2 + $0x648] sm:$0xff]   ;;  %v7527_v11 = vld [vmem:[%s9187_s2 + $0x6b8] sm:$0xff]  }
 0x25e   :  { %v6798_v55 = vpop.f32.mrf.mxu0  ;;  %v2493_v15 = vpop.f32.mrf.mxu1  ;;  %7102 = vmatprep.subr.bf16.mxu0 %v7597_v0 }
 0x25f   :  { %7115 = vmatpush3.bf16.msra.mxu1 %v7505_v49  ;;  %v434_v5 = vadd.f32 %v7793_v53, %v312_v28  ;;  %v7511_v53 = vld [vmem:[%s9187_s2 + $0x638] sm:$0xff]   ;;  %v7526_v49 = vld [vmem:[%s9187_s2 + $0x640] sm:$0xff]   ;;  %v7529_v28 = vld [vmem:[%s9187_s2 + $0x6b0] sm:$0xff]  }
 0x260   :  { %v2416_v57 = vpop.f32.mrf.mxu0  ;;  %v6811_v58 = vpop.f32.mrf.mxu1  ;;  %7116 = vmatprep.subr.bf16.mxu1 %v7597_v0 }
 0x261   :  { %7103 = vmatpush3.bf16.msra.mxu0 %v7506_v54  ;;  %v563_v27 = vadd.f32 %v7795_v56, %v434_v5  ;;  %v4354_v56 = vrot.slane %v7834_v34, 7  ;;  %v7528_v54 = vld [vmem:[%s9187_s2 + $0x698] sm:$0xff]  }
 0x262   :  { %v6799_v61 = vpop.f32.mrf.mxu0  ;;  %7104 = vmatprep.subr.bf16.mxu0 %v7597_v0 }
 0x263   :  { %7117 = vmatpush3.bf16.msra.mxu1 %v7507_v16  ;;  %v681_v8 = vadd.f32 %v8316_v59, %v563_v27  ;;  %v7513_v59 = vld [vmem:[%s9187_s2 + $0x630] sm:$0xff]   ;;  %v7532_v27 = vld [vmem:[%s9187_s2 + $0x688] sm:$0xff]  }
 0x264   :  { %7118 = vmatprep.subr.bf16.mxu1 %v7597_v0 }
 0x265   :  { %7105 = vmatpush3.bf16.msra.mxu0 %v7508_v60  ;;  %v795_v19 = vadd.f32 %v8309_v35, %v681_v8  ;;  %v7515_v35 = vld [vmem:[%s9187_s2 + $0x628] sm:$0xff]   ;;  %v7533_v8 = vld [vmem:[%s9187_s2 + $0x6a0] sm:$0xff]  }
 0x266   :  { %7106 = vmatprep.subr.bf16.mxu0 %v7597_v0 }
 0x267   :  { %7119 = vmatpush3.bf16.msra.mxu1 %v7509_v23  ;;  %v810_v10 = vmax.f32 %v795_v19, 0.0  ;;  %v7531_v23 = vld [vmem:[%s9187_s2 + $0x6a8] sm:$0xff]  }
 0x268   :  { %7136 = vmatprep.subr.bf16.mxu1 %v7597_v0 }
 0x269   :  { %7107 = vmatpush3.bf16.msra.mxu0 %v7510_v26  ;;  %v8835_v21 = vpack.c.bf16 %v811_v14, %v810_v10 }
 0x26a   :  { %v2644_v62 = vpop.f32.mrf.mxu1  ;;  %7121 = vmatmul.mubr.msk.bf16.vlgmr.msra.gmra.mxu1 %vm914_vm3, %v4431_v41  ;;  %7124 = vmatprep.subr.bf16.mxu0 %v7597_v0  ;;  %v7534_v41 = vld [vmem:[%s9187_s2 + $0x680] sm:$0xff]  }
 0x26b   :  { %v8804_v2 = vadd.f32 %v2644_v62, %v8625_v42  ;;  %7137 = vmatpush3.bf16.msra.mxu1 %v7511_v53  ;;  %7144 = vmatprep.mubr.msk.bf16.mxu1 %vm7598_vm2, %v7597_v0  ;;  %v7514_v42 = vld [vmem:[%s9187_s2 + $0x610] sm:$0xff]   ;;  %v8846_v63 = vshrl.u32 %v8835_v21, 16  ;;  %v4663_v15 = vrot.slane %v8835_v21, 1  ;;  %v4817_v19 = vrot.slane %v8835_v21, 2 }
 0x26c   :  { %v2567_v1 = vpop.f32.mrf.mxu0  ;;  %v6834_v4 = vpop.f32.mrf.mxu1  ;;  %7109 = vmatmul.mubr.msk.bf16.vlgmr.msra.gmra.mxu0 %vm914_vm3, %v4354_v56  ;;  %7138 = vmatprep.subr.bf16.mxu1 %v7597_v0  ;;  %v7536_v56 = vld [vmem:[%s9187_s2 + $0x6d8] sm:$0xff]  }
 0x26d   :  { %v8815_v34 = vadd.f32 %v2567_v1, %v8583_v9  ;;  %7125 = vmatpush3.bf16.msra.mxu0 %v7512_v7  ;;  %7132 = vmatprep.mubr.msk.bf16.mxu0 %vm7598_vm2, %v7597_v0  ;;  %v4740_v51 = vrot.slane %v8846_v63, 1  ;;  %v7535_v7 = vld [vmem:[%s9187_s2 + $0x6f8] sm:$0xff]   ;;  %v4894_v62 = vrot.slane %v8846_v63, 2  ;;  %v7537_v4 = vld [vmem:[%s9187_s2 + $0x6f0] sm:$0xff]  }
 0x26e   :  { %v6822_v3 = vpop.f32.mrf.mxu0  ;;  %v2647_v6 = vpop.f32.mrf.mxu1  ;;  %7126 = vmatprep.subr.bf16.mxu0 %v7597_v0 }
 0x26f   :  { %7139 = vmatpush3.bf16.msra.mxu1 %v7513_v59 }
 0x270   :  { %v2570_v9 = vpop.f32.mrf.mxu0  ;;  %v6835_v12 = vpop.f32.mrf.mxu1  ;;  %7140 = vmatprep.subr.bf16.mxu1 %v7597_v0 }
 0x271   :  { %7127 = vmatpush3.bf16.msra.mxu0 %v7514_v42  ;;  %v7539_v9 = vld [vmem:[%s9187_s2 + $0x6e8] sm:$0xff]  }
 0x272   :  { %v6823_v17 = vpop.f32.mrf.mxu0  ;;  %7128 = vmatprep.subr.bf16.mxu0 %v7597_v0 }
 0x273   :  { %7141 = vmatpush3.bf16.msra.mxu1 %v7515_v35  ;;  %v7541_v17 = vld [vmem:[%s9187_s2 + $0x6e0] sm:$0xff]  }
 0x274   :  { %7142 = vmatprep.subr.bf16.mxu1 %v7597_v0 }
 0x275   :  { %7129 = vmatpush3.bf16.msra.mxu0 %v7516_v13  ;;  %v7540_v13 = vld [vmem:[%s9187_s2 + $0x6c8] sm:$0xff]  }
 0x276   :  { %7130 = vmatprep.subr.bf16.mxu0 %v7597_v0 }
 0x277   :  { %7143 = vmatpush3.bf16.msra.mxu1 %v7517_v20  ;;  %v7542_v20 = vld [vmem:[%s9187_s2 + $0x6c0] sm:$0xff]  }
 0x278   :  { %7160 = vmatprep.subr.bf16.mxu1 %v7597_v0 }
 0x279   :  { %7131 = vmatpush3.bf16.msra.mxu0 %v7518_v22  ;;  %v7543_v22 = vld [vmem:[%s9187_s2 + $0x738] sm:$0xff]  }
 0x27a   :  { %v2798_v29 = vpop.f32.mrf.mxu1  ;;  %7145 = vmatmul.mubr.msk.bf16.vlgmr.msra.gmra.mxu1 %vm914_vm3, %v8846_v63  ;;  %7148 = vmatprep.subr.bf16.mxu0 %v7597_v0 }
 0x27b   :  { %v8856_v30 = vadd.f32 %v2798_v29, %v8661_v37  ;;  %7161 = vmatpush3.bf16.msra.mxu1 %v7519_v32  ;;  %7168 = vmatprep.mubr.msk.bf16.mxu1 %vm7598_vm2, %v7597_v0  ;;  %v7522_v37 = vld [vmem:[%s9187_s2 + $0x650] sm:$0xff]   ;;  %v5048_v32 = vrot.slane %v8846_v63, 3 }
 0x27c   :  { %v2721_v50 = vpop.f32.mrf.mxu0  ;;  %v6858_v33 = vpop.f32.mrf.mxu1  ;;  %7133 = vmatmul.mubr.msk.bf16.vlgmr.msra.gmra.mxu0 %vm914_vm3, %v8835_v21  ;;  %7162 = vmatprep.subr.bf16.mxu1 %v7597_v0 }
 0x27d   :  { %v8867_v38 = vadd.f32 %v2721_v50, %v8671_v36  ;;  %7149 = vmatpush3.bf16.msra.mxu0 %v7520_v25  ;;  %7156 = vmatprep.mubr.msk.bf16.mxu0 %vm7598_vm2, %v7597_v0  ;;  %v7544_v25 = vld [vmem:[%s9187_s2 + $0x718] sm:$0xff]   ;;  %v7545_v33 = vld [vmem:[%s9187_s2 + $0x730] sm:$0xff]  }
 0x27e   :  { %v6846_v39 = vpop.f32.mrf.mxu0  ;;  %v2801_v40 = vpop.f32.mrf.mxu1  ;;  %7150 = vmatprep.subr.bf16.mxu0 %v7597_v0 }
 0x27f   :  { %7163 = vmatpush3.bf16.msra.mxu1 %v7521_v31  ;;  %v4971_v31 = vrot.slane %v8835_v21, 3 }
 0x280   :  { %v2724_v44 = vpop.f32.mrf.mxu0  ;;  %v6859_v36 = vpop.f32.mrf.mxu1  ;;  %7164 = vmatprep.subr.bf16.mxu1 %v7597_v0 }
 0x281   :  { %7151 = vmatpush3.bf16.msra.mxu0 %v7522_v37  ;;  %v7547_v36 = vld [vmem:[%s9187_s2 + $0x728] sm:$0xff]  }
 0x282   :  { %v6847_v46 = vpop.f32.mrf.mxu0  ;;  %7152 = vmatprep.subr.bf16.mxu0 %v7597_v0 }
 0x283   :  { %7165 = vmatpush3.bf16.msra.mxu1 %v7523_v43  ;;  %v7548_v46 = vld [vmem:[%s9187_s2 + $0x708] sm:$0xff]  }
 0x284   :  { %7166 = vmatprep.subr.bf16.mxu1 %v7597_v0 }
 0x285   :  { %7153 = vmatpush3.bf16.msra.mxu0 %v7524_v45 }
 0x286   :  { %7154 = vmatprep.subr.bf16.mxu0 %v7597_v0 }
 0x287   :  { %7167 = vmatpush3.bf16.msra.mxu1 %v7525_v47 }
 0x288   :  { %7184 = vmatprep.subr.bf16.mxu1 %v7597_v0 }
 0x289   :  { %7155 = vmatpush3.bf16.msra.mxu0 %v7526_v49  ;;  %v7549_v49 = vld [vmem:[%s9187_s2 + $0x720] sm:$0xff]  }
 0x28a   :  { %v2952_v55 = vpop.f32.mrf.mxu1  ;;  %7169 = vmatmul.mubr.msk.bf16.vlgmr.msra.gmra.mxu1 %vm914_vm3, %v4740_v51  ;;  %7172 = vmatprep.subr.bf16.mxu0 %v7597_v0  ;;  %v7551_v51 = vld [vmem:[%s9187_s2 + $0x778] sm:$0xff]  }
 0x28b   :  { %v8903_v16 = vadd.f32 %v2952_v55, %v8707_v18  ;;  %7185 = vmatpush3.bf16.msra.mxu1 %v7527_v11  ;;  %7192 = vmatprep.mubr.msk.bf16.mxu1 %vm7598_vm2, %v7597_v0  ;;  %v7530_v18 = vld [vmem:[%s9187_s2 + $0x690] sm:$0xff]   ;;  %v7550_v11 = vld [vmem:[%s9187_s2 + $0x700] sm:$0xff]   ;;  %v7552_v55 = vld [vmem:[%s9187_s2 + $0x758] sm:$0xff]  }
 0x28c   :  { %v2875_v57 = vpop.f32.mrf.mxu0  ;;  %v6882_v58 = vpop.f32.mrf.mxu1  ;;  %7157 = vmatmul.mubr.msk.bf16.vlgmr.msra.gmra.mxu0 %vm914_vm3, %v4663_v15  ;;  %7186 = vmatprep.subr.bf16.mxu1 %v7597_v0 }
 0x28d   :  { %v8913_v60 = vadd.f32 %v2875_v57, %v8717_v24  ;;  %7173 = vmatpush3.bf16.msra.mxu0 %v7528_v54  ;;  %7180 = vmatprep.mubr.msk.bf16.mxu0 %vm7598_vm2, %v7597_v0  ;;  %v5202_v54 = vrot.slane %v8846_v63, 4  ;;  %v7553_v58 = vld [vmem:[%s9187_s2 + $0x770] sm:$0xff]  }
 0x28e   :  { %v6870_v5 = vpop.f32.mrf.mxu0  ;;  %v2955_v61 = vpop.f32.mrf.mxu1  ;;  %7174 = vmatprep.subr.bf16.mxu0 %v7597_v0 }
 0x28f   :  { %7187 = vmatpush3.bf16.msra.mxu1 %v7529_v28  ;;  %v5125_v28 = vrot.slane %v8835_v21, 4 }
 0x290   :  { %v2878_v26 = vpop.f32.mrf.mxu0  ;;  %v6883_v24 = vpop.f32.mrf.mxu1  ;;  %7188 = vmatprep.subr.bf16.mxu1 %v7597_v0 }
 0x291   :  { %7175 = vmatpush3.bf16.msra.mxu0 %v7530_v18  ;;  %v7555_v24 = vld [vmem:[%s9187_s2 + $0x768] sm:$0xff]  }
 0x292   :  { %v6871_v53 = vpop.f32.mrf.mxu0  ;;  %7176 = vmatprep.subr.bf16.mxu0 %v7597_v0 }
 0x293   :  { %7189 = vmatpush3.bf16.msra.mxu1 %v7531_v23  ;;  %v7556_v53 = vld [vmem:[%s9187_s2 + $0x748] sm:$0xff]  }
 0x294   :  { %7190 = vmatprep.subr.bf16.mxu1 %v7597_v0 }
 0x295   :  { %7177 = vmatpush3.bf16.msra.mxu0 %v7532_v27 }
 0x296   :  { %7178 = vmatprep.subr.bf16.mxu0 %v7597_v0 }
 0x297   :  { %7191 = vmatpush3.bf16.msra.mxu1 %v7533_v8 }
 0x298   :  { %7208 = vmatprep.subr.bf16.mxu1 %v7597_v0 }
 0x299   :  { %7179 = vmatpush3.bf16.msra.mxu0 %v7534_v41  ;;  %v7557_v41 = vld [vmem:[%s9187_s2 + $0x760] sm:$0xff]  }
 0x29a   :  { %v3106_v59 = vpop.f32.mrf.mxu1  ;;  %7193 = vmatmul.mubr.msk.bf16.vlgmr.msra.gmra.mxu1 %vm914_vm3, %v4894_v62  ;;  %7196 = vmatprep.subr.bf16.mxu0 %v7597_v0  ;;  %v7559_v62 = vld [vmem:[%s9187_s2 + $0x7b8] sm:$0xff]  }
 0x29b   :  { %v8949_v1 = vadd.f32 %v3106_v59, %v8753_v48  ;;  %7209 = vmatpush3.bf16.msra.mxu1 %v7535_v7  ;;  %7216 = vmatprep.mubr.msk.bf16.mxu1 %vm7598_vm2, %v7597_v0  ;;  %v7538_v48 = vld [vmem:[%s9187_s2 + $0x6d0] sm:$0xff]   ;;  %v7558_v7 = vld [vmem:[%s9187_s2 + $0x740] sm:$0xff]   ;;  %v7560_v59 = vld [vmem:[%s9187_s2 + $0x798] sm:$0xff]  }
 0x29c   :  { %v3029_v42 = vpop.f32.mrf.mxu0  ;;  %v6906_v3 = vpop.f32.mrf.mxu1  ;;  %7181 = vmatmul.mubr.msk.bf16.vlgmr.msra.gmra.mxu0 %vm914_vm3, %v4817_v19  ;;  %7210 = vmatprep.subr.bf16.mxu1 %v7597_v0 }
 0x29d   :  { %v8959_v6 = vadd.f32 %v3029_v42, %v8763_v52  ;;  %7197 = vmatpush3.bf16.msra.mxu0 %v7536_v56  ;;  %7204 = vmatprep.mubr.msk.bf16.mxu0 %vm7598_vm2, %v7597_v0  ;;  %v5356_v56 = vrot.slane %v8846_v63, 5  ;;  %v7561_v3 = vld [vmem:[%s9187_s2 + $0x7b0] sm:$0xff]  }
 0x29e   :  { %v6894_v35 = vpop.f32.mrf.mxu0  ;;  %v3109_v10 = vpop.f32.mrf.mxu1  ;;  %7198 = vmatprep.subr.bf16.mxu0 %v7597_v0 }
 0x29f   :  { %7211 = vmatpush3.bf16.msra.mxu1 %v7537_v4  ;;  %v5279_v4 = vrot.slane %v8835_v21, 5 }
 0x2a0   :  { %v3032_v12 = vpop.f32.mrf.mxu0  ;;  %v6907_v52 = vpop.f32.mrf.mxu1  ;;  %7212 = vmatprep.subr.bf16.mxu1 %v7597_v0 }
 0x2a1   :  { %7199 = vmatpush3.bf16.msra.mxu0 %v7538_v48  ;;  %v7563_v52 = vld [vmem:[%s9187_s2 + $0x7a8] sm:$0xff]  }
 0x2a2   :  { %v6895_v14 = vpop.f32.mrf.mxu0  ;;  %7200 = vmatprep.subr.bf16.mxu0 %v7597_v0 }
 0x2a3   :  { %7213 = vmatpush3.bf16.msra.mxu1 %v7539_v9  ;;  %v7564_v14 = vld [vmem:[%s9187_s2 + $0x788] sm:$0xff]  }
 0x2a4   :  { %7214 = vmatprep.subr.bf16.mxu1 %v7597_v0 }
 0x2a5   :  { %7201 = vmatpush3.bf16.msra.mxu0 %v7540_v13 }
 0x2a6   :  { %7202 = vmatprep.subr.bf16.mxu0 %v7597_v0 }
 0x2a7   :  { %7215 = vmatpush3.bf16.msra.mxu1 %v7541_v17 }
 0x2a8   :  { %7232 = vmatprep.subr.bf16.mxu1 %v7597_v0 }
 0x2a9   :  { %7203 = vmatpush3.bf16.msra.mxu0 %v7542_v20  ;;  %v7565_v20 = vld [vmem:[%s9187_s2 + $0x7a0] sm:$0xff]  }
 0x2aa   :  { %v3260_v29 = vpop.f32.mrf.mxu1  ;;  %7217 = vmatmul.mubr.msk.bf16.vlgmr.msra.gmra.mxu1 %vm914_vm3, %v5048_v32  ;;  %7220 = vmatprep.subr.bf16.mxu0 %v7597_v0  ;;  %v7567_v32 = vld [vmem:[%s9187_s2 + $0x7f8] sm:$0xff]  }
 0x2ab   :  { %v8995_v50 = vadd.f32 %v3260_v29, %v8804_v2  ;;  %7233 = vmatpush3.bf16.msra.mxu1 %v7543_v22  ;;  %7240 = vmatprep.mubr.msk.bf16.mxu1 %vm7598_vm2, %v7597_v0  ;;  %v7546_v2 = vld [vmem:[%s9187_s2 + $0x710] sm:$0xff]   ;;  %v7566_v22 = vld [vmem:[%s9187_s2 + $0x780] sm:$0xff]   ;;  %v7568_v29 = vld [vmem:[%s9187_s2 + $0x7d8] sm:$0xff]  }
 0x2ac   :  { %v3183_v37 = vpop.f32.mrf.mxu0  ;;  %v6930_v39 = vpop.f32.mrf.mxu1  ;;  %7205 = vmatmul.mubr.msk.bf16.vlgmr.msra.gmra.mxu0 %vm914_vm3, %v4971_v31  ;;  %7234 = vmatprep.subr.bf16.mxu1 %v7597_v0 }
 0x2ad   :  { %v9005_v40 = vadd.f32 %v3183_v37, %v8815_v34  ;;  %7221 = vmatpush3.bf16.msra.mxu0 %v7544_v25  ;;  %7228 = vmatprep.mubr.msk.bf16.mxu0 %vm7598_vm2, %v7597_v0  ;;  %v5510_v25 = vrot.slane %v8846_v63, 6  ;;  %v7569_v39 = vld [vmem:[%s9187_s2 + $0x7f0] sm:$0xff]  }
 0x2ae   :  { %v6918_v43 = vpop.f32.mrf.mxu0  ;;  %v3263_v44 = vpop.f32.mrf.mxu1  ;;  %7222 = vmatprep.subr.bf16.mxu0 %v7597_v0 }
 0x2af   :  { %7235 = vmatpush3.bf16.msra.mxu1 %v7545_v33  ;;  %v5433_v33 = vrot.slane %v8835_v21, 6 }
 0x2b0   :  { %v3186_v45 = vpop.f32.mrf.mxu0  ;;  %v6931_v34 = vpop.f32.mrf.mxu1  ;;  %7236 = vmatprep.subr.bf16.mxu1 %v7597_v0 }
 0x2b1   :  { %7223 = vmatpush3.bf16.msra.mxu0 %v7546_v2  ;;  %v7571_v34 = vld [vmem:[%s9187_s2 + $0x7e8] sm:$0xff]  }
 0x2b2   :  { %v6919_v47 = vpop.f32.mrf.mxu0  ;;  %7224 = vmatprep.subr.bf16.mxu0 %v7597_v0 }
 0x2b3   :  { %7237 = vmatpush3.bf16.msra.mxu1 %v7547_v36 }
 0x2b4   :  { %7238 = vmatprep.subr.bf16.mxu1 %v7597_v0 }
 0x2b5   :  { %7225 = vmatpush3.bf16.msra.mxu0 %v7548_v46 }
 0x2b6   :  { %7226 = vmatprep.subr.bf16.mxu0 %v7597_v0 }
 0x2b7   :  { %7239 = vmatpush3.bf16.msra.mxu1 %v7549_v49 }
 0x2b8   :  { %7256 = vmatprep.subr.bf16.mxu1 %v7597_v0 }
 0x2b9   :  { %7227 = vmatpush3.bf16.msra.mxu0 %v7550_v11  ;;  %v7573_v11 = vld [vmem:[%s9187_s2 + $0x7e0] sm:$0xff]  }
 0x2ba   :  { %v3414_v15 = vpop.f32.mrf.mxu1  ;;  %7241 = vmatmul.mubr.msk.bf16.vlgmr.msra.gmra.mxu1 %vm914_vm3, %v5202_v54  ;;  %7244 = vmatprep.subr.bf16.mxu0 %v7597_v0  ;;  %v5664_v54 = vrot.slane %v8846_v63, 7 }
 0x2bb   :  { %v9041_v57 = vadd.f32 %v3414_v15, %v8856_v30  ;;  %7257 = vmatpush3.bf16.msra.mxu1 %v7551_v51  ;;  %7264 = vmatprep.mubr.msk.bf16.mxu1 %vm7598_vm2, %v7597_v0  ;;  %v7554_v30 = vld [vmem:[%s9187_s2 + $0x750] sm:$0xff]   ;;  %v7574_v51 = vld [vmem:[%s9187_s2 + $0x7c0] sm:$0xff]   ;;  %v5587_v15 = vrot.slane %v8835_v21, 7 }
 0x2bc   :  { %v3336_v18 = vpop.f32.mrf.mxu0  ;;  %v6954_v5 = vpop.f32.mrf.mxu1  ;;  %7229 = vmatmul.mubr.msk.bf16.vlgmr.msra.gmra.mxu0 %vm914_vm3, %v5125_v28  ;;  %7258 = vmatprep.subr.bf16.mxu1 %v7597_v0 }
 0x2bd   :  { %v9051_v61 = vadd.f32 %v3336_v18, %v8867_v38  ;;  %7245 = vmatpush3.bf16.msra.mxu0 %v7552_v55  ;;  %7252 = vmatprep.mubr.msk.bf16.mxu0 %vm7598_vm2, %v7597_v0 }
 0x2be   :  { %v6942_v23 = vpop.f32.mrf.mxu0  ;;  %v3417_v26 = vpop.f32.mrf.mxu1  ;;  %7246 = vmatprep.subr.bf16.mxu0 %v7597_v0 }
 0x2bf   :  { %7259 = vmatpush3.bf16.msra.mxu1 %v7553_v58 }
 0x2c0   :  { %v3339_v27 = vpop.f32.mrf.mxu0  ;;  %v6955_v38 = vpop.f32.mrf.mxu1  ;;  %7260 = vmatprep.subr.bf16.mxu1 %v7597_v0 }
 0x2c1   :  { %7247 = vmatpush3.bf16.msra.mxu0 %v7554_v30 }
 0x2c2   :  { %v6943_v8 = vpop.f32.mrf.mxu0  ;;  %7248 = vmatprep.subr.bf16.mxu0 %v7597_v0 }
 0x2c3   :  { %7261 = vmatpush3.bf16.msra.mxu1 %v7555_v24 }
 0x2c4   :  { %7262 = vmatprep.subr.bf16.mxu1 %v7597_v0 }
 0x2c5   :  { %7249 = vmatpush3.bf16.msra.mxu0 %v7556_v53 }
 0x2c6   :  { %7250 = vmatprep.subr.bf16.mxu0 %v7597_v0 }
 0x2c7   :  { %7263 = vmatpush3.bf16.msra.mxu1 %v7557_v41 }
 0x2c8   :  { %7280 = vmatprep.subr.bf16.mxu1 %v7597_v0 }
 0x2c9   :  { %7251 = vmatpush3.bf16.msra.mxu0 %v7558_v7 }
 0x2ca   :  { %v3569_v19 = vpop.f32.mrf.mxu1  ;;  %7265 = vmatmul.mubr.msk.bf16.vlgmr.msra.gmra.mxu1 %vm914_vm3, %v5356_v56  ;;  %7268 = vmatprep.subr.bf16.mxu0 %v7597_v0 }
 0x2cb   :  { %v9087_v42 = vadd.f32 %v3569_v19, %v8903_v16  ;;  %7281 = vmatpush3.bf16.msra.mxu1 %v7559_v62  ;;  %7288 = vmatprep.mubr.msk.bf16.mxu1 %vm7598_vm2, %v7597_v0  ;;  %v7562_v16 = vld [vmem:[%s9187_s2 + $0x790] sm:$0xff]  }
 0x2cc   :  { %v3492_v48 = vpop.f32.mrf.mxu0  ;;  %v6978_v35 = vpop.f32.mrf.mxu1  ;;  %7253 = vmatmul.mubr.msk.bf16.vlgmr.msra.gmra.mxu0 %vm914_vm3, %v5279_v4  ;;  %7282 = vmatprep.subr.bf16.mxu1 %v7597_v0 }
 0x2cd   :  { %v9097_v10 = vadd.f32 %v3492_v48, %v8913_v60  ;;  %7269 = vmatpush3.bf16.msra.mxu0 %v7560_v59  ;;  %7276 = vmatprep.mubr.msk.bf16.mxu0 %vm7598_vm2, %v7597_v0 }
 0x2ce   :  { %v6966_v9 = vpop.f32.mrf.mxu0  ;;  %v3572_v12 = vpop.f32.mrf.mxu1  ;;  %7270 = vmatprep.subr.bf16.mxu0 %v7597_v0 }
 0x2cf   :  { %7283 = vmatpush3.bf16.msra.mxu1 %v7561_v3 }
 0x2d0   :  { %v3495_v13 = vpop.f32.mrf.mxu0  ;;  %v6979_v60 = vpop.f32.mrf.mxu1  ;;  %7284 = vmatprep.subr.bf16.mxu1 %v7597_v0 }
 0x2d1   :  { %7271 = vmatpush3.bf16.msra.mxu0 %v7562_v16 }
 0x2d2   :  { %v6967_v17 = vpop.f32.mrf.mxu0  ;;  %7272 = vmatprep.subr.bf16.mxu0 %v7597_v0 }
 0x2d3   :  { %7285 = vmatpush3.bf16.msra.mxu1 %v7563_v52 }
 0x2d4   :  { %7286 = vmatprep.subr.bf16.mxu1 %v7597_v0 }
 0x2d5   :  { %7273 = vmatpush3.bf16.msra.mxu0 %v7564_v14 }
 0x2d6   :  { %7274 = vmatprep.subr.bf16.mxu0 %v7597_v0 }
 0x2d7   :  { %7287 = vmatpush3.bf16.msra.mxu1 %v7565_v20 }
 0x2d8   :  { %7304 = vmatprep.subr.bf16.mxu1 %v7597_v0 }
 0x2d9   :  { %7275 = vmatpush3.bf16.msra.mxu0 %v7566_v22 }
 0x2da   :  { %v3723_v31 = vpop.f32.mrf.mxu1  ;;  %7289 = vmatmul.mubr.msk.bf16.vlgmr.msra.gmra.mxu1 %vm914_vm3, %v5510_v25  ;;  %7292 = vmatprep.subr.bf16.mxu0 %v7597_v0 }
 0x2db   :  { %v9133_v37 = vadd.f32 %v3723_v31, %v8949_v1  ;;  %7305 = vmatpush3.bf16.msra.mxu1 %v7567_v32  ;;  %7312 = vmatprep.mubr.msk.bf16.mxu1 %vm7598_vm2, %v7597_v0  ;;  %v7570_v1 = vld [vmem:[%s9187_s2 + $0x7d0] sm:$0xff]  }
 0x2dc   :  { %v3646_v2 = vpop.f32.mrf.mxu0  ;;  %v7002_v43 = vpop.f32.mrf.mxu1  ;;  %7277 = vmatmul.mubr.msk.bf16.vlgmr.msra.gmra.mxu0 %vm914_vm3, %v5433_v33  ;;  %7306 = vmatprep.subr.bf16.mxu1 %v7597_v0 }
 0x2dd   :  { %v3652_v44 = vadd.f32 %v3646_v2, %v8959_v6  ;;  %7293 = vmatpush3.bf16.msra.mxu0 %v7568_v29  ;;  %7300 = vmatprep.mubr.msk.bf16.mxu0 %vm7598_vm2, %v7597_v0  ;;  %v7572_v6 = vld [vmem:[%s9187_s2 + $0x7c8] sm:$0xff]  }
 0x2de   :  { %v6990_v36 = vpop.f32.mrf.mxu0  ;;  %v3726_v45 = vpop.f32.mrf.mxu1  ;;  %7294 = vmatprep.subr.bf16.mxu0 %v7597_v0 }
 0x2df   :  { %7307 = vmatpush3.bf16.msra.mxu1 %v7569_v39 }
 0x2e0   :  { %v3649_v46 = vpop.f32.mrf.mxu0  ;;  %v7003_v47 = vpop.f32.mrf.mxu1  ;;  %7308 = vmatprep.subr.bf16.mxu1 %v7597_v0 }
 0x2e1   :  { %7295 = vmatpush3.bf16.msra.mxu0 %v7570_v1 }
 0x2e2   :  { %v6991_v49 = vpop.f32.mrf.mxu0  ;;  %7296 = vmatprep.subr.bf16.mxu0 %v7597_v0 }
 0x2e3   :  { %7309 = vmatpush3.bf16.msra.mxu1 %v7571_v34 }
 0x2e4   :  { %7310 = vmatprep.subr.bf16.mxu1 %v7597_v0 }
 0x2e5   :  { %7297 = vmatpush3.bf16.msra.mxu0 %v7572_v6 }
 0x2e6   :  { %7298 = vmatprep.subr.bf16.mxu0 %v7597_v0 }
 0x2e7   :  { %7311 = vmatpush3.bf16.msra.mxu1 %v7573_v11 }
 0x2e9   :  { %7299 = vmatpush3.bf16.msra.mxu0 %v7574_v51 }
 0x2ea   :  { %v3877_v55 = vpop.f32.mrf.mxu1  ;;  %7313 = vmatmul.mubr.msk.bf16.vlgmr.msra.gmra.mxu1 %vm914_vm3, %v5664_v54 }
 0x2eb   :  { %v3883_v28 = vadd.f32 %v3877_v55, %v8995_v50 }
 0x2ec   :  { %v3800_v58 = vpop.f32.mrf.mxu0  ;;  %v7026_v18 = vpop.f32.mrf.mxu1  ;;  %7301 = vmatmul.mubr.msk.bf16.vlgmr.msra.gmra.mxu0 %vm914_vm3, %v5587_v15 }
 0x2ed   :  { %v3806_v5 = vadd.f32 %v3800_v58, %v9005_v40 }
 0x2ee   :  { %v7014_v30 = vpop.f32.mrf.mxu0  ;;  %v3880_v23 = vpop.f32.mrf.mxu1 }
 0x2f0   :  { %v3803_v0 = vpop.f32.mrf.mxu0  ;;  %v7027_v26 = vpop.f32.mrf.mxu1 }
 0x2f2   :  { %v7015_v24 = vpop.f32.mrf.mxu0 }
 0x2fa   :  { %v4031_v63 = vpop.f32.mrf.mxu1 }
 0x2fb   :  { %v4037_v27 = vadd.f32 %v4031_v63, %v9041_v57 }
 0x2fc   :  { %v3954_v38 = vpop.f32.mrf.mxu0  ;;  %v7050_v53 = vpop.f32.mrf.mxu1 }
 0x2fd   :  { %v3960_v21 = vadd.f32 %v3954_v38, %v9051_v61 }
 0x2fe   :  { %v7038_v8 = vpop.f32.mrf.mxu0  ;;  %v4034_v50 = vpop.f32.mrf.mxu1 }
 0x300   :  { %v3957_v41 = vpop.f32.mrf.mxu0  ;;  %v7051_v7 = vpop.f32.mrf.mxu1 }
 0x302   :  { %v7039_v62 = vpop.f32.mrf.mxu0 }
 0x30a   :  { %v4185_v56 = vpop.f32.mrf.mxu1 }
 0x30b   :  { %v4191_v40 = vadd.f32 %v4185_v56, %v9087_v42 }
 0x30c   :  { %v4108_v59 = vpop.f32.mrf.mxu0  ;;  %v7074_v19 = vpop.f32.mrf.mxu1 }
 0x30d   :  { %v4114_v4 = vadd.f32 %v4108_v59, %v9097_v10 }
 0x30e   :  { %v7062_v3 = vpop.f32.mrf.mxu0  ;;  %v4188_v48 = vpop.f32.mrf.mxu1 }
 0x310   :  { %v4111_v35 = vpop.f32.mrf.mxu0  ;;  %v7075_v57 = vpop.f32.mrf.mxu1 }
 0x312   :  { %v7063_v16 = vpop.f32.mrf.mxu0 }
 0x31a   :  { %v4339_v9 = vpop.f32.mrf.mxu1 }
 0x31b   :  { %v4345_v61 = vadd.f32 %v4339_v9, %v9133_v37 }
 0x31c   :  { %v4262_v12 = vpop.f32.mrf.mxu0  ;;  %v7098_v52 = vpop.f32.mrf.mxu1 }
 0x31d   :  { %v4268_v13 = vadd.f32 %v4262_v12, %v3652_v44 }
 0x31e   :  { %v7086_v60 = vpop.f32.mrf.mxu0  ;;  %v4342_v14 = vpop.f32.mrf.mxu1 }
 0x320   :  { %v4265_v17 = vpop.f32.mrf.mxu0  ;;  %v7099_v20 = vpop.f32.mrf.mxu1 }
 0x322   :  { %v7087_v42 = vpop.f32.mrf.mxu0 }
 0x32a   :  { %v4493_v22 = vpop.f32.mrf.mxu1 }
 0x32b   :  { %v4499_v32 = vadd.f32 %v4493_v22, %v3883_v28 }
 0x32c   :  { %v4416_v25 = vpop.f32.mrf.mxu0  ;;  %v7122_v10 = vpop.f32.mrf.mxu1 }
 0x32d   :  { %v9176_v29 = vadd.f32 %v4416_v25, %v3806_v5 }
 0x32e   :  { %v7110_v31 = vpop.f32.mrf.mxu0  ;;  %v4496_v33 = vpop.f32.mrf.mxu1 }
 0x330   :  { %v4419_v39 = vpop.f32.mrf.mxu0  ;;  %v7123_v2 = vpop.f32.mrf.mxu1 }
 0x332   :  { %v7111_v43 = vpop.f32.mrf.mxu0 }
 0x33a   :  { %v4647_v37 = vpop.f32.mrf.mxu1 }
 0x33b   :  { %v4653_v1 = vadd.f32 %v4647_v37, %v4037_v27 }
 0x33c   :  { %v4569_v36 = vpop.f32.mrf.mxu0  ;;  %v7146_v44 = vpop.f32.mrf.mxu1 }
 0x33d   :  { %v4575_v45 = vadd.f32 %v4569_v36, %v3960_v21 }
 0x33e   :  { %v7134_v34 = vpop.f32.mrf.mxu0  ;;  %v4650_v46 = vpop.f32.mrf.mxu1 }
 0x340   :  { %v4572_v47 = vpop.f32.mrf.mxu0  ;;  %v7147_v6 = vpop.f32.mrf.mxu1 }
 0x342   :  { %v7135_v49 = vpop.f32.mrf.mxu0 }
 0x34a   :  { %v4802_v11 = vpop.f32.mrf.mxu1 }
 0x34b   :  { %v4808_v51 = vadd.f32 %v4802_v11, %v4191_v40 }
 0x34c   :  { %v4725_v54 = vpop.f32.mrf.mxu0  ;;  %v7170_v55 = vpop.f32.mrf.mxu1 }
 0x34d   :  { %v4731_v15 = vadd.f32 %v4725_v54, %v4114_v4 }
 0x34e   :  { %v7158_v28 = vpop.f32.mrf.mxu0  ;;  %v4805_v58 = vpop.f32.mrf.mxu1 }
 0x350   :  { %v4728_v18 = vpop.f32.mrf.mxu0  ;;  %v7171_v5 = vpop.f32.mrf.mxu1 }
 0x352   :  { %v7159_v30 = vpop.f32.mrf.mxu0 }
 0x35a   :  { %v4956_v23 = vpop.f32.mrf.mxu1 }
 0x35b   :  { %v4962_v0 = vadd.f32 %v4956_v23, %v4345_v61 }
 0x35c   :  { %v4879_v26 = vpop.f32.mrf.mxu0  ;;  %v7194_v24 = vpop.f32.mrf.mxu1 }
 0x35d   :  { %v4885_v63 = vadd.f32 %v4879_v26, %v4268_v13  ;;  %v5740_v24 = vld [vmem:[%s9188_s3] sm:$0x7] }
 0x35e   :  { %v7182_v27 = vpop.f32.mrf.mxu0  ;;  %v4959_v38 = vpop.f32.mrf.mxu1 }
 0x35f   :  { %v5744_v38 = vrot.slane %v5740_v24, 1 }
 0x360   :  { %v4882_v53 = vpop.f32.mrf.mxu0  ;;  %v7195_v21 = vpop.f32.mrf.mxu1 }
 0x362   :  { %v7183_v8 = vpop.f32.mrf.mxu0 }
 0x363   :  { %v5751_v8 = vrot.slane %v5740_v24, 2 }
 0x36a   :  { %v5110_v50 = vpop.f32.mrf.mxu1 }
 0x36b   :  { %v5116_v41 = vadd.f32 %v5110_v50, %v4499_v32 }
 0x36c   :  { %v5033_v7 = vpop.f32.mrf.mxu0  ;;  %v7218_v62 = vpop.f32.mrf.mxu1 }
 0x36e   :  { %v7206_v56 = vpop.f32.mrf.mxu0  ;;  %v5113_v40 = vpop.f32.mrf.mxu1 }
 0x370   :  { %v5036_v59 = vpop.f32.mrf.mxu0  ;;  %v7219_v19 = vpop.f32.mrf.mxu1 }
 0x372   :  { %v7207_v4 = vpop.f32.mrf.mxu0 }
 0x37a   :  { %v5264_v3 = vpop.f32.mrf.mxu1 }
 0x37b   :  { %v5270_v57 = vadd.f32 %v5264_v3, %v4653_v1 }
 0x37c   :  { %v5187_v48 = vpop.f32.mrf.mxu0  ;;  %v7242_v35 = vpop.f32.mrf.mxu1 }
 0x37d   :  { %v5193_v16 = vadd.f32 %v5187_v48, %v4575_v45 }
 0x37e   :  { %v7230_v9 = vpop.f32.mrf.mxu0  ;;  %v5267_v61 = vpop.f32.mrf.mxu1 }
 0x37f   :  { %v5733_v12 = vadd.f32 %v5270_v57, %v5193_v16 }
 0x380   :  { %v5190_v52 = vpop.f32.mrf.mxu0  ;;  %v7243_v13 = vpop.f32.mrf.mxu1 }
 0x382   :  { %v7231_v60 = vpop.f32.mrf.mxu0 }
 0x38a   :  { %v5418_v14 = vpop.f32.mrf.mxu1 }
 0x38b   :  { %v5424_v42 = vadd.f32 %v5418_v14, %v4808_v51  ;;  %v5039_v51 = vadd.f32 %v5033_v7, %v9176_v29 }
 0x38c   :  { %v5341_v17 = vpop.f32.mrf.mxu0  ;;  %v7266_v20 = vpop.f32.mrf.mxu1 }
 0x38d   :  { %v5347_v22 = vadd.f32 %v5341_v17, %v4731_v15 }
 0x38e   :  { %v7254_v32 = vpop.f32.mrf.mxu0  ;;  %v5421_v25 = vpop.f32.mrf.mxu1 }
 0x38f   :  { %v5734_v10 = vadd.f32 %v5424_v42, %v5347_v22 }
 0x390   :  { %v5344_v31 = vpop.f32.mrf.mxu0  ;;  %v7267_v33 = vpop.f32.mrf.mxu1 }
 0x391   :  { %v5737_v39 = vadd.f32 %v5734_v10, %v5733_v12 }
 0x392   :  { %v7255_v2 = vpop.f32.mrf.mxu0 }
 0x39a   :  { %v5572_v43 = vpop.f32.mrf.mxu1 }
 0x39b   :  { %v5578_v36 = vadd.f32 %v5572_v43, %v4962_v0 }
 0x39c   :  { %v5495_v37 = vpop.f32.mrf.mxu0  ;;  %v7290_v1 = vpop.f32.mrf.mxu1 }
 0x39d   :  { %v5501_v44 = vadd.f32 %v5495_v37, %v4885_v63 }
 0x39e   :  { %v7278_v45 = vpop.f32.mrf.mxu0  ;;  %v5575_v34 = vpop.f32.mrf.mxu1 }
 0x39f   :  { %v5735_v46 = vadd.f32 %v5578_v36, %v5501_v44 }
 0x3a0   :  { %v5498_v47 = vpop.f32.mrf.mxu0  ;;  %v7291_v6 = vpop.f32.mrf.mxu1 }
 0x3a2   :  { %v7279_v49 = vpop.f32.mrf.mxu0 }
 0x3aa   :  { %v5726_v11 = vpop.f32.mrf.mxu1 }
 0x3ab   :  { %v5732_v15 = vadd.f32 %v5726_v11, %v5116_v41 }
 0x3ac   :  { %v5649_v54 = vpop.f32.mrf.mxu0  ;;  %v7314_v55 = vpop.f32.mrf.mxu1 }
 0x3ad   :  { %v5655_v28 = vadd.f32 %v5649_v54, %v5039_v51 }
 0x3ae   :  { %v7302_v58 = vpop.f32.mrf.mxu0  ;;  %v5729_v18 = vpop.f32.mrf.mxu1 }
 0x3af   :  { %v5736_v5 = vadd.f32 %v5732_v15, %v5655_v28 }
 0x3b0   :  { %v5652_v30 = vpop.f32.mrf.mxu0  ;;  %v7315_v23 = vpop.f32.mrf.mxu1 }
 0x3b1   :  { %v5738_v0 = vadd.f32 %v5736_v5, %v5735_v46 }
 0x3b2   :  { %v7303_v26 = vpop.f32.mrf.mxu0 }
 0x3b3   :  { %v5739_v63 = vadd.f32 %v5738_v0, %v5737_v39 }
 0x3b5   :  { %v5741_v27 = vadd.f32 %v5740_v24, %v5739_v63 }
 0x3b7   :  { %v5742_v53 = vmax.f32 %v5741_v27, 0.0 }
 0x3b9   :  { %v5746_v29 = vmul.f32 %v5744_v38, %v5742_v53 }
 0x3bb   :  { %v5748_v21 = vsel %vm5747_vm4, %v5746_v29, 0.0 }
 0x3bc   :  { %5749 = vadd.xlane.f32.xlu0 %v5748_v21 }
 0x445   :  { %v5750_v50 = vpop.xlane.xlu0 %5749 }
 0x446   :  { %v5753_v41 = vadd.f32 %v5751_v8, %v5750_v50 }
 0x448   :  { %5755 = vst.msk [vmem:[#allocation2] sm:$0x1] %vm5754_vm5, %v5753_v41 }
 0x449   :  { %7586 = shalt.err (!%p7583_p4)
}
 0x44a   :  { %5765 = dma.vmem_to_hbm [thread:$0]  %s5763_s15, 16, %s9189_s4, [#allocation3]  }
 0x44b   :  { %7595 = dma.done.wait [#allocation3], 16  }
 0x44c   :  { %7596 = vsyncadd [#allocation3], 4294967280 }
 0x44d   :  { %5769 = vsyncpa [#allocation3], 1 }

</bundles_post_ra>
